<compile_context>
chip_gen: v7x
topology: tpu7x:2x2x1
jax: 0.10.0
libtpu: 0.0.40
codegen_flags: <defaults>
</compile_context>

<pallas_src>
import math

import jax
import jax.numpy as jnp
from jax import lax
from jax.experimental import pallas as pl
from jax.experimental.pallas import tpu as pltpu


def _softplus(x):
    # Numerically-stable softplus, matches F.softplus(beta=1).
    return jnp.log1p(jnp.exp(-jnp.abs(x))) + jnp.maximum(x, 0.0)


def _make_kernel(names, has_obs, has_nt, min_std, act, t_blk, b_blk,
                 H, S, A, E, N, out_pad, unroll):
    """Build the per-grid-step kernel body (flags/sizes are static)."""
    NW = 2 * S if has_obs else S
    a_lo, a_hi = 0, A
    nz_lo, nz_hi = A, A + NW
    nt_lo, nt_hi = nz_hi, nz_hi + (S if has_nt else 0)
    ob_lo, ob_hi = nt_hi, nt_hi + (E if has_obs else 0)
    TB = t_blk * b_blk

    def kernel(*refs):
        it = iter(refs)
        prev_h_ref = next(it)
        prev_s_ref = next(it)
        slab_ref = next(it)                    # (t_blk, b_blk, F) fused inputs
        w = {nm: next(it) for nm in names}
        o_ref = next(it)                       # (t_blk, b_blk, out_width_p)
        h_scr = next(it)                       # (b_blk, H)  GRU hidden carry
        s_scr = next(it)                       # (b_blk, S)  latent state carry
        h_all = next(it)                       # (t_blk, b_blk, H)
        t_mean = next(it)                      # (t_blk, b_blk, S)
        t_std = next(it)                       # (t_blk, b_blk, S)
        t_state = next(it)                     # (t_blk, b_blk, S)
        pre_sa = next(it)                      # (t_blk, b_blk, H)
        pre_obs = next(it) if has_obs else None  # (t_blk, b_blk, N)

        # Initialize the carried state at the first time block of each batch
        # chunk (time is the inner grid axis, so it resets per batch chunk).
        @pl.when(pl.program_id(1) == 0)
        def _():
            h_scr[...] = prev_h_ref[...]
            s_scr[...] = prev_s_ref[...]

        def mm(a, w_ref):
            # bf16 (or f32) at the MXU, f32 accumulation.
            return jnp.dot(a.astype(w_ref.dtype), w_ref[...],
                           preferred_element_type=jnp.float32)

        # ---- Hoisted, batched (M = t_blk*b_blk) embeds for the whole block ----
        acts = slab_ref[:, :, a_lo:a_hi].reshape(TB, A)
        pre_sa[...] = (mm(acts, w["W_sa_a"]) +
                       w["b_sa"][...]).reshape(t_blk, b_blk, H)
        if has_obs:
            obs_x = slab_ref[:, :, ob_lo:ob_hi].reshape(TB, E)
            pre_obs[...] = (mm(obs_x, w["W_eq_e"]) +
                            w["b_eq"][...]).reshape(t_blk, b_blk, N)

        # Per-step bias broadcasts hoisted out of the loop (no CSE in-loop).
        b_i = jnp.broadcast_to(w["b_i"][...], (b_blk, 3 * H))
        b_hn = jnp.broadcast_to(w["b_hn"][...], (b_blk, H))
        if has_obs:
            b_tail = jnp.broadcast_to(w["b_q"][...], (b_blk, 2 * S))
            b_head = None
        else:
            b_head = jnp.broadcast_to(w["b_ep"][...], (b_blk, N))
            b_tail = jnp.broadcast_to(w["b_p"][...], (b_blk, 2 * S))

        h0 = h_scr[...]
        s0 = s_scr[...]
        # Prime the hidden-to-gates projection; inside the loop gh for step t+1
        # is produced by the fused W_hcat matmul of step t (software pipeline).
        gh0 = mm(h0, w["W_hcat"])[:, :3 * H]

        def body(lt, carry):
            h, s, gh = carry
            row = slab_ref[lt]                         # (b_blk, F), one load
            state = s
            if has_nt:
                state = state * row[:, nt_lo:nt_hi]

            # fc_embed_state_action: state part per-step, action part hoisted.
            x = act(mm(state, w["W_sa_s"]) + pre_sa[lt])

            # GRUCell (PyTorch gate order r|z|n); one sigmoid over 2H lanes.
            gi = mm(x, w["W_i"]) + b_i                 # (b_blk, 3H)
            rz = jax.nn.sigmoid(gi[:, :2 * H] + gh[:, :2 * H])
            r = rz[:, :H]
            z = rz[:, H:]
            n = jnp.tanh(gi[:, 2 * H:] + r * (gh[:, 2 * H:] + b_hn))
            h = (1.0 - z) * n + z * h
            h_all[lt] = h

            # One fused h-consuming matmul: [gates for t+1 | head embed for t].
            hcat = mm(h, w["W_hcat"])                  # (b_blk, 3H + N)
            gh_next = hcat[:, :3 * H]
            head = hcat[:, 3 * H:]

            if has_obs:
                # Posterior feeds the recurrence -> stays in the loop.
                q = act(head + pre_obs[lt])
                qq = mm(q, w["W_q"]) + b_tail          # (b_blk, 2S)
                nz = row[:, nz_lo + S:nz_hi]
            else:
                # Prior feeds the recurrence -> stays in the loop.
                p = act(head + b_head)
                qq = mm(p, w["W_p"]) + b_tail
                nz = row[:, nz_lo:nz_hi]
            mean = qq[:, :S]
            std = _softplus(qq[:, S:]) + min_std
            samp = mean + std * nz
            t_mean[lt] = mean
            t_std[lt] = std
            t_state[lt] = samp
            return (h, samp, gh_next)

        h_fin, s_fin, _ = lax.fori_loop(0, t_blk, body, (h0, s0, gh0),
                                        unroll=unroll)
        # Carry the recurrence to the next time block.
        h_scr[...] = h_fin
        s_scr[...] = s_fin

        # ---- Assemble the lane-dense output slab with ONE full-width store ----
        H_all = h_all[...]
        if has_obs:
            # Prior head does not feed the recurrence: batched over the block.
            Hf = H_all.reshape(TB, H)
            p = act(mm(Hf, w["W_ep"]) + w["b_ep"][...])
            pp = mm(p, w["W_p"]) + w["b_p"][...]       # (TB, 2S)
            p_mean = pp[:, :S]
            p_std = _softplus(pp[:, S:]) + min_std
            nz_p = slab_ref[:, :, nz_lo:nz_lo + S].reshape(TB, S)
            p_state = p_mean + p_std * nz_p
            pieces = [H_all,
                      p_mean.reshape(t_blk, b_blk, S),
                      p_std.reshape(t_blk, b_blk, S),
                      p_state.reshape(t_blk, b_blk, S),
                      t_mean[...], t_std[...], t_state[...]]
        else:
            pieces = [H_all, t_mean[...], t_std[...], t_state[...]]
        if out_pad > 0:
            pieces.append(jnp.zeros((t_blk, b_blk, out_pad), jnp.float32))
        o_ref[...] = jnp.concatenate(pieces, axis=-1)

    return kernel


def recurrent_dynamics(params, prev_hidden, prev_state, actions, obs=None,
                       non_terms=None, *, act_fn="relu", min_std=0.1,
                       noise_key=None, t_block=None, batch_block=None,
                       matmul_dtype=jnp.bfloat16, vmem_limit_bytes=None):
    """Pallas implementation of RecurrentDynamics.forward."""
    Tm1, B, A = actions.shape
    H = prev_hidden.shape[1]
    S = prev_state.shape[1]
    N = params["W_ep"].shape[1]
    E = obs.shape[2] if obs is not None else 0
    has_obs = obs is not None
    has_nt = non_terms is not None
    act = getattr(jax.nn, act_fn)

    # Time blocking: whole sequence resident for short sequences, else 64-step
    # blocks (amortizes the ~0.35us per-grid-step pipeline overhead).
    if t_block is None:
        t_block = Tm1 if Tm1 <= 128 else 64
    t_block = max(1, min(int(t_block), Tm1))
    n_tblocks = pl.cdiv(Tm1, t_block)
    Tp = n_tblocks * t_block
    unroll = t_block if t_block <= 8 else math.gcd(t_block, 8)

    # Optional batch split: on v7x set batch_block=B//2 so both TensorCores
    # work (batch axis is "parallel"); default is no split (best on v5e/v6e).
    if batch_block is None:
        batch_block = B
    assert B % batch_block == 0 and (batch_block == B or batch_block % 8 == 0)
    n_bblocks = B // batch_block

    # Noise reproduces torch.randn_like (precomputed; see TODO at top).
    if noise_key is None:
        noise_key = jax.random.PRNGKey(0)
    noise_w = 2 * S if has_obs else S
    noise = jax.random.normal(noise_key, (Tm1, B, noise_w), jnp.float32)

    # One fused per-step input slab: [actions | noise | non_terms? | obs?].
    parts = [actions.astype(jnp.float32), noise]
    if has_nt:
        parts.append(non_terms.astype(jnp.float32))
    if has_obs:
        parts.append(obs.astype(jnp.float32))
    slab = jnp.concatenate(parts, axis=-1)
    F = slab.shape[-1]
    if Tp != Tm1:
        slab = jnp.concatenate(
            [slab, jnp.zeros((Tp - Tm1, B, F), jnp.float32)], axis=0)

    # Fused weights, built once from the checkpoint-shaped parameter dict.
    mat = lambda x: jnp.asarray(x, jnp.float32).astype(matmul_dtype)
    vec = lambda x: jnp.asarray(x, jnp.float32)
    W_hcat = jnp.concatenate(
        [params["W_h"], params["W_eq_h"] if has_obs else params["W_ep"]],
        axis=1)
    weights = [("W_sa_s", mat(params["W_sa_s"])),
               ("W_sa_a", mat(params["W_sa_a"])),
               ("b_sa", vec(params["b_sa"])),
               ("W_i", mat(params["W_i"])),
               ("b_i", vec(params["b_i"])),
               ("b_hn", vec(params["b_hn"])),
               ("W_hcat", mat(W_hcat))]
    if has_obs:
        weights += [("W_eq_e", mat(params["W_eq_e"])),
                    ("b_eq", vec(params["b_eq"])),
                    ("W_q", mat(params["W_q"])),
                    ("b_q", vec(params["b_q"])),
                    ("W_ep", mat(params["W_ep"])),
                    ("b_ep", vec(params["b_ep"])),
                    ("W_p", mat(params["W_p"])),
                    ("b_p", vec(params["b_p"]))]
    else:
        weights += [("b_ep", vec(params["b_ep"])),
                    ("W_p", mat(params["W_p"])),
                    ("b_p", vec(params["b_p"]))]
    names = [nm for nm, _ in weights]

    # Lane-dense fused output slab (width padded to a multiple of 128 lanes).
    out_width = H + 3 * S + (3 * S if has_obs else 0)
    out_width_p = ((out_width + 127) // 128) * 128
    out_pad = out_width_p - out_width

    bb, tb = batch_block, t_block
    in_specs = [pl.BlockSpec((bb, H), lambda b, t: (b, 0)),
                pl.BlockSpec((bb, S), lambda b, t: (b, 0)),
                pl.BlockSpec((tb, bb, F), lambda b, t: (t, b, 0))]
    # Constant-index (resident) weight blocks.
    in_specs += [pl.BlockSpec(wv.shape, lambda b, t: (0, 0))
                 for _, wv in weights]
    out_spec = pl.BlockSpec((tb, bb, out_width_p), lambda b, t: (t, b, 0))
    out_shape = jax.ShapeDtypeStruct((Tp, B, out_width_p), jnp.float32)

    scratch = [pltpu.VMEM((bb, H), jnp.float32),      # GRU hidden carry
               pltpu.VMEM((bb, S), jnp.float32),      # latent state carry
               pltpu.VMEM((tb, bb, H), jnp.float32),  # per-block hidden history
               pltpu.VMEM((tb, bb, S), jnp.float32),  # in-loop head: mean
               pltpu.VMEM((tb, bb, S), jnp.float32),  # in-loop head: std
               pltpu.VMEM((tb, bb, S), jnp.float32),  # in-loop head: sample
               pltpu.VMEM((tb, bb, H), jnp.float32)]  # hoisted action embed
    if has_obs:
        scratch.append(pltpu.VMEM((tb, bb, N), jnp.float32))  # hoisted obs embed

    kernel = _make_kernel(names, has_obs, has_nt, float(min_std), act,
                          tb, bb, H, S, A, E, N, out_pad, unroll)

    fused = pl.pallas_call(
        kernel,
        out_shape=out_shape,
        grid_spec=pltpu.PrefetchScalarGridSpec(
            num_scalar_prefetch=0,
            grid=(n_bblocks, n_tblocks),   # (parallel batch, serial time)
            in_specs=in_specs,
            out_specs=out_spec,
            scratch_shapes=scratch),
        compiler_params=pltpu.CompilerParams(
            dimension_semantics=("parallel", "arbitrary"),
            vmem_limit_bytes=vmem_limit_bytes),
    )(prev_hidden.astype(jnp.float32), prev_state.astype(jnp.float32), slab,
      *[wv for _, wv in weights])

    fused = fused[:Tm1]
    result = {
        "hiddens": fused[:, :, :H],
        "prior_means": fused[:, :, H:H + S],
        "prior_stds": fused[:, :, H + S:H + 2 * S],
        "prior_states": fused[:, :, H + 2 * S:H + 3 * S],
    }
    if has_obs:
        base = H + 3 * S
        result.update({
            "posterior_means": fused[:, :, base:base + S],
            "posterior_stds": fused[:, :, base + S:base + 2 * S],
            "posterior_states": fused[:, :, base + 2 * S:base + 3 * S],
        })
    return result


def init_params(key, hidden_size, state_size, action_size, node_size, embedding_size):
    """Deterministic init mirroring torch's default U(-1/sqrt(fan_in), ...).
    (From a torch checkpoint: W_i/W_h are weight_ih.T / weight_hh.T with r|z|n
    column order; b_i = [b_ir+b_hr, b_iz+b_hz, b_in]; b_hn kept separately.)"""
    H, S, A, N, E = hidden_size, state_size, action_size, node_size, embedding_size

    def uniform(k, shape, fan_in):
        bound = 1.0 / float(fan_in) ** 0.5
        return jax.random.uniform(k, shape, jnp.float32, -bound, bound)

    keys = iter(jax.random.split(key, 24))
    p = {}
    # fc_embed_state_action: Linear(S + A, H), stored row-split [S,H] / [A,H].
    p["W_sa_s"] = uniform(next(keys), (S, H), S + A)
    p["W_sa_a"] = uniform(next(keys), (A, H), S + A)
    p["b_sa"] = uniform(next(keys), (1, H), S + A)
    # GRUCell(H, H): fused gate weights (r|z|n) along the output axis.
    p["W_i"] = uniform(next(keys), (H, 3 * H), H)
    p["W_h"] = uniform(next(keys), (H, 3 * H), H)
    p["b_i"] = uniform(next(keys), (1, 3 * H), H)
    p["b_hn"] = uniform(next(keys), (1, H), H)
    # fc_embed_prior: Linear(H, N)
    p["W_ep"] = uniform(next(keys), (H, N), H)
    p["b_ep"] = uniform(next(keys), (1, N), H)
    # fc_prior: Linear(N, 2S), mean | raw-std columns.
    p["W_p"] = uniform(next(keys), (N, 2 * S), N)
    p["b_p"] = uniform(next(keys), (1, 2 * S), N)
    # fc_embed_posterior: Linear(H + E, N), stored row-split [H,N] / [E,N].
    p["W_eq_h"] = uniform(next(keys), (H, N), H + E)
    p["W_eq_e"] = uniform(next(keys), (E, N), H + E)
    p["b_eq"] = uniform(next(keys), (1, N), H + E)
    # fc_posterior: Linear(N, 2S), mean | raw-std columns.
    p["W_q"] = uniform(next(keys), (N, 2 * S), N)
    p["b_q"] = uniform(next(keys), (1, 2 * S), N)
    return p


if __name__ == "__main__":
    key = jax.random.PRNGKey(0)
    B, H, S, A, N, E, seq = 8, 32, 16, 8, 32, 24, 8
    kparam, kh, ks, ka, ko, knoise = jax.random.split(key, 6)

    params = init_params(kparam, H, S, A, N, E)
    prev_hidden = jax.random.normal(kh, (B, H), jnp.float32)
    prev_state = jax.random.normal(ks, (B, S), jnp.float32)
    actions = jax.random.normal(ka, (seq, B, A), jnp.float32)
    obs = jax.random.normal(ko, (seq, B, E), jnp.float32)
    non_terms = jnp.ones((seq, B, S), jnp.float32)

    # Posterior path (obs + non_terms supplied).
    out_post = recurrent_dynamics(params, prev_hidden, prev_state, actions,
                                  obs=obs, non_terms=non_terms,
                                  noise_key=knoise)
    # Prior-only path (obs is None), whole sequence in one block.
    out_prior = recurrent_dynamics(params, prev_hidden, prev_state, actions,
                                   noise_key=knoise)
    # Prior-only path again with t_block=4 to exercise the cross-block carry.
    out_prior_blk = recurrent_dynamics(params, prev_hidden, prev_state, actions,
                                       noise_key=knoise, t_block=4)

    jax.tree_util.tree_map(jax.block_until_ready, out_post)
    jax.tree_util.tree_map(jax.block_until_ready, out_prior)
    jax.tree_util.tree_map(jax.block_until_ready, out_prior_blk)

    assert out_post["hiddens"].shape == (seq, B, H)
    assert out_post["posterior_states"].shape == (seq, B, S)
    assert out_prior["prior_states"].shape == (seq, B, S)
    assert bool(jnp.all(jnp.isfinite(out_post["posterior_states"])))
    assert bool(jnp.all(jnp.isfinite(out_prior["prior_states"])))
    # Cross-block carry must reproduce the single-block result.
    assert bool(jnp.allclose(out_prior["prior_states"],
                             out_prior_blk["prior_states"],
                             atol=1e-4, rtol=1e-4))
    print("KERNEL_OK")
</pallas_src>

<mosaic_0001>
module attributes {stable_mosaic.version = 11 : i64} {
  func.func @kernel(%arg0: i32, %arg1: i32, %arg2: memref<8x32xf32, #tpu.memory_space<vmem>>, %arg3: memref<8x16xf32, #tpu.memory_space<vmem>>, %arg4: memref<8x8x80xf32, #tpu.memory_space<vmem>>, %arg5: memref<16x32xbf16, #tpu.memory_space<vmem>>, %arg6: memref<8x32xbf16, #tpu.memory_space<vmem>>, %arg7: memref<1x32xf32, #tpu.memory_space<vmem>>, %arg8: memref<32x96xbf16, #tpu.memory_space<vmem>>, %arg9: memref<1x96xf32, #tpu.memory_space<vmem>>, %arg10: memref<1x32xf32, #tpu.memory_space<vmem>>, %arg11: memref<32x128xbf16, #tpu.memory_space<vmem>>, %arg12: memref<24x32xbf16, #tpu.memory_space<vmem>>, %arg13: memref<1x32xf32, #tpu.memory_space<vmem>>, %arg14: memref<32x32xbf16, #tpu.memory_space<vmem>>, %arg15: memref<1x32xf32, #tpu.memory_space<vmem>>, %arg16: memref<32x32xbf16, #tpu.memory_space<vmem>>, %arg17: memref<1x32xf32, #tpu.memory_space<vmem>>, %arg18: memref<32x32xbf16, #tpu.memory_space<vmem>>, %arg19: memref<1x32xf32, #tpu.memory_space<vmem>>, %arg20: memref<8x8x128xf32, #tpu.memory_space<vmem>>, %arg21: memref<8x32xf32, #tpu.memory_space<vmem>>, %arg22: memref<8x16xf32, #tpu.memory_space<vmem>>, %arg23: memref<8x8x32xf32, #tpu.memory_space<vmem>>, %arg24: memref<8x8x16xf32, #tpu.memory_space<vmem>>, %arg25: memref<8x8x16xf32, #tpu.memory_space<vmem>>, %arg26: memref<8x8x16xf32, #tpu.memory_space<vmem>>, %arg27: memref<8x8x32xf32, #tpu.memory_space<vmem>>, %arg28: memref<8x8x32xf32, #tpu.memory_space<vmem>>) attributes {dimension_semantics = [#tpu.dimension_semantics<parallel>, #tpu.dimension_semantics<arbitrary>], iteration_bounds = array<i64: 1, 1>, scalar_prefetch = 0 : i64, scratch_operands = 8 : i64, tpu.core_type = #tpu.core_type<tc>, window_params = [{transform_indices = @transform_0, window_bounds = array<i64: 8, 32>}, {transform_indices = @transform_1, window_bounds = array<i64: 8, 16>}, {transform_indices = @transform_2, window_bounds = array<i64: 8, 8, 80>}, {pipeline_mode = #tpu.pipeline_mode<synchronous>, transform_indices = @transform_3, window_bounds = array<i64: 16, 32>}, {pipeline_mode = #tpu.pipeline_mode<synchronous>, transform_indices = @transform_4, window_bounds = array<i64: 8, 32>}, {pipeline_mode = #tpu.pipeline_mode<synchronous>, transform_indices = @transform_5, window_bounds = array<i64: 1, 32>}, {pipeline_mode = #tpu.pipeline_mode<synchronous>, transform_indices = @transform_6, window_bounds = array<i64: 32, 96>}, {pipeline_mode = #tpu.pipeline_mode<synchronous>, transform_indices = @transform_7, window_bounds = array<i64: 1, 96>}, {pipeline_mode = #tpu.pipeline_mode<synchronous>, transform_indices = @transform_8, window_bounds = array<i64: 1, 32>}, {pipeline_mode = #tpu.pipeline_mode<synchronous>, transform_indices = @transform_9, window_bounds = array<i64: 32, 128>}, {pipeline_mode = #tpu.pipeline_mode<synchronous>, transform_indices = @transform_10, window_bounds = array<i64: 24, 32>}, {pipeline_mode = #tpu.pipeline_mode<synchronous>, transform_indices = @transform_11, window_bounds = array<i64: 1, 32>}, {pipeline_mode = #tpu.pipeline_mode<synchronous>, transform_indices = @transform_12, window_bounds = array<i64: 32, 32>}, {pipeline_mode = #tpu.pipeline_mode<synchronous>, transform_indices = @transform_13, window_bounds = array<i64: 1, 32>}, {pipeline_mode = #tpu.pipeline_mode<synchronous>, transform_indices = @transform_14, window_bounds = array<i64: 32, 32>}, {pipeline_mode = #tpu.pipeline_mode<synchronous>, transform_indices = @transform_15, window_bounds = array<i64: 1, 32>}, {pipeline_mode = #tpu.pipeline_mode<synchronous>, transform_indices = @transform_16, window_bounds = array<i64: 32, 32>}, {pipeline_mode = #tpu.pipeline_mode<synchronous>, transform_indices = @transform_17, window_bounds = array<i64: 1, 32>}, {transform_indices = @transform_18, window_bounds = array<i64: 8, 8, 128>}]} {
    %c0_i32 = arith.constant 0 : i32
    %0 = arith.cmpi eq, %arg1, %c0_i32 : i32
    %1 = arith.extui %0 : i1 to i32
    %c0_i32_0 = arith.constant 0 : i32
    %2 = arith.cmpi ne, %1, %c0_i32_0 : i32
    scf.if %2 {
      %c0_333 = arith.constant 0 : index
      %c0_334 = arith.constant 0 : index
      %760 = vector.load %arg2[%c0_333, %c0_334] : memref<8x32xf32, #tpu.memory_space<vmem>>, vector<8x32xf32>
      %c0_335 = arith.constant 0 : index
      %c0_336 = arith.constant 0 : index
      %761 = vector.load %arg21[%c0_335, %c0_336] : memref<8x32xf32, #tpu.memory_space<vmem>>, vector<8x32xf32>
      tpu.vector_store %arg21[%c0_335, %c0_336], %760 {strides = array<i32>} : memref<8x32xf32, #tpu.memory_space<vmem>>, vector<8x32xf32>,
      %c0_337 = arith.constant 0 : index
      %c0_338 = arith.constant 0 : index
      %762 = vector.load %arg3[%c0_337, %c0_338] : memref<8x16xf32, #tpu.memory_space<vmem>>, vector<8x16xf32>
      %c0_339 = arith.constant 0 : index
      %c0_340 = arith.constant 0 : index
      %763 = vector.load %arg22[%c0_339, %c0_340] : memref<8x16xf32, #tpu.memory_space<vmem>>, vector<8x16xf32>
      tpu.vector_store %arg22[%c0_339, %c0_340], %762 {strides = array<i32>} : memref<8x16xf32, #tpu.memory_space<vmem>>, vector<8x16xf32>,
    } else {
    }
    %c0 = arith.constant 0 : index
    %c0_1 = arith.constant 0 : index
    %c0_2 = arith.constant 0 : index
    %3 = vector.load %arg4[%c0, %c0_1, %c0_2] : memref<8x8x80xf32, #tpu.memory_space<vmem>>, vector<8x8x8xf32>
    %4 = vector.shape_cast %3 : vector<8x8x8xf32> to vector<64x8xf32>
    %5 = arith.truncf %4 : vector<64x8xf32> to vector<64x8xbf16>
    %c0_3 = arith.constant 0 : index
    %c0_4 = arith.constant 0 : index
    %6 = vector.load %arg6[%c0_3, %c0_4] : memref<8x32xbf16, #tpu.memory_space<vmem>>, vector<8x32xbf16>
    %cst = arith.constant dense<0.000000e+00> : vector<64x32xf32>
    %7 = tpu.matmul %5, %6, %cst {dimension_numbers = #tpu.dot_dimension_numbers<[1], [0], [0], [1], [0, 0, 1, 1], [], []>} : vector<64x8xbf16>, vector<8x32xbf16>, vector<64x32xf32> -> vector<64x32xf32>
    %c0_5 = arith.constant 0 : index
    %c0_6 = arith.constant 0 : index
    %8 = vector.load %arg7[%c0_5, %c0_6] : memref<1x32xf32, #tpu.memory_space<vmem>>, vector<1x32xf32>
    %9 = vector.broadcast %8 : vector<1x32xf32> to vector<64x32xf32>
    %10 = arith.addf %7, %9 : vector<64x32xf32>
    %11 = vector.shape_cast %10 : vector<64x32xf32> to vector<8x8x32xf32>
    %c0_7 = arith.constant 0 : index
    %c0_8 = arith.constant 0 : index
    %c0_9 = arith.constant 0 : index
    %12 = vector.load %arg27[%c0_7, %c0_8, %c0_9] : memref<8x8x32xf32, #tpu.memory_space<vmem>>, vector<8x8x32xf32>
    tpu.vector_store %arg27[%c0_7, %c0_8, %c0_9], %11 {strides = array<i32>} : memref<8x8x32xf32, #tpu.memory_space<vmem>>, vector<8x8x32xf32>,
    %c0_10 = arith.constant 0 : index
    %c0_11 = arith.constant 0 : index
    %c56 = arith.constant 56 : index
    %13 = vector.load %arg4[%c0_10, %c0_11, %c56] : memref<8x8x80xf32, #tpu.memory_space<vmem>>, vector<8x8x24xf32>
    %14 = vector.shape_cast %13 : vector<8x8x24xf32> to vector<64x24xf32>
    %15 = arith.truncf %14 : vector<64x24xf32> to vector<64x24xbf16>
    %c0_12 = arith.constant 0 : index
    %c0_13 = arith.constant 0 : index
    %16 = vector.load %arg12[%c0_12, %c0_13] : memref<24x32xbf16, #tpu.memory_space<vmem>>, vector<24x32xbf16>
    %cst_14 = arith.constant dense<0.000000e+00> : vector<64x32xf32>
    %17 = tpu.matmul %15, %16, %cst_14 {dimension_numbers = #tpu.dot_dimension_numbers<[1], [0], [0], [1], [0, 0, 1, 1], [], []>} : vector<64x24xbf16>, vector<24x32xbf16>, vector<64x32xf32> -> vector<64x32xf32>
    %c0_15 = arith.constant 0 : index
    %c0_16 = arith.constant 0 : index
    %18 = vector.load %arg13[%c0_15, %c0_16] : memref<1x32xf32, #tpu.memory_space<vmem>>, vector<1x32xf32>
    %19 = vector.broadcast %18 : vector<1x32xf32> to vector<64x32xf32>
    %20 = arith.addf %17, %19 : vector<64x32xf32>
    %21 = vector.shape_cast %20 : vector<64x32xf32> to vector<8x8x32xf32>
    %c0_17 = arith.constant 0 : index
    %c0_18 = arith.constant 0 : index
    %c0_19 = arith.constant 0 : index
    %22 = vector.load %arg28[%c0_17, %c0_18, %c0_19] : memref<8x8x32xf32, #tpu.memory_space<vmem>>, vector<8x8x32xf32>
    tpu.vector_store %arg28[%c0_17, %c0_18, %c0_19], %21 {strides = array<i32>} : memref<8x8x32xf32, #tpu.memory_space<vmem>>, vector<8x8x32xf32>,
    %c0_20 = arith.constant 0 : index
    %c0_21 = arith.constant 0 : index
    %23 = vector.load %arg9[%c0_20, %c0_21] : memref<1x96xf32, #tpu.memory_space<vmem>>, vector<1x96xf32>
    %24 = vector.shape_cast %23 : vector<1x96xf32> to vector<1x96xf32>
    %25 = vector.broadcast %24 : vector<1x96xf32> to vector<8x96xf32>
    %c0_22 = arith.constant 0 : index
    %c0_23 = arith.constant 0 : index
    %26 = vector.load %arg10[%c0_22, %c0_23] : memref<1x32xf32, #tpu.memory_space<vmem>>, vector<1x32xf32>
    %27 = vector.shape_cast %26 : vector<1x32xf32> to vector<1x32xf32>
    %28 = vector.broadcast %27 : vector<1x32xf32> to vector<8x32xf32>
    %c0_24 = arith.constant 0 : index
    %c0_25 = arith.constant 0 : index
    %29 = vector.load %arg15[%c0_24, %c0_25] : memref<1x32xf32, #tpu.memory_space<vmem>>, vector<1x32xf32>
    %30 = vector.shape_cast %29 : vector<1x32xf32> to vector<1x32xf32>
    %31 = vector.broadcast %30 : vector<1x32xf32> to vector<8x32xf32>
    %c0_26 = arith.constant 0 : index
    %c0_27 = arith.constant 0 : index
    %32 = vector.load %arg21[%c0_26, %c0_27] : memref<8x32xf32, #tpu.memory_space<vmem>>, vector<8x32xf32>
    %c0_28 = arith.constant 0 : index
    %c0_29 = arith.constant 0 : index
    %33 = vector.load %arg22[%c0_28, %c0_29] : memref<8x16xf32, #tpu.memory_space<vmem>>, vector<8x16xf32>
    %34 = arith.truncf %32 : vector<8x32xf32> to vector<8x32xbf16>
    %c0_30 = arith.constant 0 : index
    %c0_31 = arith.constant 0 : index
    %35 = vector.load %arg11[%c0_30, %c0_31] : memref<32x128xbf16, #tpu.memory_space<vmem>>, vector<32x128xbf16>
    %cst_32 = arith.constant dense<0.000000e+00> : vector<8x128xf32>
    %36 = tpu.matmul %34, %35, %cst_32 {dimension_numbers = #tpu.dot_dimension_numbers<[1], [0], [0], [1], [0, 0, 1, 1], [], []>} : vector<8x32xbf16>, vector<32x128xbf16>, vector<8x128xf32> -> vector<8x128xf32>
    %37 = vector.extract_strided_slice %36 {offsets = [0, 0], sizes = [8, 96], strides = [1, 1]} : vector<8x128xf32> to vector<8x96xf32>
    %c0_i32_33 = arith.constant 0 : i32
    %38 = arith.index_cast %c0_i32_33 : i32 to index
    %c0_34 = arith.constant 0 : index
    %c0_35 = arith.constant 0 : index
    %39 = vector.load %arg4[%38, %c0_34, %c0_35] : memref<8x8x80xf32, #tpu.memory_space<vmem>>, vector<1x8x80xf32>
    %40 = vector.shape_cast %39 : vector<1x8x80xf32> to vector<8x80xf32>
    %41 = vector.extract_strided_slice %40 {offsets = [0, 40], sizes = [8, 16], strides = [1, 1]} : vector<8x80xf32> to vector<8x16xf32>
    %42 = arith.mulf %33, %41 : vector<8x16xf32>
    %43 = arith.truncf %42 : vector<8x16xf32> to vector<8x16xbf16>
    %c0_36 = arith.constant 0 : index
    %c0_37 = arith.constant 0 : index
    %44 = vector.load %arg5[%c0_36, %c0_37] : memref<16x32xbf16, #tpu.memory_space<vmem>>, vector<16x32xbf16>
    %cst_38 = arith.constant dense<0.000000e+00> : vector<8x32xf32>
    %45 = tpu.matmul %43, %44, %cst_38 {dimension_numbers = #tpu.dot_dimension_numbers<[1], [0], [0], [1], [0, 0, 1, 1], [], []>} : vector<8x16xbf16>, vector<16x32xbf16>, vector<8x32xf32> -> vector<8x32xf32>
    %46 = arith.index_cast %c0_i32_33 : i32 to index
    %c0_39 = arith.constant 0 : index
    %c0_40 = arith.constant 0 : index
    %47 = vector.load %arg27[%46, %c0_39, %c0_40] : memref<8x8x32xf32, #tpu.memory_space<vmem>>, vector<1x8x32xf32>
    %48 = vector.shape_cast %47 : vector<1x8x32xf32> to vector<8x32xf32>
    %49 = arith.addf %45, %48 : vector<8x32xf32>
    %cst_41 = arith.constant 0.000000e+00 : f32
    %50 = vector.broadcast %cst_41 : f32 to vector<8x32xf32>
    %51 = arith.maximumf %49, %50 : vector<8x32xf32>
    %52 = arith.truncf %51 : vector<8x32xf32> to vector<8x32xbf16>
    %c0_42 = arith.constant 0 : index
    %c0_43 = arith.constant 0 : index
    %53 = vector.load %arg8[%c0_42, %c0_43] : memref<32x96xbf16, #tpu.memory_space<vmem>>, vector<32x96xbf16>
    %cst_44 = arith.constant dense<0.000000e+00> : vector<8x96xf32>
    %54 = tpu.matmul %52, %53, %cst_44 {dimension_numbers = #tpu.dot_dimension_numbers<[1], [0], [0], [1], [0, 0, 1, 1], [], []>} : vector<8x32xbf16>, vector<32x96xbf16>, vector<8x96xf32> -> vector<8x96xf32>
    %55 = arith.addf %54, %25 : vector<8x96xf32>
    %56 = vector.extract_strided_slice %55 {offsets = [0, 0], sizes = [8, 64], strides = [1, 1]} : vector<8x96xf32> to vector<8x64xf32>
    %57 = vector.extract_strided_slice %37 {offsets = [0, 0], sizes = [8, 64], strides = [1, 1]} : vector<8x96xf32> to vector<8x64xf32>
    %58 = arith.addf %56, %57 : vector<8x64xf32>
    %59 = arith.negf %58 : vector<8x64xf32>
    %60 = math.exp %59 : vector<8x64xf32>
    %cst_45 = arith.constant 1.000000e+00 : f32
    %61 = vector.broadcast %cst_45 : f32 to vector<8x64xf32>
    %62 = arith.addf %61, %60 : vector<8x64xf32>
    %63 = arith.divf %61, %62 : vector<8x64xf32>
    %64 = vector.extract_strided_slice %63 {offsets = [0, 0], sizes = [8, 32], strides = [1, 1]} : vector<8x64xf32> to vector<8x32xf32>
    %65 = vector.extract_strided_slice %63 {offsets = [0, 32], sizes = [8, 32], strides = [1, 1]} : vector<8x64xf32> to vector<8x32xf32>
    %66 = vector.extract_strided_slice %55 {offsets = [0, 64], sizes = [8, 32], strides = [1, 1]} : vector<8x96xf32> to vector<8x32xf32>
    %67 = vector.extract_strided_slice %37 {offsets = [0, 64], sizes = [8, 32], strides = [1, 1]} : vector<8x96xf32> to vector<8x32xf32>
    %68 = arith.addf %67, %28 : vector<8x32xf32>
    %69 = arith.mulf %64, %68 : vector<8x32xf32>
    %70 = arith.addf %66, %69 : vector<8x32xf32>
    %71 = math.tanh %70 : vector<8x32xf32>
    %cst_46 = arith.constant 1.000000e+00 : f32
    %72 = vector.broadcast %cst_46 : f32 to vector<8x32xf32>
    %73 = arith.subf %72, %65 : vector<8x32xf32>
    %74 = arith.mulf %73, %71 : vector<8x32xf32>
    %75 = arith.mulf %65, %32 : vector<8x32xf32>
    %76 = arith.addf %74, %75 : vector<8x32xf32>
    %77 = arith.index_cast %c0_i32_33 : i32 to index
    %c0_47 = arith.constant 0 : index
    %c0_48 = arith.constant 0 : index
    %78 = vector.load %arg23[%77, %c0_47, %c0_48] : memref<8x8x32xf32, #tpu.memory_space<vmem>>, vector<1x8x32xf32>
    %79 = vector.shape_cast %78 : vector<1x8x32xf32> to vector<8x32xf32>
    %80 = vector.shape_cast %76 : vector<8x32xf32> to vector<1x8x32xf32>
    tpu.vector_store %arg23[%77, %c0_47, %c0_48], %80 {strides = array<i32>} : memref<8x8x32xf32, #tpu.memory_space<vmem>>, vector<1x8x32xf32>,
    %81 = arith.truncf %76 : vector<8x32xf32> to vector<8x32xbf16>
    %c0_49 = arith.constant 0 : index
    %c0_50 = arith.constant 0 : index
    %82 = vector.load %arg11[%c0_49, %c0_50] : memref<32x128xbf16, #tpu.memory_space<vmem>>, vector<32x128xbf16>
    %cst_51 = arith.constant dense<0.000000e+00> : vector<8x128xf32>
    %83 = tpu.matmul %81, %82, %cst_51 {dimension_numbers = #tpu.dot_dimension_numbers<[1], [0], [0], [1], [0, 0, 1, 1], [], []>} : vector<8x32xbf16>, vector<32x128xbf16>, vector<8x128xf32> -> vector<8x128xf32>
    %84 = vector.extract_strided_slice %83 {offsets = [0, 0], sizes = [8, 96], strides = [1, 1]} : vector<8x128xf32> to vector<8x96xf32>
    %85 = vector.extract_strided_slice %83 {offsets = [0, 96], sizes = [8, 32], strides = [1, 1]} : vector<8x128xf32> to vector<8x32xf32>
    %86 = arith.index_cast %c0_i32_33 : i32 to index
    %c0_52 = arith.constant 0 : index
    %c0_53 = arith.constant 0 : index
    %87 = vector.load %arg28[%86, %c0_52, %c0_53] : memref<8x8x32xf32, #tpu.memory_space<vmem>>, vector<1x8x32xf32>
    %88 = vector.shape_cast %87 : vector<1x8x32xf32> to vector<8x32xf32>
    %89 = arith.addf %85, %88 : vector<8x32xf32>
    %cst_54 = arith.constant 0.000000e+00 : f32
    %90 = vector.broadcast %cst_54 : f32 to vector<8x32xf32>
    %91 = arith.maximumf %89, %90 : vector<8x32xf32>
    %92 = arith.truncf %91 : vector<8x32xf32> to vector<8x32xbf16>
    %c0_55 = arith.constant 0 : index
    %c0_56 = arith.constant 0 : index
    %93 = vector.load %arg14[%c0_55, %c0_56] : memref<32x32xbf16, #tpu.memory_space<vmem>>, vector<32x32xbf16>
    %cst_57 = arith.constant dense<0.000000e+00> : vector<8x32xf32>
    %94 = tpu.matmul %92, %93, %cst_57 {dimension_numbers = #tpu.dot_dimension_numbers<[1], [0], [0], [1], [0, 0, 1, 1], [], []>} : vector<8x32xbf16>, vector<32x32xbf16>, vector<8x32xf32> -> vector<8x32xf32>
    %95 = arith.addf %94, %31 : vector<8x32xf32>
    %96 = vector.extract_strided_slice %40 {offsets = [0, 24], sizes = [8, 16], strides = [1, 1]} : vector<8x80xf32> to vector<8x16xf32>
    %97 = vector.extract_strided_slice %95 {offsets = [0, 0], sizes = [8, 16], strides = [1, 1]} : vector<8x32xf32> to vector<8x16xf32>
    %98 = vector.extract_strided_slice %95 {offsets = [0, 16], sizes = [8, 16], strides = [1, 1]} : vector<8x32xf32> to vector<8x16xf32>
    %99 = math.absf %98 : vector<8x16xf32>
    %cst_58 = arith.constant 0.000000e+00 : f32
    %100 = vector.broadcast %cst_58 : f32 to vector<8x16xf32>
    %101 = arith.subf %100, %99 : vector<8x16xf32>
    %102 = math.exp %101 : vector<8x16xf32>
    %103 = math.log1p %102 : vector<8x16xf32>
    %cst_59 = arith.constant 0.000000e+00 : f32
    %104 = vector.broadcast %cst_59 : f32 to vector<8x16xf32>
    %105 = arith.maximumf %98, %104 : vector<8x16xf32>
    %106 = arith.addf %103, %105 : vector<8x16xf32>
    %cst_60 = arith.constant 1.000000e-01 : f32
    %107 = vector.broadcast %cst_60 : f32 to vector<8x16xf32>
    %108 = arith.addf %106, %107 : vector<8x16xf32>
    %109 = arith.mulf %108, %96 : vector<8x16xf32>
    %110 = arith.addf %97, %109 : vector<8x16xf32>
    %111 = arith.index_cast %c0_i32_33 : i32 to index
    %c0_61 = arith.constant 0 : index
    %c0_62 = arith.constant 0 : index
    %112 = vector.load %arg24[%111, %c0_61, %c0_62] : memref<8x8x16xf32, #tpu.memory_space<vmem>>, vector<1x8x16xf32>
    %113 = vector.shape_cast %112 : vector<1x8x16xf32> to vector<8x16xf32>
    %114 = vector.shape_cast %97 : vector<8x16xf32> to vector<1x8x16xf32>
    tpu.vector_store %arg24[%111, %c0_61, %c0_62], %114 {strides = array<i32>} : memref<8x8x16xf32, #tpu.memory_space<vmem>>, vector<1x8x16xf32>,
    %115 = arith.index_cast %c0_i32_33 : i32 to index
    %c0_63 = arith.constant 0 : index
    %c0_64 = arith.constant 0 : index
    %116 = vector.load %arg25[%115, %c0_63, %c0_64] : memref<8x8x16xf32, #tpu.memory_space<vmem>>, vector<1x8x16xf32>
    %117 = vector.shape_cast %116 : vector<1x8x16xf32> to vector<8x16xf32>
    %118 = vector.shape_cast %108 : vector<8x16xf32> to vector<1x8x16xf32>
    tpu.vector_store %arg25[%115, %c0_63, %c0_64], %118 {strides = array<i32>} : memref<8x8x16xf32, #tpu.memory_space<vmem>>, vector<1x8x16xf32>,
    %119 = arith.index_cast %c0_i32_33 : i32 to index
    %c0_65 = arith.constant 0 : index
    %c0_66 = arith.constant 0 : index
    %120 = vector.load %arg26[%119, %c0_65, %c0_66] : memref<8x8x16xf32, #tpu.memory_space<vmem>>, vector<1x8x16xf32>
    %121 = vector.shape_cast %120 : vector<1x8x16xf32> to vector<8x16xf32>
    %122 = vector.shape_cast %110 : vector<8x16xf32> to vector<1x8x16xf32>
    tpu.vector_store %arg26[%119, %c0_65, %c0_66], %122 {strides = array<i32>} : memref<8x8x16xf32, #tpu.memory_space<vmem>>, vector<1x8x16xf32>,
    %c1_i32 = arith.constant 1 : i32
    %123 = arith.index_cast %c1_i32 : i32 to index
    %c0_67 = arith.constant 0 : index
    %c0_68 = arith.constant 0 : index
    %124 = vector.load %arg4[%123, %c0_67, %c0_68] : memref<8x8x80xf32, #tpu.memory_space<vmem>>, vector<1x8x80xf32>
    %125 = vector.shape_cast %124 : vector<1x8x80xf32> to vector<8x80xf32>
    %126 = vector.extract_strided_slice %125 {offsets = [0, 40], sizes = [8, 16], strides = [1, 1]} : vector<8x80xf32> to vector<8x16xf32>
    %127 = arith.mulf %110, %126 : vector<8x16xf32>
    %128 = arith.truncf %127 : vector<8x16xf32> to vector<8x16xbf16>
    %c0_69 = arith.constant 0 : index
    %c0_70 = arith.constant 0 : index
    %129 = vector.load %arg5[%c0_69, %c0_70] : memref<16x32xbf16, #tpu.memory_space<vmem>>, vector<16x32xbf16>
    %cst_71 = arith.constant dense<0.000000e+00> : vector<8x32xf32>
    %130 = tpu.matmul %128, %129, %cst_71 {dimension_numbers = #tpu.dot_dimension_numbers<[1], [0], [0], [1], [0, 0, 1, 1], [], []>} : vector<8x16xbf16>, vector<16x32xbf16>, vector<8x32xf32> -> vector<8x32xf32>
    %131 = arith.index_cast %c1_i32 : i32 to index
    %c0_72 = arith.constant 0 : index
    %c0_73 = arith.constant 0 : index
    %132 = vector.load %arg27[%131, %c0_72, %c0_73] : memref<8x8x32xf32, #tpu.memory_space<vmem>>, vector<1x8x32xf32>
    %133 = vector.shape_cast %132 : vector<1x8x32xf32> to vector<8x32xf32>
    %134 = arith.addf %130, %133 : vector<8x32xf32>
    %cst_74 = arith.constant 0.000000e+00 : f32
    %135 = vector.broadcast %cst_74 : f32 to vector<8x32xf32>
    %136 = arith.maximumf %134, %135 : vector<8x32xf32>
    %137 = arith.truncf %136 : vector<8x32xf32> to vector<8x32xbf16>
    %c0_75 = arith.constant 0 : index
    %c0_76 = arith.constant 0 : index
    %138 = vector.load %arg8[%c0_75, %c0_76] : memref<32x96xbf16, #tpu.memory_space<vmem>>, vector<32x96xbf16>
    %cst_77 = arith.constant dense<0.000000e+00> : vector<8x96xf32>
    %139 = tpu.matmul %137, %138, %cst_77 {dimension_numbers = #tpu.dot_dimension_numbers<[1], [0], [0], [1], [0, 0, 1, 1], [], []>} : vector<8x32xbf16>, vector<32x96xbf16>, vector<8x96xf32> -> vector<8x96xf32>
    %140 = arith.addf %139, %25 : vector<8x96xf32>
    %141 = vector.extract_strided_slice %140 {offsets = [0, 0], sizes = [8, 64], strides = [1, 1]} : vector<8x96xf32> to vector<8x64xf32>
    %142 = vector.extract_strided_slice %84 {offsets = [0, 0], sizes = [8, 64], strides = [1, 1]} : vector<8x96xf32> to vector<8x64xf32>
    %143 = arith.addf %141, %142 : vector<8x64xf32>
    %144 = arith.negf %143 : vector<8x64xf32>
    %145 = math.exp %144 : vector<8x64xf32>
    %cst_78 = arith.constant 1.000000e+00 : f32
    %146 = vector.broadcast %cst_78 : f32 to vector<8x64xf32>
    %147 = arith.addf %146, %145 : vector<8x64xf32>
    %148 = arith.divf %146, %147 : vector<8x64xf32>
    %149 = vector.extract_strided_slice %148 {offsets = [0, 0], sizes = [8, 32], strides = [1, 1]} : vector<8x64xf32> to vector<8x32xf32>
    %150 = vector.extract_strided_slice %148 {offsets = [0, 32], sizes = [8, 32], strides = [1, 1]} : vector<8x64xf32> to vector<8x32xf32>
    %151 = vector.extract_strided_slice %140 {offsets = [0, 64], sizes = [8, 32], strides = [1, 1]} : vector<8x96xf32> to vector<8x32xf32>
    %152 = vector.extract_strided_slice %84 {offsets = [0, 64], sizes = [8, 32], strides = [1, 1]} : vector<8x96xf32> to vector<8x32xf32>
    %153 = arith.addf %152, %28 : vector<8x32xf32>
    %154 = arith.mulf %149, %153 : vector<8x32xf32>
    %155 = arith.addf %151, %154 : vector<8x32xf32>
    %156 = math.tanh %155 : vector<8x32xf32>
    %cst_79 = arith.constant 1.000000e+00 : f32
    %157 = vector.broadcast %cst_79 : f32 to vector<8x32xf32>
    %158 = arith.subf %157, %150 : vector<8x32xf32>
    %159 = arith.mulf %158, %156 : vector<8x32xf32>
    %160 = arith.mulf %150, %76 : vector<8x32xf32>
    %161 = arith.addf %159, %160 : vector<8x32xf32>
    %162 = arith.index_cast %c1_i32 : i32 to index
    %c0_80 = arith.constant 0 : index
    %c0_81 = arith.constant 0 : index
    %163 = vector.load %arg23[%162, %c0_80, %c0_81] : memref<8x8x32xf32, #tpu.memory_space<vmem>>, vector<1x8x32xf32>
    %164 = vector.shape_cast %163 : vector<1x8x32xf32> to vector<8x32xf32>
    %165 = vector.shape_cast %161 : vector<8x32xf32> to vector<1x8x32xf32>
    tpu.vector_store %arg23[%162, %c0_80, %c0_81], %165 {strides = array<i32>} : memref<8x8x32xf32, #tpu.memory_space<vmem>>, vector<1x8x32xf32>,
    %166 = arith.truncf %161 : vector<8x32xf32> to vector<8x32xbf16>
    %c0_82 = arith.constant 0 : index
    %c0_83 = arith.constant 0 : index
    %167 = vector.load %arg11[%c0_82, %c0_83] : memref<32x128xbf16, #tpu.memory_space<vmem>>, vector<32x128xbf16>
    %cst_84 = arith.constant dense<0.000000e+00> : vector<8x128xf32>
    %168 = tpu.matmul %166, %167, %cst_84 {dimension_numbers = #tpu.dot_dimension_numbers<[1], [0], [0], [1], [0, 0, 1, 1], [], []>} : vector<8x32xbf16>, vector<32x128xbf16>, vector<8x128xf32> -> vector<8x128xf32>
    %169 = vector.extract_strided_slice %168 {offsets = [0, 0], sizes = [8, 96], strides = [1, 1]} : vector<8x128xf32> to vector<8x96xf32>
    %170 = vector.extract_strided_slice %168 {offsets = [0, 96], sizes = [8, 32], strides = [1, 1]} : vector<8x128xf32> to vector<8x32xf32>
    %171 = arith.index_cast %c1_i32 : i32 to index
    %c0_85 = arith.constant 0 : index
    %c0_86 = arith.constant 0 : index
    %172 = vector.load %arg28[%171, %c0_85, %c0_86] : memref<8x8x32xf32, #tpu.memory_space<vmem>>, vector<1x8x32xf32>
    %173 = vector.shape_cast %172 : vector<1x8x32xf32> to vector<8x32xf32>
    %174 = arith.addf %170, %173 : vector<8x32xf32>
    %cst_87 = arith.constant 0.000000e+00 : f32
    %175 = vector.broadcast %cst_87 : f32 to vector<8x32xf32>
    %176 = arith.maximumf %174, %175 : vector<8x32xf32>
    %177 = arith.truncf %176 : vector<8x32xf32> to vector<8x32xbf16>
    %c0_88 = arith.constant 0 : index
    %c0_89 = arith.constant 0 : index
    %178 = vector.load %arg14[%c0_88, %c0_89] : memref<32x32xbf16, #tpu.memory_space<vmem>>, vector<32x32xbf16>
    %cst_90 = arith.constant dense<0.000000e+00> : vector<8x32xf32>
    %179 = tpu.matmul %177, %178, %cst_90 {dimension_numbers = #tpu.dot_dimension_numbers<[1], [0], [0], [1], [0, 0, 1, 1], [], []>} : vector<8x32xbf16>, vector<32x32xbf16>, vector<8x32xf32> -> vector<8x32xf32>
    %180 = arith.addf %179, %31 : vector<8x32xf32>
    %181 = vector.extract_strided_slice %125 {offsets = [0, 24], sizes = [8, 16], strides = [1, 1]} : vector<8x80xf32> to vector<8x16xf32>
    %182 = vector.extract_strided_slice %180 {offsets = [0, 0], sizes = [8, 16], strides = [1, 1]} : vector<8x32xf32> to vector<8x16xf32>
    %183 = vector.extract_strided_slice %180 {offsets = [0, 16], sizes = [8, 16], strides = [1, 1]} : vector<8x32xf32> to vector<8x16xf32>
    %184 = math.absf %183 : vector<8x16xf32>
    %cst_91 = arith.constant 0.000000e+00 : f32
    %185 = vector.broadcast %cst_91 : f32 to vector<8x16xf32>
    %186 = arith.subf %185, %184 : vector<8x16xf32>
    %187 = math.exp %186 : vector<8x16xf32>
    %188 = math.log1p %187 : vector<8x16xf32>
    %cst_92 = arith.constant 0.000000e+00 : f32
    %189 = vector.broadcast %cst_92 : f32 to vector<8x16xf32>
    %190 = arith.maximumf %183, %189 : vector<8x16xf32>
    %191 = arith.addf %188, %190 : vector<8x16xf32>
    %cst_93 = arith.constant 1.000000e-01 : f32
    %192 = vector.broadcast %cst_93 : f32 to vector<8x16xf32>
    %193 = arith.addf %191, %192 : vector<8x16xf32>
    %194 = arith.mulf %193, %181 : vector<8x16xf32>
    %195 = arith.addf %182, %194 : vector<8x16xf32>
    %196 = arith.index_cast %c1_i32 : i32 to index
    %c0_94 = arith.constant 0 : index
    %c0_95 = arith.constant 0 : index
    %197 = vector.load %arg24[%196, %c0_94, %c0_95] : memref<8x8x16xf32, #tpu.memory_space<vmem>>, vector<1x8x16xf32>
    %198 = vector.shape_cast %197 : vector<1x8x16xf32> to vector<8x16xf32>
    %199 = vector.shape_cast %182 : vector<8x16xf32> to vector<1x8x16xf32>
    tpu.vector_store %arg24[%196, %c0_94, %c0_95], %199 {strides = array<i32>} : memref<8x8x16xf32, #tpu.memory_space<vmem>>, vector<1x8x16xf32>,
    %200 = arith.index_cast %c1_i32 : i32 to index
    %c0_96 = arith.constant 0 : index
    %c0_97 = arith.constant 0 : index
    %201 = vector.load %arg25[%200, %c0_96, %c0_97] : memref<8x8x16xf32, #tpu.memory_space<vmem>>, vector<1x8x16xf32>
    %202 = vector.shape_cast %201 : vector<1x8x16xf32> to vector<8x16xf32>
    %203 = vector.shape_cast %193 : vector<8x16xf32> to vector<1x8x16xf32>
    tpu.vector_store %arg25[%200, %c0_96, %c0_97], %203 {strides = array<i32>} : memref<8x8x16xf32, #tpu.memory_space<vmem>>, vector<1x8x16xf32>,
    %204 = arith.index_cast %c1_i32 : i32 to index
    %c0_98 = arith.constant 0 : index
    %c0_99 = arith.constant 0 : index
    %205 = vector.load %arg26[%204, %c0_98, %c0_99] : memref<8x8x16xf32, #tpu.memory_space<vmem>>, vector<1x8x16xf32>
    %206 = vector.shape_cast %205 : vector<1x8x16xf32> to vector<8x16xf32>
    %207 = vector.shape_cast %195 : vector<8x16xf32> to vector<1x8x16xf32>
    tpu.vector_store %arg26[%204, %c0_98, %c0_99], %207 {strides = array<i32>} : memref<8x8x16xf32, #tpu.memory_space<vmem>>, vector<1x8x16xf32>,
    %c2_i32 = arith.constant 2 : i32
    %208 = arith.index_cast %c2_i32 : i32 to index
    %c0_100 = arith.constant 0 : index
    %c0_101 = arith.constant 0 : index
    %209 = vector.load %arg4[%208, %c0_100, %c0_101] : memref<8x8x80xf32, #tpu.memory_space<vmem>>, vector<1x8x80xf32>
    %210 = vector.shape_cast %209 : vector<1x8x80xf32> to vector<8x80xf32>
    %211 = vector.extract_strided_slice %210 {offsets = [0, 40], sizes = [8, 16], strides = [1, 1]} : vector<8x80xf32> to vector<8x16xf32>
    %212 = arith.mulf %195, %211 : vector<8x16xf32>
    %213 = arith.truncf %212 : vector<8x16xf32> to vector<8x16xbf16>
    %c0_102 = arith.constant 0 : index
    %c0_103 = arith.constant 0 : index
    %214 = vector.load %arg5[%c0_102, %c0_103] : memref<16x32xbf16, #tpu.memory_space<vmem>>, vector<16x32xbf16>
    %cst_104 = arith.constant dense<0.000000e+00> : vector<8x32xf32>
    %215 = tpu.matmul %213, %214, %cst_104 {dimension_numbers = #tpu.dot_dimension_numbers<[1], [0], [0], [1], [0, 0, 1, 1], [], []>} : vector<8x16xbf16>, vector<16x32xbf16>, vector<8x32xf32> -> vector<8x32xf32>
    %216 = arith.index_cast %c2_i32 : i32 to index
    %c0_105 = arith.constant 0 : index
    %c0_106 = arith.constant 0 : index
    %217 = vector.load %arg27[%216, %c0_105, %c0_106] : memref<8x8x32xf32, #tpu.memory_space<vmem>>, vector<1x8x32xf32>
    %218 = vector.shape_cast %217 : vector<1x8x32xf32> to vector<8x32xf32>
    %219 = arith.addf %215, %218 : vector<8x32xf32>
    %cst_107 = arith.constant 0.000000e+00 : f32
    %220 = vector.broadcast %cst_107 : f32 to vector<8x32xf32>
    %221 = arith.maximumf %219, %220 : vector<8x32xf32>
    %222 = arith.truncf %221 : vector<8x32xf32> to vector<8x32xbf16>
    %c0_108 = arith.constant 0 : index
    %c0_109 = arith.constant 0 : index
    %223 = vector.load %arg8[%c0_108, %c0_109] : memref<32x96xbf16, #tpu.memory_space<vmem>>, vector<32x96xbf16>
    %cst_110 = arith.constant dense<0.000000e+00> : vector<8x96xf32>
    %224 = tpu.matmul %222, %223, %cst_110 {dimension_numbers = #tpu.dot_dimension_numbers<[1], [0], [0], [1], [0, 0, 1, 1], [], []>} : vector<8x32xbf16>, vector<32x96xbf16>, vector<8x96xf32> -> vector<8x96xf32>
    %225 = arith.addf %224, %25 : vector<8x96xf32>
    %226 = vector.extract_strided_slice %225 {offsets = [0, 0], sizes = [8, 64], strides = [1, 1]} : vector<8x96xf32> to vector<8x64xf32>
    %227 = vector.extract_strided_slice %169 {offsets = [0, 0], sizes = [8, 64], strides = [1, 1]} : vector<8x96xf32> to vector<8x64xf32>
    %228 = arith.addf %226, %227 : vector<8x64xf32>
    %229 = arith.negf %228 : vector<8x64xf32>
    %230 = math.exp %229 : vector<8x64xf32>
    %cst_111 = arith.constant 1.000000e+00 : f32
    %231 = vector.broadcast %cst_111 : f32 to vector<8x64xf32>
    %232 = arith.addf %231, %230 : vector<8x64xf32>
    %233 = arith.divf %231, %232 : vector<8x64xf32>
    %234 = vector.extract_strided_slice %233 {offsets = [0, 0], sizes = [8, 32], strides = [1, 1]} : vector<8x64xf32> to vector<8x32xf32>
    %235 = vector.extract_strided_slice %233 {offsets = [0, 32], sizes = [8, 32], strides = [1, 1]} : vector<8x64xf32> to vector<8x32xf32>
    %236 = vector.extract_strided_slice %225 {offsets = [0, 64], sizes = [8, 32], strides = [1, 1]} : vector<8x96xf32> to vector<8x32xf32>
    %237 = vector.extract_strided_slice %169 {offsets = [0, 64], sizes = [8, 32], strides = [1, 1]} : vector<8x96xf32> to vector<8x32xf32>
    %238 = arith.addf %237, %28 : vector<8x32xf32>
    %239 = arith.mulf %234, %238 : vector<8x32xf32>
    %240 = arith.addf %236, %239 : vector<8x32xf32>
    %241 = math.tanh %240 : vector<8x32xf32>
    %cst_112 = arith.constant 1.000000e+00 : f32
    %242 = vector.broadcast %cst_112 : f32 to vector<8x32xf32>
    %243 = arith.subf %242, %235 : vector<8x32xf32>
    %244 = arith.mulf %243, %241 : vector<8x32xf32>
    %245 = arith.mulf %235, %161 : vector<8x32xf32>
    %246 = arith.addf %244, %245 : vector<8x32xf32>
    %247 = arith.index_cast %c2_i32 : i32 to index
    %c0_113 = arith.constant 0 : index
    %c0_114 = arith.constant 0 : index
    %248 = vector.load %arg23[%247, %c0_113, %c0_114] : memref<8x8x32xf32, #tpu.memory_space<vmem>>, vector<1x8x32xf32>
    %249 = vector.shape_cast %248 : vector<1x8x32xf32> to vector<8x32xf32>
    %250 = vector.shape_cast %246 : vector<8x32xf32> to vector<1x8x32xf32>
    tpu.vector_store %arg23[%247, %c0_113, %c0_114], %250 {strides = array<i32>} : memref<8x8x32xf32, #tpu.memory_space<vmem>>, vector<1x8x32xf32>,
    %251 = arith.truncf %246 : vector<8x32xf32> to vector<8x32xbf16>
    %c0_115 = arith.constant 0 : index
    %c0_116 = arith.constant 0 : index
    %252 = vector.load %arg11[%c0_115, %c0_116] : memref<32x128xbf16, #tpu.memory_space<vmem>>, vector<32x128xbf16>
    %cst_117 = arith.constant dense<0.000000e+00> : vector<8x128xf32>
    %253 = tpu.matmul %251, %252, %cst_117 {dimension_numbers = #tpu.dot_dimension_numbers<[1], [0], [0], [1], [0, 0, 1, 1], [], []>} : vector<8x32xbf16>, vector<32x128xbf16>, vector<8x128xf32> -> vector<8x128xf32>
    %254 = vector.extract_strided_slice %253 {offsets = [0, 0], sizes = [8, 96], strides = [1, 1]} : vector<8x128xf32> to vector<8x96xf32>
    %255 = vector.extract_strided_slice %253 {offsets = [0, 96], sizes = [8, 32], strides = [1, 1]} : vector<8x128xf32> to vector<8x32xf32>
    %256 = arith.index_cast %c2_i32 : i32 to index
    %c0_118 = arith.constant 0 : index
    %c0_119 = arith.constant 0 : index
    %257 = vector.load %arg28[%256, %c0_118, %c0_119] : memref<8x8x32xf32, #tpu.memory_space<vmem>>, vector<1x8x32xf32>
    %258 = vector.shape_cast %257 : vector<1x8x32xf32> to vector<8x32xf32>
    %259 = arith.addf %255, %258 : vector<8x32xf32>
    %cst_120 = arith.constant 0.000000e+00 : f32
    %260 = vector.broadcast %cst_120 : f32 to vector<8x32xf32>
    %261 = arith.maximumf %259, %260 : vector<8x32xf32>
    %262 = arith.truncf %261 : vector<8x32xf32> to vector<8x32xbf16>
    %c0_121 = arith.constant 0 : index
    %c0_122 = arith.constant 0 : index
    %263 = vector.load %arg14[%c0_121, %c0_122] : memref<32x32xbf16, #tpu.memory_space<vmem>>, vector<32x32xbf16>
    %cst_123 = arith.constant dense<0.000000e+00> : vector<8x32xf32>
    %264 = tpu.matmul %262, %263, %cst_123 {dimension_numbers = #tpu.dot_dimension_numbers<[1], [0], [0], [1], [0, 0, 1, 1], [], []>} : vector<8x32xbf16>, vector<32x32xbf16>, vector<8x32xf32> -> vector<8x32xf32>
    %265 = arith.addf %264, %31 : vector<8x32xf32>
    %266 = vector.extract_strided_slice %210 {offsets = [0, 24], sizes = [8, 16], strides = [1, 1]} : vector<8x80xf32> to vector<8x16xf32>
    %267 = vector.extract_strided_slice %265 {offsets = [0, 0], sizes = [8, 16], strides = [1, 1]} : vector<8x32xf32> to vector<8x16xf32>
    %268 = vector.extract_strided_slice %265 {offsets = [0, 16], sizes = [8, 16], strides = [1, 1]} : vector<8x32xf32> to vector<8x16xf32>
    %269 = math.absf %268 : vector<8x16xf32>
    %cst_124 = arith.constant 0.000000e+00 : f32
    %270 = vector.broadcast %cst_124 : f32 to vector<8x16xf32>
    %271 = arith.subf %270, %269 : vector<8x16xf32>
    %272 = math.exp %271 : vector<8x16xf32>
    %273 = math.log1p %272 : vector<8x16xf32>
    %cst_125 = arith.constant 0.000000e+00 : f32
    %274 = vector.broadcast %cst_125 : f32 to vector<8x16xf32>
    %275 = arith.maximumf %268, %274 : vector<8x16xf32>
    %276 = arith.addf %273, %275 : vector<8x16xf32>
    %cst_126 = arith.constant 1.000000e-01 : f32
    %277 = vector.broadcast %cst_126 : f32 to vector<8x16xf32>
    %278 = arith.addf %276, %277 : vector<8x16xf32>
    %279 = arith.mulf %278, %266 : vector<8x16xf32>
    %280 = arith.addf %267, %279 : vector<8x16xf32>
    %281 = arith.index_cast %c2_i32 : i32 to index
    %c0_127 = arith.constant 0 : index
    %c0_128 = arith.constant 0 : index
    %282 = vector.load %arg24[%281, %c0_127, %c0_128] : memref<8x8x16xf32, #tpu.memory_space<vmem>>, vector<1x8x16xf32>
    %283 = vector.shape_cast %282 : vector<1x8x16xf32> to vector<8x16xf32>
    %284 = vector.shape_cast %267 : vector<8x16xf32> to vector<1x8x16xf32>
    tpu.vector_store %arg24[%281, %c0_127, %c0_128], %284 {strides = array<i32>} : memref<8x8x16xf32, #tpu.memory_space<vmem>>, vector<1x8x16xf32>,
    %285 = arith.index_cast %c2_i32 : i32 to index
    %c0_129 = arith.constant 0 : index
    %c0_130 = arith.constant 0 : index
    %286 = vector.load %arg25[%285, %c0_129, %c0_130] : memref<8x8x16xf32, #tpu.memory_space<vmem>>, vector<1x8x16xf32>
    %287 = vector.shape_cast %286 : vector<1x8x16xf32> to vector<8x16xf32>
    %288 = vector.shape_cast %278 : vector<8x16xf32> to vector<1x8x16xf32>
    tpu.vector_store %arg25[%285, %c0_129, %c0_130], %288 {strides = array<i32>} : memref<8x8x16xf32, #tpu.memory_space<vmem>>, vector<1x8x16xf32>,
    %289 = arith.index_cast %c2_i32 : i32 to index
    %c0_131 = arith.constant 0 : index
    %c0_132 = arith.constant 0 : index
    %290 = vector.load %arg26[%289, %c0_131, %c0_132] : memref<8x8x16xf32, #tpu.memory_space<vmem>>, vector<1x8x16xf32>
    %291 = vector.shape_cast %290 : vector<1x8x16xf32> to vector<8x16xf32>
    %292 = vector.shape_cast %280 : vector<8x16xf32> to vector<1x8x16xf32>
    tpu.vector_store %arg26[%289, %c0_131, %c0_132], %292 {strides = array<i32>} : memref<8x8x16xf32, #tpu.memory_space<vmem>>, vector<1x8x16xf32>,
    %c3_i32 = arith.constant 3 : i32
    %293 = arith.index_cast %c3_i32 : i32 to index
    %c0_133 = arith.constant 0 : index
    %c0_134 = arith.constant 0 : index
    %294 = vector.load %arg4[%293, %c0_133, %c0_134] : memref<8x8x80xf32, #tpu.memory_space<vmem>>, vector<1x8x80xf32>
    %295 = vector.shape_cast %294 : vector<1x8x80xf32> to vector<8x80xf32>
    %296 = vector.extract_strided_slice %295 {offsets = [0, 40], sizes = [8, 16], strides = [1, 1]} : vector<8x80xf32> to vector<8x16xf32>
    %297 = arith.mulf %280, %296 : vector<8x16xf32>
    %298 = arith.truncf %297 : vector<8x16xf32> to vector<8x16xbf16>
    %c0_135 = arith.constant 0 : index
    %c0_136 = arith.constant 0 : index
    %299 = vector.load %arg5[%c0_135, %c0_136] : memref<16x32xbf16, #tpu.memory_space<vmem>>, vector<16x32xbf16>
    %cst_137 = arith.constant dense<0.000000e+00> : vector<8x32xf32>
    %300 = tpu.matmul %298, %299, %cst_137 {dimension_numbers = #tpu.dot_dimension_numbers<[1], [0], [0], [1], [0, 0, 1, 1], [], []>} : vector<8x16xbf16>, vector<16x32xbf16>, vector<8x32xf32> -> vector<8x32xf32>
    %301 = arith.index_cast %c3_i32 : i32 to index
    %c0_138 = arith.constant 0 : index
    %c0_139 = arith.constant 0 : index
    %302 = vector.load %arg27[%301, %c0_138, %c0_139] : memref<8x8x32xf32, #tpu.memory_space<vmem>>, vector<1x8x32xf32>
    %303 = vector.shape_cast %302 : vector<1x8x32xf32> to vector<8x32xf32>
    %304 = arith.addf %300, %303 : vector<8x32xf32>
    %cst_140 = arith.constant 0.000000e+00 : f32
    %305 = vector.broadcast %cst_140 : f32 to vector<8x32xf32>
    %306 = arith.maximumf %304, %305 : vector<8x32xf32>
    %307 = arith.truncf %306 : vector<8x32xf32> to vector<8x32xbf16>
    %c0_141 = arith.constant 0 : index
    %c0_142 = arith.constant 0 : index
    %308 = vector.load %arg8[%c0_141, %c0_142] : memref<32x96xbf16, #tpu.memory_space<vmem>>, vector<32x96xbf16>
    %cst_143 = arith.constant dense<0.000000e+00> : vector<8x96xf32>
    %309 = tpu.matmul %307, %308, %cst_143 {dimension_numbers = #tpu.dot_dimension_numbers<[1], [0], [0], [1], [0, 0, 1, 1], [], []>} : vector<8x32xbf16>, vector<32x96xbf16>, vector<8x96xf32> -> vector<8x96xf32>
    %310 = arith.addf %309, %25 : vector<8x96xf32>
    %311 = vector.extract_strided_slice %310 {offsets = [0, 0], sizes = [8, 64], strides = [1, 1]} : vector<8x96xf32> to vector<8x64xf32>
    %312 = vector.extract_strided_slice %254 {offsets = [0, 0], sizes = [8, 64], strides = [1, 1]} : vector<8x96xf32> to vector<8x64xf32>
    %313 = arith.addf %311, %312 : vector<8x64xf32>
    %314 = arith.negf %313 : vector<8x64xf32>
    %315 = math.exp %314 : vector<8x64xf32>
    %cst_144 = arith.constant 1.000000e+00 : f32
    %316 = vector.broadcast %cst_144 : f32 to vector<8x64xf32>
    %317 = arith.addf %316, %315 : vector<8x64xf32>
    %318 = arith.divf %316, %317 : vector<8x64xf32>
    %319 = vector.extract_strided_slice %318 {offsets = [0, 0], sizes = [8, 32], strides = [1, 1]} : vector<8x64xf32> to vector<8x32xf32>
    %320 = vector.extract_strided_slice %318 {offsets = [0, 32], sizes = [8, 32], strides = [1, 1]} : vector<8x64xf32> to vector<8x32xf32>
    %321 = vector.extract_strided_slice %310 {offsets = [0, 64], sizes = [8, 32], strides = [1, 1]} : vector<8x96xf32> to vector<8x32xf32>
    %322 = vector.extract_strided_slice %254 {offsets = [0, 64], sizes = [8, 32], strides = [1, 1]} : vector<8x96xf32> to vector<8x32xf32>
    %323 = arith.addf %322, %28 : vector<8x32xf32>
    %324 = arith.mulf %319, %323 : vector<8x32xf32>
    %325 = arith.addf %321, %324 : vector<8x32xf32>
    %326 = math.tanh %325 : vector<8x32xf32>
    %cst_145 = arith.constant 1.000000e+00 : f32
    %327 = vector.broadcast %cst_145 : f32 to vector<8x32xf32>
    %328 = arith.subf %327, %320 : vector<8x32xf32>
    %329 = arith.mulf %328, %326 : vector<8x32xf32>
    %330 = arith.mulf %320, %246 : vector<8x32xf32>
    %331 = arith.addf %329, %330 : vector<8x32xf32>
    %332 = arith.index_cast %c3_i32 : i32 to index
    %c0_146 = arith.constant 0 : index
    %c0_147 = arith.constant 0 : index
    %333 = vector.load %arg23[%332, %c0_146, %c0_147] : memref<8x8x32xf32, #tpu.memory_space<vmem>>, vector<1x8x32xf32>
    %334 = vector.shape_cast %333 : vector<1x8x32xf32> to vector<8x32xf32>
    %335 = vector.shape_cast %331 : vector<8x32xf32> to vector<1x8x32xf32>
    tpu.vector_store %arg23[%332, %c0_146, %c0_147], %335 {strides = array<i32>} : memref<8x8x32xf32, #tpu.memory_space<vmem>>, vector<1x8x32xf32>,
    %336 = arith.truncf %331 : vector<8x32xf32> to vector<8x32xbf16>
    %c0_148 = arith.constant 0 : index
    %c0_149 = arith.constant 0 : index
    %337 = vector.load %arg11[%c0_148, %c0_149] : memref<32x128xbf16, #tpu.memory_space<vmem>>, vector<32x128xbf16>
    %cst_150 = arith.constant dense<0.000000e+00> : vector<8x128xf32>
    %338 = tpu.matmul %336, %337, %cst_150 {dimension_numbers = #tpu.dot_dimension_numbers<[1], [0], [0], [1], [0, 0, 1, 1], [], []>} : vector<8x32xbf16>, vector<32x128xbf16>, vector<8x128xf32> -> vector<8x128xf32>
    %339 = vector.extract_strided_slice %338 {offsets = [0, 0], sizes = [8, 96], strides = [1, 1]} : vector<8x128xf32> to vector<8x96xf32>
    %340 = vector.extract_strided_slice %338 {offsets = [0, 96], sizes = [8, 32], strides = [1, 1]} : vector<8x128xf32> to vector<8x32xf32>
    %341 = arith.index_cast %c3_i32 : i32 to index
    %c0_151 = arith.constant 0 : index
    %c0_152 = arith.constant 0 : index
    %342 = vector.load %arg28[%341, %c0_151, %c0_152] : memref<8x8x32xf32, #tpu.memory_space<vmem>>, vector<1x8x32xf32>
    %343 = vector.shape_cast %342 : vector<1x8x32xf32> to vector<8x32xf32>
    %344 = arith.addf %340, %343 : vector<8x32xf32>
    %cst_153 = arith.constant 0.000000e+00 : f32
    %345 = vector.broadcast %cst_153 : f32 to vector<8x32xf32>
    %346 = arith.maximumf %344, %345 : vector<8x32xf32>
    %347 = arith.truncf %346 : vector<8x32xf32> to vector<8x32xbf16>
    %c0_154 = arith.constant 0 : index
    %c0_155 = arith.constant 0 : index
    %348 = vector.load %arg14[%c0_154, %c0_155] : memref<32x32xbf16, #tpu.memory_space<vmem>>, vector<32x32xbf16>
    %cst_156 = arith.constant dense<0.000000e+00> : vector<8x32xf32>
    %349 = tpu.matmul %347, %348, %cst_156 {dimension_numbers = #tpu.dot_dimension_numbers<[1], [0], [0], [1], [0, 0, 1, 1], [], []>} : vector<8x32xbf16>, vector<32x32xbf16>, vector<8x32xf32> -> vector<8x32xf32>
    %350 = arith.addf %349, %31 : vector<8x32xf32>
    %351 = vector.extract_strided_slice %295 {offsets = [0, 24], sizes = [8, 16], strides = [1, 1]} : vector<8x80xf32> to vector<8x16xf32>
    %352 = vector.extract_strided_slice %350 {offsets = [0, 0], sizes = [8, 16], strides = [1, 1]} : vector<8x32xf32> to vector<8x16xf32>
    %353 = vector.extract_strided_slice %350 {offsets = [0, 16], sizes = [8, 16], strides = [1, 1]} : vector<8x32xf32> to vector<8x16xf32>
    %354 = math.absf %353 : vector<8x16xf32>
    %cst_157 = arith.constant 0.000000e+00 : f32
    %355 = vector.broadcast %cst_157 : f32 to vector<8x16xf32>
    %356 = arith.subf %355, %354 : vector<8x16xf32>
    %357 = math.exp %356 : vector<8x16xf32>
    %358 = math.log1p %357 : vector<8x16xf32>
    %cst_158 = arith.constant 0.000000e+00 : f32
    %359 = vector.broadcast %cst_158 : f32 to vector<8x16xf32>
    %360 = arith.maximumf %353, %359 : vector<8x16xf32>
    %361 = arith.addf %358, %360 : vector<8x16xf32>
    %cst_159 = arith.constant 1.000000e-01 : f32
    %362 = vector.broadcast %cst_159 : f32 to vector<8x16xf32>
    %363 = arith.addf %361, %362 : vector<8x16xf32>
    %364 = arith.mulf %363, %351 : vector<8x16xf32>
    %365 = arith.addf %352, %364 : vector<8x16xf32>
    %366 = arith.index_cast %c3_i32 : i32 to index
    %c0_160 = arith.constant 0 : index
    %c0_161 = arith.constant 0 : index
    %367 = vector.load %arg24[%366, %c0_160, %c0_161] : memref<8x8x16xf32, #tpu.memory_space<vmem>>, vector<1x8x16xf32>
    %368 = vector.shape_cast %367 : vector<1x8x16xf32> to vector<8x16xf32>
    %369 = vector.shape_cast %352 : vector<8x16xf32> to vector<1x8x16xf32>
    tpu.vector_store %arg24[%366, %c0_160, %c0_161], %369 {strides = array<i32>} : memref<8x8x16xf32, #tpu.memory_space<vmem>>, vector<1x8x16xf32>,
    %370 = arith.index_cast %c3_i32 : i32 to index
    %c0_162 = arith.constant 0 : index
    %c0_163 = arith.constant 0 : index
    %371 = vector.load %arg25[%370, %c0_162, %c0_163] : memref<8x8x16xf32, #tpu.memory_space<vmem>>, vector<1x8x16xf32>
    %372 = vector.shape_cast %371 : vector<1x8x16xf32> to vector<8x16xf32>
    %373 = vector.shape_cast %363 : vector<8x16xf32> to vector<1x8x16xf32>
    tpu.vector_store %arg25[%370, %c0_162, %c0_163], %373 {strides = array<i32>} : memref<8x8x16xf32, #tpu.memory_space<vmem>>, vector<1x8x16xf32>,
    %374 = arith.index_cast %c3_i32 : i32 to index
    %c0_164 = arith.constant 0 : index
    %c0_165 = arith.constant 0 : index
    %375 = vector.load %arg26[%374, %c0_164, %c0_165] : memref<8x8x16xf32, #tpu.memory_space<vmem>>, vector<1x8x16xf32>
    %376 = vector.shape_cast %375 : vector<1x8x16xf32> to vector<8x16xf32>
    %377 = vector.shape_cast %365 : vector<8x16xf32> to vector<1x8x16xf32>
    tpu.vector_store %arg26[%374, %c0_164, %c0_165], %377 {strides = array<i32>} : memref<8x8x16xf32, #tpu.memory_space<vmem>>, vector<1x8x16xf32>,
    %c4_i32 = arith.constant 4 : i32
    %378 = arith.index_cast %c4_i32 : i32 to index
    %c0_166 = arith.constant 0 : index
    %c0_167 = arith.constant 0 : index
    %379 = vector.load %arg4[%378, %c0_166, %c0_167] : memref<8x8x80xf32, #tpu.memory_space<vmem>>, vector<1x8x80xf32>
    %380 = vector.shape_cast %379 : vector<1x8x80xf32> to vector<8x80xf32>
    %381 = vector.extract_strided_slice %380 {offsets = [0, 40], sizes = [8, 16], strides = [1, 1]} : vector<8x80xf32> to vector<8x16xf32>
    %382 = arith.mulf %365, %381 : vector<8x16xf32>
    %383 = arith.truncf %382 : vector<8x16xf32> to vector<8x16xbf16>
    %c0_168 = arith.constant 0 : index
    %c0_169 = arith.constant 0 : index
    %384 = vector.load %arg5[%c0_168, %c0_169] : memref<16x32xbf16, #tpu.memory_space<vmem>>, vector<16x32xbf16>
    %cst_170 = arith.constant dense<0.000000e+00> : vector<8x32xf32>
    %385 = tpu.matmul %383, %384, %cst_170 {dimension_numbers = #tpu.dot_dimension_numbers<[1], [0], [0], [1], [0, 0, 1, 1], [], []>} : vector<8x16xbf16>, vector<16x32xbf16>, vector<8x32xf32> -> vector<8x32xf32>
    %386 = arith.index_cast %c4_i32 : i32 to index
    %c0_171 = arith.constant 0 : index
    %c0_172 = arith.constant 0 : index
    %387 = vector.load %arg27[%386, %c0_171, %c0_172] : memref<8x8x32xf32, #tpu.memory_space<vmem>>, vector<1x8x32xf32>
    %388 = vector.shape_cast %387 : vector<1x8x32xf32> to vector<8x32xf32>
    %389 = arith.addf %385, %388 : vector<8x32xf32>
    %cst_173 = arith.constant 0.000000e+00 : f32
    %390 = vector.broadcast %cst_173 : f32 to vector<8x32xf32>
    %391 = arith.maximumf %389, %390 : vector<8x32xf32>
    %392 = arith.truncf %391 : vector<8x32xf32> to vector<8x32xbf16>
    %c0_174 = arith.constant 0 : index
    %c0_175 = arith.constant 0 : index
    %393 = vector.load %arg8[%c0_174, %c0_175] : memref<32x96xbf16, #tpu.memory_space<vmem>>, vector<32x96xbf16>
    %cst_176 = arith.constant dense<0.000000e+00> : vector<8x96xf32>
    %394 = tpu.matmul %392, %393, %cst_176 {dimension_numbers = #tpu.dot_dimension_numbers<[1], [0], [0], [1], [0, 0, 1, 1], [], []>} : vector<8x32xbf16>, vector<32x96xbf16>, vector<8x96xf32> -> vector<8x96xf32>
    %395 = arith.addf %394, %25 : vector<8x96xf32>
    %396 = vector.extract_strided_slice %395 {offsets = [0, 0], sizes = [8, 64], strides = [1, 1]} : vector<8x96xf32> to vector<8x64xf32>
    %397 = vector.extract_strided_slice %339 {offsets = [0, 0], sizes = [8, 64], strides = [1, 1]} : vector<8x96xf32> to vector<8x64xf32>
    %398 = arith.addf %396, %397 : vector<8x64xf32>
    %399 = arith.negf %398 : vector<8x64xf32>
    %400 = math.exp %399 : vector<8x64xf32>
    %cst_177 = arith.constant 1.000000e+00 : f32
    %401 = vector.broadcast %cst_177 : f32 to vector<8x64xf32>
    %402 = arith.addf %401, %400 : vector<8x64xf32>
    %403 = arith.divf %401, %402 : vector<8x64xf32>
    %404 = vector.extract_strided_slice %403 {offsets = [0, 0], sizes = [8, 32], strides = [1, 1]} : vector<8x64xf32> to vector<8x32xf32>
    %405 = vector.extract_strided_slice %403 {offsets = [0, 32], sizes = [8, 32], strides = [1, 1]} : vector<8x64xf32> to vector<8x32xf32>
    %406 = vector.extract_strided_slice %395 {offsets = [0, 64], sizes = [8, 32], strides = [1, 1]} : vector<8x96xf32> to vector<8x32xf32>
    %407 = vector.extract_strided_slice %339 {offsets = [0, 64], sizes = [8, 32], strides = [1, 1]} : vector<8x96xf32> to vector<8x32xf32>
    %408 = arith.addf %407, %28 : vector<8x32xf32>
    %409 = arith.mulf %404, %408 : vector<8x32xf32>
    %410 = arith.addf %406, %409 : vector<8x32xf32>
    %411 = math.tanh %410 : vector<8x32xf32>
    %cst_178 = arith.constant 1.000000e+00 : f32
    %412 = vector.broadcast %cst_178 : f32 to vector<8x32xf32>
    %413 = arith.subf %412, %405 : vector<8x32xf32>
    %414 = arith.mulf %413, %411 : vector<8x32xf32>
    %415 = arith.mulf %405, %331 : vector<8x32xf32>
    %416 = arith.addf %414, %415 : vector<8x32xf32>
    %417 = arith.index_cast %c4_i32 : i32 to index
    %c0_179 = arith.constant 0 : index
    %c0_180 = arith.constant 0 : index
    %418 = vector.load %arg23[%417, %c0_179, %c0_180] : memref<8x8x32xf32, #tpu.memory_space<vmem>>, vector<1x8x32xf32>
    %419 = vector.shape_cast %418 : vector<1x8x32xf32> to vector<8x32xf32>
    %420 = vector.shape_cast %416 : vector<8x32xf32> to vector<1x8x32xf32>
    tpu.vector_store %arg23[%417, %c0_179, %c0_180], %420 {strides = array<i32>} : memref<8x8x32xf32, #tpu.memory_space<vmem>>, vector<1x8x32xf32>,
    %421 = arith.truncf %416 : vector<8x32xf32> to vector<8x32xbf16>
    %c0_181 = arith.constant 0 : index
    %c0_182 = arith.constant 0 : index
    %422 = vector.load %arg11[%c0_181, %c0_182] : memref<32x128xbf16, #tpu.memory_space<vmem>>, vector<32x128xbf16>
    %cst_183 = arith.constant dense<0.000000e+00> : vector<8x128xf32>
    %423 = tpu.matmul %421, %422, %cst_183 {dimension_numbers = #tpu.dot_dimension_numbers<[1], [0], [0], [1], [0, 0, 1, 1], [], []>} : vector<8x32xbf16>, vector<32x128xbf16>, vector<8x128xf32> -> vector<8x128xf32>
    %424 = vector.extract_strided_slice %423 {offsets = [0, 0], sizes = [8, 96], strides = [1, 1]} : vector<8x128xf32> to vector<8x96xf32>
    %425 = vector.extract_strided_slice %423 {offsets = [0, 96], sizes = [8, 32], strides = [1, 1]} : vector<8x128xf32> to vector<8x32xf32>
    %426 = arith.index_cast %c4_i32 : i32 to index
    %c0_184 = arith.constant 0 : index
    %c0_185 = arith.constant 0 : index
    %427 = vector.load %arg28[%426, %c0_184, %c0_185] : memref<8x8x32xf32, #tpu.memory_space<vmem>>, vector<1x8x32xf32>
    %428 = vector.shape_cast %427 : vector<1x8x32xf32> to vector<8x32xf32>
    %429 = arith.addf %425, %428 : vector<8x32xf32>
    %cst_186 = arith.constant 0.000000e+00 : f32
    %430 = vector.broadcast %cst_186 : f32 to vector<8x32xf32>
    %431 = arith.maximumf %429, %430 : vector<8x32xf32>
    %432 = arith.truncf %431 : vector<8x32xf32> to vector<8x32xbf16>
    %c0_187 = arith.constant 0 : index
    %c0_188 = arith.constant 0 : index
    %433 = vector.load %arg14[%c0_187, %c0_188] : memref<32x32xbf16, #tpu.memory_space<vmem>>, vector<32x32xbf16>
    %cst_189 = arith.constant dense<0.000000e+00> : vector<8x32xf32>
    %434 = tpu.matmul %432, %433, %cst_189 {dimension_numbers = #tpu.dot_dimension_numbers<[1], [0], [0], [1], [0, 0, 1, 1], [], []>} : vector<8x32xbf16>, vector<32x32xbf16>, vector<8x32xf32> -> vector<8x32xf32>
    %435 = arith.addf %434, %31 : vector<8x32xf32>
    %436 = vector.extract_strided_slice %380 {offsets = [0, 24], sizes = [8, 16], strides = [1, 1]} : vector<8x80xf32> to vector<8x16xf32>
    %437 = vector.extract_strided_slice %435 {offsets = [0, 0], sizes = [8, 16], strides = [1, 1]} : vector<8x32xf32> to vector<8x16xf32>
    %438 = vector.extract_strided_slice %435 {offsets = [0, 16], sizes = [8, 16], strides = [1, 1]} : vector<8x32xf32> to vector<8x16xf32>
    %439 = math.absf %438 : vector<8x16xf32>
    %cst_190 = arith.constant 0.000000e+00 : f32
    %440 = vector.broadcast %cst_190 : f32 to vector<8x16xf32>
    %441 = arith.subf %440, %439 : vector<8x16xf32>
    %442 = math.exp %441 : vector<8x16xf32>
    %443 = math.log1p %442 : vector<8x16xf32>
    %cst_191 = arith.constant 0.000000e+00 : f32
    %444 = vector.broadcast %cst_191 : f32 to vector<8x16xf32>
    %445 = arith.maximumf %438, %444 : vector<8x16xf32>
    %446 = arith.addf %443, %445 : vector<8x16xf32>
    %cst_192 = arith.constant 1.000000e-01 : f32
    %447 = vector.broadcast %cst_192 : f32 to vector<8x16xf32>
    %448 = arith.addf %446, %447 : vector<8x16xf32>
    %449 = arith.mulf %448, %436 : vector<8x16xf32>
    %450 = arith.addf %437, %449 : vector<8x16xf32>
    %451 = arith.index_cast %c4_i32 : i32 to index
    %c0_193 = arith.constant 0 : index
    %c0_194 = arith.constant 0 : index
    %452 = vector.load %arg24[%451, %c0_193, %c0_194] : memref<8x8x16xf32, #tpu.memory_space<vmem>>, vector<1x8x16xf32>
    %453 = vector.shape_cast %452 : vector<1x8x16xf32> to vector<8x16xf32>
    %454 = vector.shape_cast %437 : vector<8x16xf32> to vector<1x8x16xf32>
    tpu.vector_store %arg24[%451, %c0_193, %c0_194], %454 {strides = array<i32>} : memref<8x8x16xf32, #tpu.memory_space<vmem>>, vector<1x8x16xf32>,
    %455 = arith.index_cast %c4_i32 : i32 to index
    %c0_195 = arith.constant 0 : index
    %c0_196 = arith.constant 0 : index
    %456 = vector.load %arg25[%455, %c0_195, %c0_196] : memref<8x8x16xf32, #tpu.memory_space<vmem>>, vector<1x8x16xf32>
    %457 = vector.shape_cast %456 : vector<1x8x16xf32> to vector<8x16xf32>
    %458 = vector.shape_cast %448 : vector<8x16xf32> to vector<1x8x16xf32>
    tpu.vector_store %arg25[%455, %c0_195, %c0_196], %458 {strides = array<i32>} : memref<8x8x16xf32, #tpu.memory_space<vmem>>, vector<1x8x16xf32>,
    %459 = arith.index_cast %c4_i32 : i32 to index
    %c0_197 = arith.constant 0 : index
    %c0_198 = arith.constant 0 : index
    %460 = vector.load %arg26[%459, %c0_197, %c0_198] : memref<8x8x16xf32, #tpu.memory_space<vmem>>, vector<1x8x16xf32>
    %461 = vector.shape_cast %460 : vector<1x8x16xf32> to vector<8x16xf32>
    %462 = vector.shape_cast %450 : vector<8x16xf32> to vector<1x8x16xf32>
    tpu.vector_store %arg26[%459, %c0_197, %c0_198], %462 {strides = array<i32>} : memref<8x8x16xf32, #tpu.memory_space<vmem>>, vector<1x8x16xf32>,
    %c5_i32 = arith.constant 5 : i32
    %463 = arith.index_cast %c5_i32 : i32 to index
    %c0_199 = arith.constant 0 : index
    %c0_200 = arith.constant 0 : index
    %464 = vector.load %arg4[%463, %c0_199, %c0_200] : memref<8x8x80xf32, #tpu.memory_space<vmem>>, vector<1x8x80xf32>
    %465 = vector.shape_cast %464 : vector<1x8x80xf32> to vector<8x80xf32>
    %466 = vector.extract_strided_slice %465 {offsets = [0, 40], sizes = [8, 16], strides = [1, 1]} : vector<8x80xf32> to vector<8x16xf32>
    %467 = arith.mulf %450, %466 : vector<8x16xf32>
    %468 = arith.truncf %467 : vector<8x16xf32> to vector<8x16xbf16>
    %c0_201 = arith.constant 0 : index
    %c0_202 = arith.constant 0 : index
    %469 = vector.load %arg5[%c0_201, %c0_202] : memref<16x32xbf16, #tpu.memory_space<vmem>>, vector<16x32xbf16>
    %cst_203 = arith.constant dense<0.000000e+00> : vector<8x32xf32>
    %470 = tpu.matmul %468, %469, %cst_203 {dimension_numbers = #tpu.dot_dimension_numbers<[1], [0], [0], [1], [0, 0, 1, 1], [], []>} : vector<8x16xbf16>, vector<16x32xbf16>, vector<8x32xf32> -> vector<8x32xf32>
    %471 = arith.index_cast %c5_i32 : i32 to index
    %c0_204 = arith.constant 0 : index
    %c0_205 = arith.constant 0 : index
    %472 = vector.load %arg27[%471, %c0_204, %c0_205] : memref<8x8x32xf32, #tpu.memory_space<vmem>>, vector<1x8x32xf32>
    %473 = vector.shape_cast %472 : vector<1x8x32xf32> to vector<8x32xf32>
    %474 = arith.addf %470, %473 : vector<8x32xf32>
    %cst_206 = arith.constant 0.000000e+00 : f32
    %475 = vector.broadcast %cst_206 : f32 to vector<8x32xf32>
    %476 = arith.maximumf %474, %475 : vector<8x32xf32>
    %477 = arith.truncf %476 : vector<8x32xf32> to vector<8x32xbf16>
    %c0_207 = arith.constant 0 : index
    %c0_208 = arith.constant 0 : index
    %478 = vector.load %arg8[%c0_207, %c0_208] : memref<32x96xbf16, #tpu.memory_space<vmem>>, vector<32x96xbf16>
    %cst_209 = arith.constant dense<0.000000e+00> : vector<8x96xf32>
    %479 = tpu.matmul %477, %478, %cst_209 {dimension_numbers = #tpu.dot_dimension_numbers<[1], [0], [0], [1], [0, 0, 1, 1], [], []>} : vector<8x32xbf16>, vector<32x96xbf16>, vector<8x96xf32> -> vector<8x96xf32>
    %480 = arith.addf %479, %25 : vector<8x96xf32>
    %481 = vector.extract_strided_slice %480 {offsets = [0, 0], sizes = [8, 64], strides = [1, 1]} : vector<8x96xf32> to vector<8x64xf32>
    %482 = vector.extract_strided_slice %424 {offsets = [0, 0], sizes = [8, 64], strides = [1, 1]} : vector<8x96xf32> to vector<8x64xf32>
    %483 = arith.addf %481, %482 : vector<8x64xf32>
    %484 = arith.negf %483 : vector<8x64xf32>
    %485 = math.exp %484 : vector<8x64xf32>
    %cst_210 = arith.constant 1.000000e+00 : f32
    %486 = vector.broadcast %cst_210 : f32 to vector<8x64xf32>
    %487 = arith.addf %486, %485 : vector<8x64xf32>
    %488 = arith.divf %486, %487 : vector<8x64xf32>
    %489 = vector.extract_strided_slice %488 {offsets = [0, 0], sizes = [8, 32], strides = [1, 1]} : vector<8x64xf32> to vector<8x32xf32>
    %490 = vector.extract_strided_slice %488 {offsets = [0, 32], sizes = [8, 32], strides = [1, 1]} : vector<8x64xf32> to vector<8x32xf32>
    %491 = vector.extract_strided_slice %480 {offsets = [0, 64], sizes = [8, 32], strides = [1, 1]} : vector<8x96xf32> to vector<8x32xf32>
    %492 = vector.extract_strided_slice %424 {offsets = [0, 64], sizes = [8, 32], strides = [1, 1]} : vector<8x96xf32> to vector<8x32xf32>
    %493 = arith.addf %492, %28 : vector<8x32xf32>
    %494 = arith.mulf %489, %493 : vector<8x32xf32>
    %495 = arith.addf %491, %494 : vector<8x32xf32>
    %496 = math.tanh %495 : vector<8x32xf32>
    %cst_211 = arith.constant 1.000000e+00 : f32
    %497 = vector.broadcast %cst_211 : f32 to vector<8x32xf32>
    %498 = arith.subf %497, %490 : vector<8x32xf32>
    %499 = arith.mulf %498, %496 : vector<8x32xf32>
    %500 = arith.mulf %490, %416 : vector<8x32xf32>
    %501 = arith.addf %499, %500 : vector<8x32xf32>
    %502 = arith.index_cast %c5_i32 : i32 to index
    %c0_212 = arith.constant 0 : index
    %c0_213 = arith.constant 0 : index
    %503 = vector.load %arg23[%502, %c0_212, %c0_213] : memref<8x8x32xf32, #tpu.memory_space<vmem>>, vector<1x8x32xf32>
    %504 = vector.shape_cast %503 : vector<1x8x32xf32> to vector<8x32xf32>
    %505 = vector.shape_cast %501 : vector<8x32xf32> to vector<1x8x32xf32>
    tpu.vector_store %arg23[%502, %c0_212, %c0_213], %505 {strides = array<i32>} : memref<8x8x32xf32, #tpu.memory_space<vmem>>, vector<1x8x32xf32>,
    %506 = arith.truncf %501 : vector<8x32xf32> to vector<8x32xbf16>
    %c0_214 = arith.constant 0 : index
    %c0_215 = arith.constant 0 : index
    %507 = vector.load %arg11[%c0_214, %c0_215] : memref<32x128xbf16, #tpu.memory_space<vmem>>, vector<32x128xbf16>
    %cst_216 = arith.constant dense<0.000000e+00> : vector<8x128xf32>
    %508 = tpu.matmul %506, %507, %cst_216 {dimension_numbers = #tpu.dot_dimension_numbers<[1], [0], [0], [1], [0, 0, 1, 1], [], []>} : vector<8x32xbf16>, vector<32x128xbf16>, vector<8x128xf32> -> vector<8x128xf32>
    %509 = vector.extract_strided_slice %508 {offsets = [0, 0], sizes = [8, 96], strides = [1, 1]} : vector<8x128xf32> to vector<8x96xf32>
    %510 = vector.extract_strided_slice %508 {offsets = [0, 96], sizes = [8, 32], strides = [1, 1]} : vector<8x128xf32> to vector<8x32xf32>
    %511 = arith.index_cast %c5_i32 : i32 to index
    %c0_217 = arith.constant 0 : index
    %c0_218 = arith.constant 0 : index
    %512 = vector.load %arg28[%511, %c0_217, %c0_218] : memref<8x8x32xf32, #tpu.memory_space<vmem>>, vector<1x8x32xf32>
    %513 = vector.shape_cast %512 : vector<1x8x32xf32> to vector<8x32xf32>
    %514 = arith.addf %510, %513 : vector<8x32xf32>
    %cst_219 = arith.constant 0.000000e+00 : f32
    %515 = vector.broadcast %cst_219 : f32 to vector<8x32xf32>
    %516 = arith.maximumf %514, %515 : vector<8x32xf32>
    %517 = arith.truncf %516 : vector<8x32xf32> to vector<8x32xbf16>
    %c0_220 = arith.constant 0 : index
    %c0_221 = arith.constant 0 : index
    %518 = vector.load %arg14[%c0_220, %c0_221] : memref<32x32xbf16, #tpu.memory_space<vmem>>, vector<32x32xbf16>
    %cst_222 = arith.constant dense<0.000000e+00> : vector<8x32xf32>
    %519 = tpu.matmul %517, %518, %cst_222 {dimension_numbers = #tpu.dot_dimension_numbers<[1], [0], [0], [1], [0, 0, 1, 1], [], []>} : vector<8x32xbf16>, vector<32x32xbf16>, vector<8x32xf32> -> vector<8x32xf32>
    %520 = arith.addf %519, %31 : vector<8x32xf32>
    %521 = vector.extract_strided_slice %465 {offsets = [0, 24], sizes = [8, 16], strides = [1, 1]} : vector<8x80xf32> to vector<8x16xf32>
    %522 = vector.extract_strided_slice %520 {offsets = [0, 0], sizes = [8, 16], strides = [1, 1]} : vector<8x32xf32> to vector<8x16xf32>
    %523 = vector.extract_strided_slice %520 {offsets = [0, 16], sizes = [8, 16], strides = [1, 1]} : vector<8x32xf32> to vector<8x16xf32>
    %524 = math.absf %523 : vector<8x16xf32>
    %cst_223 = arith.constant 0.000000e+00 : f32
    %525 = vector.broadcast %cst_223 : f32 to vector<8x16xf32>
    %526 = arith.subf %525, %524 : vector<8x16xf32>
    %527 = math.exp %526 : vector<8x16xf32>
    %528 = math.log1p %527 : vector<8x16xf32>
    %cst_224 = arith.constant 0.000000e+00 : f32
    %529 = vector.broadcast %cst_224 : f32 to vector<8x16xf32>
    %530 = arith.maximumf %523, %529 : vector<8x16xf32>
    %531 = arith.addf %528, %530 : vector<8x16xf32>
    %cst_225 = arith.constant 1.000000e-01 : f32
    %532 = vector.broadcast %cst_225 : f32 to vector<8x16xf32>
    %533 = arith.addf %531, %532 : vector<8x16xf32>
    %534 = arith.mulf %533, %521 : vector<8x16xf32>
    %535 = arith.addf %522, %534 : vector<8x16xf32>
    %536 = arith.index_cast %c5_i32 : i32 to index
    %c0_226 = arith.constant 0 : index
    %c0_227 = arith.constant 0 : index
    %537 = vector.load %arg24[%536, %c0_226, %c0_227] : memref<8x8x16xf32, #tpu.memory_space<vmem>>, vector<1x8x16xf32>
    %538 = vector.shape_cast %537 : vector<1x8x16xf32> to vector<8x16xf32>
    %539 = vector.shape_cast %522 : vector<8x16xf32> to vector<1x8x16xf32>
    tpu.vector_store %arg24[%536, %c0_226, %c0_227], %539 {strides = array<i32>} : memref<8x8x16xf32, #tpu.memory_space<vmem>>, vector<1x8x16xf32>,
    %540 = arith.index_cast %c5_i32 : i32 to index
    %c0_228 = arith.constant 0 : index
    %c0_229 = arith.constant 0 : index
    %541 = vector.load %arg25[%540, %c0_228, %c0_229] : memref<8x8x16xf32, #tpu.memory_space<vmem>>, vector<1x8x16xf32>
    %542 = vector.shape_cast %541 : vector<1x8x16xf32> to vector<8x16xf32>
    %543 = vector.shape_cast %533 : vector<8x16xf32> to vector<1x8x16xf32>
    tpu.vector_store %arg25[%540, %c0_228, %c0_229], %543 {strides = array<i32>} : memref<8x8x16xf32, #tpu.memory_space<vmem>>, vector<1x8x16xf32>,
    %544 = arith.index_cast %c5_i32 : i32 to index
    %c0_230 = arith.constant 0 : index
    %c0_231 = arith.constant 0 : index
    %545 = vector.load %arg26[%544, %c0_230, %c0_231] : memref<8x8x16xf32, #tpu.memory_space<vmem>>, vector<1x8x16xf32>
    %546 = vector.shape_cast %545 : vector<1x8x16xf32> to vector<8x16xf32>
    %547 = vector.shape_cast %535 : vector<8x16xf32> to vector<1x8x16xf32>
    tpu.vector_store %arg26[%544, %c0_230, %c0_231], %547 {strides = array<i32>} : memref<8x8x16xf32, #tpu.memory_space<vmem>>, vector<1x8x16xf32>,
    %c6_i32 = arith.constant 6 : i32
    %548 = arith.index_cast %c6_i32 : i32 to index
    %c0_232 = arith.constant 0 : index
    %c0_233 = arith.constant 0 : index
    %549 = vector.load %arg4[%548, %c0_232, %c0_233] : memref<8x8x80xf32, #tpu.memory_space<vmem>>, vector<1x8x80xf32>
    %550 = vector.shape_cast %549 : vector<1x8x80xf32> to vector<8x80xf32>
    %551 = vector.extract_strided_slice %550 {offsets = [0, 40], sizes = [8, 16], strides = [1, 1]} : vector<8x80xf32> to vector<8x16xf32>
    %552 = arith.mulf %535, %551 : vector<8x16xf32>
    %553 = arith.truncf %552 : vector<8x16xf32> to vector<8x16xbf16>
    %c0_234 = arith.constant 0 : index
    %c0_235 = arith.constant 0 : index
    %554 = vector.load %arg5[%c0_234, %c0_235] : memref<16x32xbf16, #tpu.memory_space<vmem>>, vector<16x32xbf16>
    %cst_236 = arith.constant dense<0.000000e+00> : vector<8x32xf32>
    %555 = tpu.matmul %553, %554, %cst_236 {dimension_numbers = #tpu.dot_dimension_numbers<[1], [0], [0], [1], [0, 0, 1, 1], [], []>} : vector<8x16xbf16>, vector<16x32xbf16>, vector<8x32xf32> -> vector<8x32xf32>
    %556 = arith.index_cast %c6_i32 : i32 to index
    %c0_237 = arith.constant 0 : index
    %c0_238 = arith.constant 0 : index
    %557 = vector.load %arg27[%556, %c0_237, %c0_238] : memref<8x8x32xf32, #tpu.memory_space<vmem>>, vector<1x8x32xf32>
    %558 = vector.shape_cast %557 : vector<1x8x32xf32> to vector<8x32xf32>
    %559 = arith.addf %555, %558 : vector<8x32xf32>
    %cst_239 = arith.constant 0.000000e+00 : f32
    %560 = vector.broadcast %cst_239 : f32 to vector<8x32xf32>
    %561 = arith.maximumf %559, %560 : vector<8x32xf32>
    %562 = arith.truncf %561 : vector<8x32xf32> to vector<8x32xbf16>
    %c0_240 = arith.constant 0 : index
    %c0_241 = arith.constant 0 : index
    %563 = vector.load %arg8[%c0_240, %c0_241] : memref<32x96xbf16, #tpu.memory_space<vmem>>, vector<32x96xbf16>
    %cst_242 = arith.constant dense<0.000000e+00> : vector<8x96xf32>
    %564 = tpu.matmul %562, %563, %cst_242 {dimension_numbers = #tpu.dot_dimension_numbers<[1], [0], [0], [1], [0, 0, 1, 1], [], []>} : vector<8x32xbf16>, vector<32x96xbf16>, vector<8x96xf32> -> vector<8x96xf32>
    %565 = arith.addf %564, %25 : vector<8x96xf32>
    %566 = vector.extract_strided_slice %565 {offsets = [0, 0], sizes = [8, 64], strides = [1, 1]} : vector<8x96xf32> to vector<8x64xf32>
    %567 = vector.extract_strided_slice %509 {offsets = [0, 0], sizes = [8, 64], strides = [1, 1]} : vector<8x96xf32> to vector<8x64xf32>
    %568 = arith.addf %566, %567 : vector<8x64xf32>
    %569 = arith.negf %568 : vector<8x64xf32>
    %570 = math.exp %569 : vector<8x64xf32>
    %cst_243 = arith.constant 1.000000e+00 : f32
    %571 = vector.broadcast %cst_243 : f32 to vector<8x64xf32>
    %572 = arith.addf %571, %570 : vector<8x64xf32>
    %573 = arith.divf %571, %572 : vector<8x64xf32>
    %574 = vector.extract_strided_slice %573 {offsets = [0, 0], sizes = [8, 32], strides = [1, 1]} : vector<8x64xf32> to vector<8x32xf32>
    %575 = vector.extract_strided_slice %573 {offsets = [0, 32], sizes = [8, 32], strides = [1, 1]} : vector<8x64xf32> to vector<8x32xf32>
    %576 = vector.extract_strided_slice %565 {offsets = [0, 64], sizes = [8, 32], strides = [1, 1]} : vector<8x96xf32> to vector<8x32xf32>
    %577 = vector.extract_strided_slice %509 {offsets = [0, 64], sizes = [8, 32], strides = [1, 1]} : vector<8x96xf32> to vector<8x32xf32>
    %578 = arith.addf %577, %28 : vector<8x32xf32>
    %579 = arith.mulf %574, %578 : vector<8x32xf32>
    %580 = arith.addf %576, %579 : vector<8x32xf32>
    %581 = math.tanh %580 : vector<8x32xf32>
    %cst_244 = arith.constant 1.000000e+00 : f32
    %582 = vector.broadcast %cst_244 : f32 to vector<8x32xf32>
    %583 = arith.subf %582, %575 : vector<8x32xf32>
    %584 = arith.mulf %583, %581 : vector<8x32xf32>
    %585 = arith.mulf %575, %501 : vector<8x32xf32>
    %586 = arith.addf %584, %585 : vector<8x32xf32>
    %587 = arith.index_cast %c6_i32 : i32 to index
    %c0_245 = arith.constant 0 : index
    %c0_246 = arith.constant 0 : index
    %588 = vector.load %arg23[%587, %c0_245, %c0_246] : memref<8x8x32xf32, #tpu.memory_space<vmem>>, vector<1x8x32xf32>
    %589 = vector.shape_cast %588 : vector<1x8x32xf32> to vector<8x32xf32>
    %590 = vector.shape_cast %586 : vector<8x32xf32> to vector<1x8x32xf32>
    tpu.vector_store %arg23[%587, %c0_245, %c0_246], %590 {strides = array<i32>} : memref<8x8x32xf32, #tpu.memory_space<vmem>>, vector<1x8x32xf32>,
    %591 = arith.truncf %586 : vector<8x32xf32> to vector<8x32xbf16>
    %c0_247 = arith.constant 0 : index
    %c0_248 = arith.constant 0 : index
    %592 = vector.load %arg11[%c0_247, %c0_248] : memref<32x128xbf16, #tpu.memory_space<vmem>>, vector<32x128xbf16>
    %cst_249 = arith.constant dense<0.000000e+00> : vector<8x128xf32>
    %593 = tpu.matmul %591, %592, %cst_249 {dimension_numbers = #tpu.dot_dimension_numbers<[1], [0], [0], [1], [0, 0, 1, 1], [], []>} : vector<8x32xbf16>, vector<32x128xbf16>, vector<8x128xf32> -> vector<8x128xf32>
    %594 = vector.extract_strided_slice %593 {offsets = [0, 0], sizes = [8, 96], strides = [1, 1]} : vector<8x128xf32> to vector<8x96xf32>
    %595 = vector.extract_strided_slice %593 {offsets = [0, 96], sizes = [8, 32], strides = [1, 1]} : vector<8x128xf32> to vector<8x32xf32>
    %596 = arith.index_cast %c6_i32 : i32 to index
    %c0_250 = arith.constant 0 : index
    %c0_251 = arith.constant 0 : index
    %597 = vector.load %arg28[%596, %c0_250, %c0_251] : memref<8x8x32xf32, #tpu.memory_space<vmem>>, vector<1x8x32xf32>
    %598 = vector.shape_cast %597 : vector<1x8x32xf32> to vector<8x32xf32>
    %599 = arith.addf %595, %598 : vector<8x32xf32>
    %cst_252 = arith.constant 0.000000e+00 : f32
    %600 = vector.broadcast %cst_252 : f32 to vector<8x32xf32>
    %601 = arith.maximumf %599, %600 : vector<8x32xf32>
    %602 = arith.truncf %601 : vector<8x32xf32> to vector<8x32xbf16>
    %c0_253 = arith.constant 0 : index
    %c0_254 = arith.constant 0 : index
    %603 = vector.load %arg14[%c0_253, %c0_254] : memref<32x32xbf16, #tpu.memory_space<vmem>>, vector<32x32xbf16>
    %cst_255 = arith.constant dense<0.000000e+00> : vector<8x32xf32>
    %604 = tpu.matmul %602, %603, %cst_255 {dimension_numbers = #tpu.dot_dimension_numbers<[1], [0], [0], [1], [0, 0, 1, 1], [], []>} : vector<8x32xbf16>, vector<32x32xbf16>, vector<8x32xf32> -> vector<8x32xf32>
    %605 = arith.addf %604, %31 : vector<8x32xf32>
    %606 = vector.extract_strided_slice %550 {offsets = [0, 24], sizes = [8, 16], strides = [1, 1]} : vector<8x80xf32> to vector<8x16xf32>
    %607 = vector.extract_strided_slice %605 {offsets = [0, 0], sizes = [8, 16], strides = [1, 1]} : vector<8x32xf32> to vector<8x16xf32>
    %608 = vector.extract_strided_slice %605 {offsets = [0, 16], sizes = [8, 16], strides = [1, 1]} : vector<8x32xf32> to vector<8x16xf32>
    %609 = math.absf %608 : vector<8x16xf32>
    %cst_256 = arith.constant 0.000000e+00 : f32
    %610 = vector.broadcast %cst_256 : f32 to vector<8x16xf32>
    %611 = arith.subf %610, %609 : vector<8x16xf32>
    %612 = math.exp %611 : vector<8x16xf32>
    %613 = math.log1p %612 : vector<8x16xf32>
    %cst_257 = arith.constant 0.000000e+00 : f32
    %614 = vector.broadcast %cst_257 : f32 to vector<8x16xf32>
    %615 = arith.maximumf %608, %614 : vector<8x16xf32>
    %616 = arith.addf %613, %615 : vector<8x16xf32>
    %cst_258 = arith.constant 1.000000e-01 : f32
    %617 = vector.broadcast %cst_258 : f32 to vector<8x16xf32>
    %618 = arith.addf %616, %617 : vector<8x16xf32>
    %619 = arith.mulf %618, %606 : vector<8x16xf32>
    %620 = arith.addf %607, %619 : vector<8x16xf32>
    %621 = arith.index_cast %c6_i32 : i32 to index
    %c0_259 = arith.constant 0 : index
    %c0_260 = arith.constant 0 : index
    %622 = vector.load %arg24[%621, %c0_259, %c0_260] : memref<8x8x16xf32, #tpu.memory_space<vmem>>, vector<1x8x16xf32>
    %623 = vector.shape_cast %622 : vector<1x8x16xf32> to vector<8x16xf32>
    %624 = vector.shape_cast %607 : vector<8x16xf32> to vector<1x8x16xf32>
    tpu.vector_store %arg24[%621, %c0_259, %c0_260], %624 {strides = array<i32>} : memref<8x8x16xf32, #tpu.memory_space<vmem>>, vector<1x8x16xf32>,
    %625 = arith.index_cast %c6_i32 : i32 to index
    %c0_261 = arith.constant 0 : index
    %c0_262 = arith.constant 0 : index
    %626 = vector.load %arg25[%625, %c0_261, %c0_262] : memref<8x8x16xf32, #tpu.memory_space<vmem>>, vector<1x8x16xf32>
    %627 = vector.shape_cast %626 : vector<1x8x16xf32> to vector<8x16xf32>
    %628 = vector.shape_cast %618 : vector<8x16xf32> to vector<1x8x16xf32>
    tpu.vector_store %arg25[%625, %c0_261, %c0_262], %628 {strides = array<i32>} : memref<8x8x16xf32, #tpu.memory_space<vmem>>, vector<1x8x16xf32>,
    %629 = arith.index_cast %c6_i32 : i32 to index
    %c0_263 = arith.constant 0 : index
    %c0_264 = arith.constant 0 : index
    %630 = vector.load %arg26[%629, %c0_263, %c0_264] : memref<8x8x16xf32, #tpu.memory_space<vmem>>, vector<1x8x16xf32>
    %631 = vector.shape_cast %630 : vector<1x8x16xf32> to vector<8x16xf32>
    %632 = vector.shape_cast %620 : vector<8x16xf32> to vector<1x8x16xf32>
    tpu.vector_store %arg26[%629, %c0_263, %c0_264], %632 {strides = array<i32>} : memref<8x8x16xf32, #tpu.memory_space<vmem>>, vector<1x8x16xf32>,
    %c7_i32 = arith.constant 7 : i32
    %633 = arith.index_cast %c7_i32 : i32 to index
    %c0_265 = arith.constant 0 : index
    %c0_266 = arith.constant 0 : index
    %634 = vector.load %arg4[%633, %c0_265, %c0_266] : memref<8x8x80xf32, #tpu.memory_space<vmem>>, vector<1x8x80xf32>
    %635 = vector.shape_cast %634 : vector<1x8x80xf32> to vector<8x80xf32>
    %636 = vector.extract_strided_slice %635 {offsets = [0, 40], sizes = [8, 16], strides = [1, 1]} : vector<8x80xf32> to vector<8x16xf32>
    %637 = arith.mulf %620, %636 : vector<8x16xf32>
    %638 = arith.truncf %637 : vector<8x16xf32> to vector<8x16xbf16>
    %c0_267 = arith.constant 0 : index
    %c0_268 = arith.constant 0 : index
    %639 = vector.load %arg5[%c0_267, %c0_268] : memref<16x32xbf16, #tpu.memory_space<vmem>>, vector<16x32xbf16>
    %cst_269 = arith.constant dense<0.000000e+00> : vector<8x32xf32>
    %640 = tpu.matmul %638, %639, %cst_269 {dimension_numbers = #tpu.dot_dimension_numbers<[1], [0], [0], [1], [0, 0, 1, 1], [], []>} : vector<8x16xbf16>, vector<16x32xbf16>, vector<8x32xf32> -> vector<8x32xf32>
    %641 = arith.index_cast %c7_i32 : i32 to index
    %c0_270 = arith.constant 0 : index
    %c0_271 = arith.constant 0 : index
    %642 = vector.load %arg27[%641, %c0_270, %c0_271] : memref<8x8x32xf32, #tpu.memory_space<vmem>>, vector<1x8x32xf32>
    %643 = vector.shape_cast %642 : vector<1x8x32xf32> to vector<8x32xf32>
    %644 = arith.addf %640, %643 : vector<8x32xf32>
    %cst_272 = arith.constant 0.000000e+00 : f32
    %645 = vector.broadcast %cst_272 : f32 to vector<8x32xf32>
    %646 = arith.maximumf %644, %645 : vector<8x32xf32>
    %647 = arith.truncf %646 : vector<8x32xf32> to vector<8x32xbf16>
    %c0_273 = arith.constant 0 : index
    %c0_274 = arith.constant 0 : index
    %648 = vector.load %arg8[%c0_273, %c0_274] : memref<32x96xbf16, #tpu.memory_space<vmem>>, vector<32x96xbf16>
    %cst_275 = arith.constant dense<0.000000e+00> : vector<8x96xf32>
    %649 = tpu.matmul %647, %648, %cst_275 {dimension_numbers = #tpu.dot_dimension_numbers<[1], [0], [0], [1], [0, 0, 1, 1], [], []>} : vector<8x32xbf16>, vector<32x96xbf16>, vector<8x96xf32> -> vector<8x96xf32>
    %650 = arith.addf %649, %25 : vector<8x96xf32>
    %651 = vector.extract_strided_slice %650 {offsets = [0, 0], sizes = [8, 64], strides = [1, 1]} : vector<8x96xf32> to vector<8x64xf32>
    %652 = vector.extract_strided_slice %594 {offsets = [0, 0], sizes = [8, 64], strides = [1, 1]} : vector<8x96xf32> to vector<8x64xf32>
    %653 = arith.addf %651, %652 : vector<8x64xf32>
    %654 = arith.negf %653 : vector<8x64xf32>
    %655 = math.exp %654 : vector<8x64xf32>
    %cst_276 = arith.constant 1.000000e+00 : f32
    %656 = vector.broadcast %cst_276 : f32 to vector<8x64xf32>
    %657 = arith.addf %656, %655 : vector<8x64xf32>
    %658 = arith.divf %656, %657 : vector<8x64xf32>
    %659 = vector.extract_strided_slice %658 {offsets = [0, 0], sizes = [8, 32], strides = [1, 1]} : vector<8x64xf32> to vector<8x32xf32>
    %660 = vector.extract_strided_slice %658 {offsets = [0, 32], sizes = [8, 32], strides = [1, 1]} : vector<8x64xf32> to vector<8x32xf32>
    %661 = vector.extract_strided_slice %650 {offsets = [0, 64], sizes = [8, 32], strides = [1, 1]} : vector<8x96xf32> to vector<8x32xf32>
    %662 = vector.extract_strided_slice %594 {offsets = [0, 64], sizes = [8, 32], strides = [1, 1]} : vector<8x96xf32> to vector<8x32xf32>
    %663 = arith.addf %662, %28 : vector<8x32xf32>
    %664 = arith.mulf %659, %663 : vector<8x32xf32>
    %665 = arith.addf %661, %664 : vector<8x32xf32>
    %666 = math.tanh %665 : vector<8x32xf32>
    %cst_277 = arith.constant 1.000000e+00 : f32
    %667 = vector.broadcast %cst_277 : f32 to vector<8x32xf32>
    %668 = arith.subf %667, %660 : vector<8x32xf32>
    %669 = arith.mulf %668, %666 : vector<8x32xf32>
    %670 = arith.mulf %660, %586 : vector<8x32xf32>
    %671 = arith.addf %669, %670 : vector<8x32xf32>
    %672 = arith.index_cast %c7_i32 : i32 to index
    %c0_278 = arith.constant 0 : index
    %c0_279 = arith.constant 0 : index
    %673 = vector.load %arg23[%672, %c0_278, %c0_279] : memref<8x8x32xf32, #tpu.memory_space<vmem>>, vector<1x8x32xf32>
    %674 = vector.shape_cast %673 : vector<1x8x32xf32> to vector<8x32xf32>
    %675 = vector.shape_cast %671 : vector<8x32xf32> to vector<1x8x32xf32>
    tpu.vector_store %arg23[%672, %c0_278, %c0_279], %675 {strides = array<i32>} : memref<8x8x32xf32, #tpu.memory_space<vmem>>, vector<1x8x32xf32>,
    %676 = arith.truncf %671 : vector<8x32xf32> to vector<8x32xbf16>
    %c0_280 = arith.constant 0 : index
    %c0_281 = arith.constant 0 : index
    %677 = vector.load %arg11[%c0_280, %c0_281] : memref<32x128xbf16, #tpu.memory_space<vmem>>, vector<32x128xbf16>
    %cst_282 = arith.constant dense<0.000000e+00> : vector<8x128xf32>
    %678 = tpu.matmul %676, %677, %cst_282 {dimension_numbers = #tpu.dot_dimension_numbers<[1], [0], [0], [1], [0, 0, 1, 1], [], []>} : vector<8x32xbf16>, vector<32x128xbf16>, vector<8x128xf32> -> vector<8x128xf32>
    %679 = vector.extract_strided_slice %678 {offsets = [0, 0], sizes = [8, 96], strides = [1, 1]} : vector<8x128xf32> to vector<8x96xf32>
    %680 = vector.extract_strided_slice %678 {offsets = [0, 96], sizes = [8, 32], strides = [1, 1]} : vector<8x128xf32> to vector<8x32xf32>
    %681 = arith.index_cast %c7_i32 : i32 to index
    %c0_283 = arith.constant 0 : index
    %c0_284 = arith.constant 0 : index
    %682 = vector.load %arg28[%681, %c0_283, %c0_284] : memref<8x8x32xf32, #tpu.memory_space<vmem>>, vector<1x8x32xf32>
    %683 = vector.shape_cast %682 : vector<1x8x32xf32> to vector<8x32xf32>
    %684 = arith.addf %680, %683 : vector<8x32xf32>
    %cst_285 = arith.constant 0.000000e+00 : f32
    %685 = vector.broadcast %cst_285 : f32 to vector<8x32xf32>
    %686 = arith.maximumf %684, %685 : vector<8x32xf32>
    %687 = arith.truncf %686 : vector<8x32xf32> to vector<8x32xbf16>
    %c0_286 = arith.constant 0 : index
    %c0_287 = arith.constant 0 : index
    %688 = vector.load %arg14[%c0_286, %c0_287] : memref<32x32xbf16, #tpu.memory_space<vmem>>, vector<32x32xbf16>
    %cst_288 = arith.constant dense<0.000000e+00> : vector<8x32xf32>
    %689 = tpu.matmul %687, %688, %cst_288 {dimension_numbers = #tpu.dot_dimension_numbers<[1], [0], [0], [1], [0, 0, 1, 1], [], []>} : vector<8x32xbf16>, vector<32x32xbf16>, vector<8x32xf32> -> vector<8x32xf32>
    %690 = arith.addf %689, %31 : vector<8x32xf32>
    %691 = vector.extract_strided_slice %635 {offsets = [0, 24], sizes = [8, 16], strides = [1, 1]} : vector<8x80xf32> to vector<8x16xf32>
    %692 = vector.extract_strided_slice %690 {offsets = [0, 0], sizes = [8, 16], strides = [1, 1]} : vector<8x32xf32> to vector<8x16xf32>
    %693 = vector.extract_strided_slice %690 {offsets = [0, 16], sizes = [8, 16], strides = [1, 1]} : vector<8x32xf32> to vector<8x16xf32>
    %694 = math.absf %693 : vector<8x16xf32>
    %cst_289 = arith.constant 0.000000e+00 : f32
    %695 = vector.broadcast %cst_289 : f32 to vector<8x16xf32>
    %696 = arith.subf %695, %694 : vector<8x16xf32>
    %697 = math.exp %696 : vector<8x16xf32>
    %698 = math.log1p %697 : vector<8x16xf32>
    %cst_290 = arith.constant 0.000000e+00 : f32
    %699 = vector.broadcast %cst_290 : f32 to vector<8x16xf32>
    %700 = arith.maximumf %693, %699 : vector<8x16xf32>
    %701 = arith.addf %698, %700 : vector<8x16xf32>
    %cst_291 = arith.constant 1.000000e-01 : f32
    %702 = vector.broadcast %cst_291 : f32 to vector<8x16xf32>
    %703 = arith.addf %701, %702 : vector<8x16xf32>
    %704 = arith.mulf %703, %691 : vector<8x16xf32>
    %705 = arith.addf %692, %704 : vector<8x16xf32>
    %706 = arith.index_cast %c7_i32 : i32 to index
    %c0_292 = arith.constant 0 : index
    %c0_293 = arith.constant 0 : index
    %707 = vector.load %arg24[%706, %c0_292, %c0_293] : memref<8x8x16xf32, #tpu.memory_space<vmem>>, vector<1x8x16xf32>
    %708 = vector.shape_cast %707 : vector<1x8x16xf32> to vector<8x16xf32>
    %709 = vector.shape_cast %692 : vector<8x16xf32> to vector<1x8x16xf32>
    tpu.vector_store %arg24[%706, %c0_292, %c0_293], %709 {strides = array<i32>} : memref<8x8x16xf32, #tpu.memory_space<vmem>>, vector<1x8x16xf32>,
    %710 = arith.index_cast %c7_i32 : i32 to index
    %c0_294 = arith.constant 0 : index
    %c0_295 = arith.constant 0 : index
    %711 = vector.load %arg25[%710, %c0_294, %c0_295] : memref<8x8x16xf32, #tpu.memory_space<vmem>>, vector<1x8x16xf32>
    %712 = vector.shape_cast %711 : vector<1x8x16xf32> to vector<8x16xf32>
    %713 = vector.shape_cast %703 : vector<8x16xf32> to vector<1x8x16xf32>
    tpu.vector_store %arg25[%710, %c0_294, %c0_295], %713 {strides = array<i32>} : memref<8x8x16xf32, #tpu.memory_space<vmem>>, vector<1x8x16xf32>,
    %714 = arith.index_cast %c7_i32 : i32 to index
    %c0_296 = arith.constant 0 : index
    %c0_297 = arith.constant 0 : index
    %715 = vector.load %arg26[%714, %c0_296, %c0_297] : memref<8x8x16xf32, #tpu.memory_space<vmem>>, vector<1x8x16xf32>
    %716 = vector.shape_cast %715 : vector<1x8x16xf32> to vector<8x16xf32>
    %717 = vector.shape_cast %705 : vector<8x16xf32> to vector<1x8x16xf32>
    tpu.vector_store %arg26[%714, %c0_296, %c0_297], %717 {strides = array<i32>} : memref<8x8x16xf32, #tpu.memory_space<vmem>>, vector<1x8x16xf32>,
    %c8_i32 = arith.constant 8 : i32
    %c0_298 = arith.constant 0 : index
    %c0_299 = arith.constant 0 : index
    %718 = vector.load %arg21[%c0_298, %c0_299] : memref<8x32xf32, #tpu.memory_space<vmem>>, vector<8x32xf32>
    tpu.vector_store %arg21[%c0_298, %c0_299], %671 {strides = array<i32>} : memref<8x32xf32, #tpu.memory_space<vmem>>, vector<8x32xf32>,
    %c0_300 = arith.constant 0 : index
    %c0_301 = arith.constant 0 : index
    %719 = vector.load %arg22[%c0_300, %c0_301] : memref<8x16xf32, #tpu.memory_space<vmem>>, vector<8x16xf32>
    tpu.vector_store %arg22[%c0_300, %c0_301], %705 {strides = array<i32>} : memref<8x16xf32, #tpu.memory_space<vmem>>, vector<8x16xf32>,
    %c0_302 = arith.constant 0 : index
    %c0_303 = arith.constant 0 : index
    %c0_304 = arith.constant 0 : index
    %720 = vector.load %arg23[%c0_302, %c0_303, %c0_304] : memref<8x8x32xf32, #tpu.memory_space<vmem>>, vector<8x8x32xf32>
    %721 = vector.shape_cast %720 : vector<8x8x32xf32> to vector<64x32xf32>
    %722 = arith.truncf %721 : vector<64x32xf32> to vector<64x32xbf16>
    %c0_305 = arith.constant 0 : index
    %c0_306 = arith.constant 0 : index
    %723 = vector.load %arg16[%c0_305, %c0_306] : memref<32x32xbf16, #tpu.memory_space<vmem>>, vector<32x32xbf16>
    %cst_307 = arith.constant dense<0.000000e+00> : vector<64x32xf32>
    %724 = tpu.matmul %722, %723, %cst_307 {dimension_numbers = #tpu.dot_dimension_numbers<[1], [0], [0], [1], [0, 0, 1, 1], [], []>} : vector<64x32xbf16>, vector<32x32xbf16>, vector<64x32xf32> -> vector<64x32xf32>
    %c0_308 = arith.constant 0 : index
    %c0_309 = arith.constant 0 : index
    %725 = vector.load %arg17[%c0_308, %c0_309] : memref<1x32xf32, #tpu.memory_space<vmem>>, vector<1x32xf32>
    %726 = vector.broadcast %725 : vector<1x32xf32> to vector<64x32xf32>
    %727 = arith.addf %724, %726 : vector<64x32xf32>
    %cst_310 = arith.constant 0.000000e+00 : f32
    %728 = vector.broadcast %cst_310 : f32 to vector<64x32xf32>
    %729 = arith.maximumf %727, %728 : vector<64x32xf32>
    %730 = arith.truncf %729 : vector<64x32xf32> to vector<64x32xbf16>
    %c0_311 = arith.constant 0 : index
    %c0_312 = arith.constant 0 : index
    %731 = vector.load %arg18[%c0_311, %c0_312] : memref<32x32xbf16, #tpu.memory_space<vmem>>, vector<32x32xbf16>
    %cst_313 = arith.constant dense<0.000000e+00> : vector<64x32xf32>
    %732 = tpu.matmul %730, %731, %cst_313 {dimension_numbers = #tpu.dot_dimension_numbers<[1], [0], [0], [1], [0, 0, 1, 1], [], []>} : vector<64x32xbf16>, vector<32x32xbf16>, vector<64x32xf32> -> vector<64x32xf32>
    %c0_314 = arith.constant 0 : index
    %c0_315 = arith.constant 0 : index
    %733 = vector.load %arg19[%c0_314, %c0_315] : memref<1x32xf32, #tpu.memory_space<vmem>>, vector<1x32xf32>
    %734 = vector.broadcast %733 : vector<1x32xf32> to vector<64x32xf32>
    %735 = arith.addf %732, %734 : vector<64x32xf32>
    %736 = vector.extract_strided_slice %735 {offsets = [0, 0], sizes = [64, 16], strides = [1, 1]} : vector<64x32xf32> to vector<64x16xf32>
    %737 = vector.extract_strided_slice %735 {offsets = [0, 16], sizes = [64, 16], strides = [1, 1]} : vector<64x32xf32> to vector<64x16xf32>
    %738 = math.absf %737 : vector<64x16xf32>
    %cst_316 = arith.constant 0.000000e+00 : f32
    %739 = vector.broadcast %cst_316 : f32 to vector<64x16xf32>
    %740 = arith.subf %739, %738 : vector<64x16xf32>
    %741 = math.exp %740 : vector<64x16xf32>
    %742 = math.log1p %741 : vector<64x16xf32>
    %cst_317 = arith.constant 0.000000e+00 : f32
    %743 = vector.broadcast %cst_317 : f32 to vector<64x16xf32>
    %744 = arith.maximumf %737, %743 : vector<64x16xf32>
    %745 = arith.addf %742, %744 : vector<64x16xf32>
    %cst_318 = arith.constant 1.000000e-01 : f32
    %746 = vector.broadcast %cst_318 : f32 to vector<64x16xf32>
    %747 = arith.addf %745, %746 : vector<64x16xf32>
    %c0_319 = arith.constant 0 : index
    %c0_320 = arith.constant 0 : index
    %c8 = arith.constant 8 : index
    %748 = vector.load %arg4[%c0_319, %c0_320, %c8] : memref<8x8x80xf32, #tpu.memory_space<vmem>>, vector<8x8x16xf32>
    %749 = vector.shape_cast %748 : vector<8x8x16xf32> to vector<64x16xf32>
    %750 = arith.mulf %747, %749 : vector<64x16xf32>
    %751 = arith.addf %736, %750 : vector<64x16xf32>
    %752 = vector.shape_cast %736 : vector<64x16xf32> to vector<8x8x16xf32>
    %753 = vector.shape_cast %747 : vector<64x16xf32> to vector<8x8x16xf32>
    %754 = vector.shape_cast %751 : vector<64x16xf32> to vector<8x8x16xf32>
    %c0_321 = arith.constant 0 : index
    %c0_322 = arith.constant 0 : index
    %c0_323 = arith.constant 0 : index
    %755 = vector.load %arg24[%c0_321, %c0_322, %c0_323] : memref<8x8x16xf32, #tpu.memory_space<vmem>>, vector<8x8x16xf32>
    %c0_324 = arith.constant 0 : index
    %c0_325 = arith.constant 0 : index
    %c0_326 = arith.constant 0 : index
    %756 = vector.load %arg25[%c0_324, %c0_325, %c0_326] : memref<8x8x16xf32, #tpu.memory_space<vmem>>, vector<8x8x16xf32>
    %c0_327 = arith.constant 0 : index
    %c0_328 = arith.constant 0 : index
    %c0_329 = arith.constant 0 : index
    %757 = vector.load %arg26[%c0_327, %c0_328, %c0_329] : memref<8x8x16xf32, #tpu.memory_space<vmem>>, vector<8x8x16xf32>
    %758 = tpu.concatenate %720, %752, %753, %754, %755, %756, %757 in 2 : vector<8x8x32xf32>, vector<8x8x16xf32>, vector<8x8x16xf32>, vector<8x8x16xf32>, vector<8x8x16xf32>, vector<8x8x16xf32>, vector<8x8x16xf32> -> vector<8x8x128xf32>
    %c0_330 = arith.constant 0 : index
    %c0_331 = arith.constant 0 : index
    %c0_332 = arith.constant 0 : index
    %759 = vector.load %arg20[%c0_330, %c0_331, %c0_332] : memref<8x8x128xf32, #tpu.memory_space<vmem>>, vector<8x8x128xf32>
    tpu.vector_store %arg20[%c0_330, %c0_331, %c0_332], %758 {strides = array<i32>} : memref<8x8x128xf32, #tpu.memory_space<vmem>>, vector<8x8x128xf32>,
    return
  }
  func.func @transform_0(%arg0: i32, %arg1: i32) -> (i32, i32) {
    %c0_i32 = arith.constant 0 : i32
    %c0_i32_0 = arith.constant 0 : i32
    return %arg0, %c0_i32 : i32, i32
  }
  func.func @transform_1(%arg0: i32, %arg1: i32) -> (i32, i32) {
    %c0_i32 = arith.constant 0 : i32
    %c0_i32_0 = arith.constant 0 : i32
    return %arg0, %c0_i32 : i32, i32
  }
  func.func @transform_2(%arg0: i32, %arg1: i32) -> (i32, i32, i32) {
    %c0_i32 = arith.constant 0 : i32
    %c0_i32_0 = arith.constant 0 : i32
    return %arg1, %arg0, %c0_i32 : i32, i32, i32
  }
  func.func @transform_3(%arg0: i32, %arg1: i32) -> (i32, i32) {
    %c0_i32 = arith.constant 0 : i32
    %c0_i32_0 = arith.constant 0 : i32
    %c0_i32_1 = arith.constant 0 : i32
    return %c0_i32, %c0_i32_0 : i32, i32
  }
  func.func @transform_4(%arg0: i32, %arg1: i32) -> (i32, i32) {
    %c0_i32 = arith.constant 0 : i32
    %c0_i32_0 = arith.constant 0 : i32
    %c0_i32_1 = arith.constant 0 : i32
    return %c0_i32, %c0_i32_0 : i32, i32
  }
  func.func @transform_5(%arg0: i32, %arg1: i32) -> (i32, i32) {
    %c0_i32 = arith.constant 0 : i32
    %c0_i32_0 = arith.constant 0 : i32
    %c0_i32_1 = arith.constant 0 : i32
    return %c0_i32, %c0_i32_0 : i32, i32
  }
  func.func @transform_6(%arg0: i32, %arg1: i32) -> (i32, i32) {
    %c0_i32 = arith.constant 0 : i32
    %c0_i32_0 = arith.constant 0 : i32
    %c0_i32_1 = arith.constant 0 : i32
    return %c0_i32, %c0_i32_0 : i32, i32
  }
  func.func @transform_7(%arg0: i32, %arg1: i32) -> (i32, i32) {
    %c0_i32 = arith.constant 0 : i32
    %c0_i32_0 = arith.constant 0 : i32
    %c0_i32_1 = arith.constant 0 : i32
    return %c0_i32, %c0_i32_0 : i32, i32
  }
  func.func @transform_8(%arg0: i32, %arg1: i32) -> (i32, i32) {
    %c0_i32 = arith.constant 0 : i32
    %c0_i32_0 = arith.constant 0 : i32
    %c0_i32_1 = arith.constant 0 : i32
    return %c0_i32, %c0_i32_0 : i32, i32
  }
  func.func @transform_9(%arg0: i32, %arg1: i32) -> (i32, i32) {
    %c0_i32 = arith.constant 0 : i32
    %c0_i32_0 = arith.constant 0 : i32
    %c0_i32_1 = arith.constant 0 : i32
    return %c0_i32, %c0_i32_0 : i32, i32
  }
  func.func @transform_10(%arg0: i32, %arg1: i32) -> (i32, i32) {
    %c0_i32 = arith.constant 0 : i32
    %c0_i32_0 = arith.constant 0 : i32
    %c0_i32_1 = arith.constant 0 : i32
    return %c0_i32, %c0_i32_0 : i32, i32
  }
  func.func @transform_11(%arg0: i32, %arg1: i32) -> (i32, i32) {
    %c0_i32 = arith.constant 0 : i32
    %c0_i32_0 = arith.constant 0 : i32
    %c0_i32_1 = arith.constant 0 : i32
    return %c0_i32, %c0_i32_0 : i32, i32
  }
  func.func @transform_12(%arg0: i32, %arg1: i32) -> (i32, i32) {
    %c0_i32 = arith.constant 0 : i32
    %c0_i32_0 = arith.constant 0 : i32
    %c0_i32_1 = arith.constant 0 : i32
    return %c0_i32, %c0_i32_0 : i32, i32
  }
  func.func @transform_13(%arg0: i32, %arg1: i32) -> (i32, i32) {
    %c0_i32 = arith.constant 0 : i32
    %c0_i32_0 = arith.constant 0 : i32
    %c0_i32_1 = arith.constant 0 : i32
    return %c0_i32, %c0_i32_0 : i32, i32
  }
  func.func @transform_14(%arg0: i32, %arg1: i32) -> (i32, i32) {
    %c0_i32 = arith.constant 0 : i32
    %c0_i32_0 = arith.constant 0 : i32
    %c0_i32_1 = arith.constant 0 : i32
    return %c0_i32, %c0_i32_0 : i32, i32
  }
  func.func @transform_15(%arg0: i32, %arg1: i32) -> (i32, i32) {
    %c0_i32 = arith.constant 0 : i32
    %c0_i32_0 = arith.constant 0 : i32
    %c0_i32_1 = arith.constant 0 : i32
    return %c0_i32, %c0_i32_0 : i32, i32
  }
  func.func @transform_16(%arg0: i32, %arg1: i32) -> (i32, i32) {
    %c0_i32 = arith.constant 0 : i32
    %c0_i32_0 = arith.constant 0 : i32
    %c0_i32_1 = arith.constant 0 : i32
    return %c0_i32, %c0_i32_0 : i32, i32
  }
  func.func @transform_17(%arg0: i32, %arg1: i32) -> (i32, i32) {
    %c0_i32 = arith.constant 0 : i32
    %c0_i32_0 = arith.constant 0 : i32
    %c0_i32_1 = arith.constant 0 : i32
    return %c0_i32, %c0_i32_0 : i32, i32
  }
  func.func @transform_18(%arg0: i32, %arg1: i32) -> (i32, i32, i32) {
    %c0_i32 = arith.constant 0 : i32
    %c0_i32_0 = arith.constant 0 : i32
    return %arg1, %arg0, %c0_i32 : i32, i32, i32
  }
}

</mosaic_0001>

<bundles_post_ra>
// kernel: tpu_custom_call.1
= control target key start
LH: loop header
LB: loop body
LE: loop exit
PB: predicated region body
PF: predicated region fallthrough
CT: control target
= control target key end

     0   :  { %s6143_s0 = inlined_call_operand.hbm [shape: f32[8,32], index: 0, kind: input, shape index: {}]   ;;  %s6144_s1 = inlined_call_operand.hbm [shape: f32[8,16], index: 1, kind: input, shape index: {}]   ;;  %s6145_s2 = inlined_call_operand.hbm [shape: f32[8,8,80], index: 2, kind: input, shape index: {}]   ;;  %s6146_s3 = inlined_call_operand.hbm [shape: bf16[16,32], index: 3, kind: input, shape index: {}]   ;;  %s6147_s4 = inlined_call_operand.hbm [shape: bf16[8,32], index: 4, kind: input, shape index: {}]   ;;  %s6148_s5 = inlined_call_operand.vmem [shape: f32[1,32], index: 5, kind: input, shape index: {}]   ;;  %s6149_s6 = inlined_call_operand.vmem [shape: bf16[32,96], index: 6, kind: input, shape index: {}]   ;;  %s6150_s7 = inlined_call_operand.hbm [shape: f32[1,96], index: 7, kind: input, shape index: {}]   ;;  %s6151_s8 = inlined_call_operand.hbm [shape: f32[1,32], index: 8, kind: input, shape index: {}]   ;;  %s6152_s9 = inlined_call_operand.vmem [shape: bf16[32,128], index: 9, kind: input, shape index: {}]   ;;  %s6153_s10 = inlined_call_operand.hbm [shape: bf16[24,32], index: 10, kind: input, shape index: {}]   ;;  %s6154_s11 = inlined_call_operand.hbm [shape: f32[1,32], index: 11, kind: input, shape index: {}]   ;;  %s6155_s12 = inlined_call_operand.hbm [shape: bf16[32,32], index: 12, kind: input, shape index: {}]   ;;  %s6156_s13 = inlined_call_operand.hbm [shape: f32[1,32], index: 13, kind: input, shape index: {}]   ;;  %s6157_s14 = inlined_call_operand.vmem [shape: bf16[32,32], index: 14, kind: input, shape index: {}]   ;;  %s6158_s15 = inlined_call_operand.vmem [shape: f32[1,32], index: 15, kind: input, shape index: {}]   ;;  %s6159_s16 = inlined_call_operand.hbm [shape: bf16[32,32], index: 16, kind: input, shape index: {}]   ;;  %s6160_s17 = inlined_call_operand.vmem [shape: f32[1,32], index: 17, kind: input, shape index: {}]   ;;  %s6161_s18 = inlined_call_operand.hbm [shape: f32[8,8,128], index: 18, kind: output, shape index: {}]  }
   0x1   :  { %6166 = sst [smem:[#allocation39_spill]] %s6143_s0 }
   0x2   :  { %6167 = sst [smem:[#allocation40_spill]] %s6144_s1 }
   0x3   :  { %6168 = sst [smem:[#allocation41_spill]] %s6145_s2 }
   0x4   :  { %6169 = sst [smem:[#allocation42_spill]] %s6161_s18 }
   0x5   :  { %23 = vsyncpa [#allocation11], 0 }
   0x6   :  { %24 = vsyncpa [#allocation14], 0 }
   0x7   :  { %25 = vsyncpa [#allocation17], 0 }
   0x8   :  { %26 = vsyncpa [#allocation20], 0 }
   0x9   :  { %27 = vsyncpa [#allocation23], 0 }
   0xa   :  { %28 = vsyncpa [#allocation26], 0 }
   0xb   :  { %29 = vsyncpa [#allocation29], 0 }
   0xc   :  { %30 = vsyncpa [#allocation12], 0  ;;  %s4926_s27 = smov [#allocation13]   ;;  %s4927_s29 = smov [#allocation16]  }
   0xd   :  { %s47_s28 = sshll.u32 %s4926_s27, 4  ;;  %s68_s30 = sshll.u32 %s4927_s29, 4  ;;  %s48_s28 = int_to_ptr.vmem [resolvable:$true] %s47_s28  ;;  %s5047_s30 = int_to_ptr.vmem [resolvable:$true] %s68_s30 }
   0xe   :  { %s6170_s1 = sld [smem:[#allocation40_spill]] }
  0x14   :  { %s4624_s20 = scalar_lea.hbm %s6170_s1, 128 }
  0x15   :  { %p4625_p0 = scmp.ne.s32.totalorder %s6170_s1, %s4624_s20  ;;  %p4628_p1 = scmp.lt.u32.totalorder %s4624_s20, %s6170_s1 }
  0x17   :  { %p4630_p2 = pnand %p4628_p1, %p4625_p0 }
  0x19   :  { %4633 = shalt.err (!%p4630_p2)
}
  0x1a   :  { %s4634_s24 = scalar_lea.vmem %s48_s28, 128  ;;  %p4639_p4 = scmp.lt.s32.totalorder %s48_s28, %s48_s28 }
  0x1b   :  { %p4635_p3 = scmp.ne.s32.totalorder %s48_s28, %s4634_s24  ;;  %p4640_p5 = scmp.lt.s32.totalorder %s4634_s24, %s4634_s24 }
  0x1d   :  { %p4641_p6 = por %p4640_p5, %p4639_p4 }
  0x1f   :  { %p4642_p7 = pnand %p4641_p6, %p4635_p3 }
  0x21   :  { %4645 = shalt.err (!%p4642_p7)
}
  0x22   :  { %50 = dma.hbm_to_vmem [thread:$0]  %s6170_s1, 128, %s48_s28, [#allocation14]  }
  0x23   :  { %s4646_s0 = scalar_lea.hbm %s6146_s3, 128 }
  0x24   :  { %p4647_p8 = scmp.ne.s32.totalorder %s6146_s3, %s4646_s0  ;;  %p4650_p9 = scmp.lt.u32.totalorder %s4646_s0, %s6146_s3 }
  0x26   :  { %p4652_p10 = pnand %p4650_p9, %p4647_p8 }
  0x28   :  { %4655 = shalt.err (!%p4652_p10)
}
  0x29   :  { %s4656_s2 = scalar_lea.vmem %s5047_s30, 128  ;;  %p4661_p12 = scmp.lt.s32.totalorder %s5047_s30, %s5047_s30 }
  0x2a   :  { %p4657_p11 = scmp.ne.s32.totalorder %s5047_s30, %s4656_s2  ;;  %p4662_p13 = scmp.lt.s32.totalorder %s4656_s2, %s4656_s2 }
  0x2c   :  { %p4663_p0 = por %p4662_p13, %p4661_p12 }
  0x2e   :  { %p4664_p1 = pnand %p4663_p0, %p4657_p11 }
  0x30   :  { %4667 = shalt.err (!%p4664_p1)
}
  0x31   :  { %s4928_s28 = smov 64   ;;  %s4929_s1 = smov 4  }
  0x32   :  { %74 = dma.hbm_to_vmem [thread:$0]  %s6146_s3, 128, %s5047_s30, [#allocation17], %s4928_s28, %s4928_s28, %s4929_s1  }
  0x33   :  { %s4930_s25 = smov [#allocation19]   ;;  %s4931_s27 = smov [#allocation22]  }
  0x34   :  { %s95_s26 = sshll.u32 %s4930_s25, 4  ;;  %s116_s29 = sshll.u32 %s4931_s27, 4  ;;  %s96_s26 = int_to_ptr.vmem [resolvable:$true] %s95_s26  ;;  %s5081_s29 = int_to_ptr.vmem [resolvable:$true] %s116_s29 }
  0x35   :  { %s4668_s21 = scalar_lea.hbm %s6150_s7, 16 }
  0x36   :  { %p4669_p2 = scmp.ne.s32.totalorder %s6150_s7, %s4668_s21  ;;  %p4672_p3 = scmp.lt.u32.totalorder %s4668_s21, %s6150_s7 }
  0x38   :  { %p4674_p4 = pnand %p4672_p3, %p4669_p2 }
  0x3a   :  { %4677 = shalt.err (!%p4674_p4)
}
  0x3b   :  { %s4678_s3 = scalar_lea.vmem %s96_s26, 16  ;;  %s4682_s30 = scalar_lea.vmem %s96_s26, 32 }
  0x3c   :  { %p4679_p5 = scmp.ne.s32.totalorder %s96_s26, %s4678_s3  ;;  %p4683_p6 = scmp.lt.s32.totalorder %s96_s26, %s96_s26 }
  0x3d   :  { %p4684_p7 = scmp.lt.s32.totalorder %s4682_s30, %s4678_s3 }
  0x3f   :  { %p4685_p8 = por %p4684_p7, %p4683_p6 }
  0x41   :  { %p4686_p9 = pnand %p4685_p8, %p4679_p5 }
  0x43   :  { %4689 = shalt.err (!%p4686_p9)
}
  0x44   :  { %98 = dma.hbm_to_vmem [thread:$0]  %s6150_s7, 16, %s96_s26, [#allocation20]  }
  0x45   :  { %s4690_s0 = scalar_lea.hbm %s6153_s10, 192 }
  0x46   :  { %p4691_p10 = scmp.ne.s32.totalorder %s6153_s10, %s4690_s0  ;;  %p4694_p11 = scmp.lt.u32.totalorder %s4690_s0, %s6153_s10 }
  0x48   :  { %p4696_p12 = pnand %p4694_p11, %p4691_p10 }
  0x4a   :  { %4699 = shalt.err (!%p4696_p12)
}
  0x4b   :  { %s4700_s22 = scalar_lea.vmem %s5081_s29, 192  ;;  %p4705_p0 = scmp.lt.s32.totalorder %s5081_s29, %s5081_s29 }
  0x4c   :  { %p4701_p13 = scmp.ne.s32.totalorder %s5081_s29, %s4700_s22  ;;  %p4706_p1 = scmp.lt.s32.totalorder %s4700_s22, %s4700_s22 }
  0x4e   :  { %p4707_p2 = por %p4706_p1, %p4705_p0 }
  0x50   :  { %p4708_p3 = pnand %p4707_p2, %p4701_p13 }
  0x52   :  { %4711 = shalt.err (!%p4708_p3)
}
  0x53   :  { %122 = dma.hbm_to_vmem [thread:$0]  %s6153_s10, 192, %s5081_s29, [#allocation23], %s4928_s28, %s4928_s28, %s4929_s1  }
  0x54   :  { %s4932_s2 = smov [#allocation25]   ;;  %s4933_s30 = smov [#allocation10]  }
  0x55   :  { %s138_s3 = sshll.u32 %s4932_s2, 4  ;;  %s37_s23 = sshll.u32 %s4933_s30, 4  ;;  %s139_s3 = int_to_ptr.vmem [resolvable:$true] %s138_s3  ;;  %s38_s23 = int_to_ptr.vmem [resolvable:$true] %s37_s23 }
  0x56   :  { %s4712_s27 = scalar_lea.hbm %s6155_s12, 256 }
  0x57   :  { %p4713_p4 = scmp.ne.s32.totalorder %s6155_s12, %s4712_s27  ;;  %p4716_p5 = scmp.lt.u32.totalorder %s4712_s27, %s6155_s12 }
  0x59   :  { %p4718_p6 = pnand %p4716_p5, %p4713_p4 }
  0x5b   :  { %4721 = shalt.err (!%p4718_p6)
}
  0x5c   :  { %s4722_s10 = scalar_lea.vmem %s139_s3, 256  ;;  %p4727_p8 = scmp.lt.s32.totalorder %s139_s3, %s139_s3 }
  0x5d   :  { %p4723_p7 = scmp.ne.s32.totalorder %s139_s3, %s4722_s10  ;;  %p4728_p9 = scmp.lt.s32.totalorder %s4722_s10, %s4722_s10 }
  0x5f   :  { %p4729_p10 = por %p4728_p9, %p4727_p8 }
  0x61   :  { %p4730_p11 = pnand %p4729_p10, %p4723_p7 }
  0x63   :  { %4733 = shalt.err (!%p4730_p11)
}
  0x64   :  { %144 = dma.hbm_to_vmem [thread:$0]  %s6155_s12, 256, %s139_s3, [#allocation26], %s4928_s28, %s4928_s28, %s4929_s1  }
  0x65   :  { %s6171_s26 = sld [smem:[#allocation39_spill]] }
  0x6b   :  { %s4734_s2 = scalar_lea.hbm %s6171_s26, 128 }
  0x6c   :  { %p4735_p12 = scmp.ne.s32.totalorder %s6171_s26, %s4734_s2  ;;  %p4738_p13 = scmp.lt.u32.totalorder %s4734_s2, %s6171_s26 }
  0x6e   :  { %p4740_p0 = pnand %p4738_p13, %p4735_p12 }
  0x70   :  { %4743 = shalt.err (!%p4740_p0)
}
  0x71   :  { %s4744_s0 = scalar_lea.vmem %s38_s23, 128  ;;  %p4749_p2 = scmp.lt.s32.totalorder %s38_s23, %s38_s23 }
  0x72   :  { %p4745_p1 = scmp.ne.s32.totalorder %s38_s23, %s4744_s0  ;;  %p4750_p3 = scmp.lt.s32.totalorder %s4744_s0, %s4744_s0 }
  0x74   :  { %p4751_p4 = por %p4750_p3, %p4749_p2 }
  0x76   :  { %p4752_p5 = pnand %p4751_p4, %p4745_p1 }
  0x78   :  { %4755 = shalt.err (!%p4752_p5)
}
  0x79   :  { %40 = dma.hbm_to_vmem [thread:$0]  %s6171_s26, 128, %s38_s23, [#allocation11]  }
  0x7a   :  { %s4934_s18 = smov [#allocation15]   ;;  %s6172_s29 = sld [smem:[#allocation41_spill]] }
  0x7b   :  { %s56_s19 = sshll.u32 %s4934_s18, 4  ;;  %s57_s19 = int_to_ptr.vmem [resolvable:$true] %s56_s19 }
  0x80   :  { %s4756_s20 = scalar_lea.hbm %s6172_s29, 1024 }
  0x81   :  { %p4757_p6 = scmp.ne.s32.totalorder %s6172_s29, %s4756_s20  ;;  %p4760_p7 = scmp.lt.u32.totalorder %s4756_s20, %s6172_s29 }
  0x83   :  { %p4762_p8 = pnand %p4760_p7, %p4757_p6 }
  0x85   :  { %4765 = shalt.err (!%p4762_p8)
}
  0x86   :  { %s4766_s24 = scalar_lea.vmem %s57_s19, 1024  ;;  %p4771_p10 = scmp.lt.s32.totalorder %s57_s19, %s57_s19 }
  0x87   :  { %p4767_p9 = scmp.ne.s32.totalorder %s57_s19, %s4766_s24  ;;  %p4772_p11 = scmp.lt.s32.totalorder %s4766_s24, %s4766_s24 }
  0x89   :  { %p4773_p12 = por %p4772_p11, %p4771_p10 }
  0x8b   :  { %p4774_p13 = pnand %p4773_p12, %p4767_p9 }
  0x8d   :  { %4777 = shalt.err (!%p4774_p13)
}
  0x8e   :  { %s4935_s23 = smov 128   ;;  %s4936_s26 = smov 8  }
  0x8f   :  { %62 = dma.hbm_to_vmem [thread:$0]  %s6172_s29, 1024, %s57_s19, [#allocation14], %s4935_s23, %s4935_s23, %s4936_s26  }
  0x90   :  { %s4937_s0 = smov [#allocation18]   ;;  %s4938_s3 = smov [#allocation21]  }
  0x91   :  { %s81_s12 = sshll.u32 %s4937_s0, 4  ;;  %s105_s18 = sshll.u32 %s4938_s3, 4  ;;  %s82_s12 = int_to_ptr.vmem [resolvable:$true] %s81_s12  ;;  %s106_s18 = int_to_ptr.vmem [resolvable:$true] %s105_s18 }
  0x92   :  { %s4778_s20 = scalar_lea.hbm %s6147_s4, 64 }
  0x93   :  { %p4779_p0 = scmp.ne.s32.totalorder %s6147_s4, %s4778_s20  ;;  %p4782_p1 = scmp.lt.u32.totalorder %s4778_s20, %s6147_s4 }
  0x95   :  { %p4784_p2 = pnand %p4782_p1, %p4779_p0 }
  0x97   :  { %4787 = shalt.err (!%p4784_p2)
}
  0x98   :  { %s4788_s19 = scalar_lea.vmem %s82_s12, 64  ;;  %p4793_p4 = scmp.lt.s32.totalorder %s82_s12, %s82_s12 }
  0x99   :  { %p4789_p3 = scmp.ne.s32.totalorder %s82_s12, %s4788_s19  ;;  %p4794_p5 = scmp.lt.s32.totalorder %s4788_s19, %s4788_s19 }
  0x9b   :  { %p4795_p6 = por %p4794_p5, %p4793_p4 }
  0x9d   :  { %p4796_p7 = pnand %p4795_p6, %p4789_p3 }
  0x9f   :  { %4799 = shalt.err (!%p4796_p7)
}
  0xa0   :  { %84 = dma.hbm_to_vmem [thread:$0]  %s6147_s4, 64, %s82_s12, [#allocation17]  }
  0xa1   :  { %s4800_s0 = scalar_lea.hbm %s6151_s8, 16 }
  0xa2   :  { %p4801_p8 = scmp.ne.s32.totalorder %s6151_s8, %s4800_s0  ;;  %p4804_p9 = scmp.lt.u32.totalorder %s4800_s0, %s6151_s8 }
  0xa4   :  { %p4806_p10 = pnand %p4804_p9, %p4801_p8 }
  0xa6   :  { %4809 = shalt.err (!%p4806_p10)
}
  0xa7   :  { %s4810_s22 = scalar_lea.vmem %s106_s18, 16  ;;  %s4814_s7 = scalar_lea.vmem %s106_s18, 32 }
  0xa8   :  { %p4811_p11 = scmp.ne.s32.totalorder %s106_s18, %s4810_s22  ;;  %p4815_p12 = scmp.lt.s32.totalorder %s106_s18, %s106_s18 }
  0xa9   :  { %p4816_p13 = scmp.lt.s32.totalorder %s4814_s7, %s4810_s22 }
  0xab   :  { %p4817_p0 = por %p4816_p13, %p4815_p12 }
  0xad   :  { %p4818_p1 = pnand %p4817_p0, %p4811_p11 }
  0xaf   :  { %4821 = shalt.err (!%p4818_p1)
}
  0xb0   :  { %108 = dma.hbm_to_vmem [thread:$0]  %s6151_s8, 16, %s106_s18, [#allocation20]  }
  0xb1   :  { %s4939_s2 = smov [#allocation24]   ;;  %s4940_s19 = smov [#allocation27]  }
  0xb2   :  { %s129_s30 = sshll.u32 %s4939_s2, 4  ;;  %s151_s29 = sshll.u32 %s4940_s19, 4  ;;  %s130_s30 = int_to_ptr.vmem [resolvable:$true] %s129_s30  ;;  %s152_s29 = int_to_ptr.vmem [resolvable:$true] %s151_s29 }
  0xb3   :  { %s4822_s27 = scalar_lea.hbm %s6154_s11, 16 }
  0xb4   :  { %p4823_p2 = scmp.ne.s32.totalorder %s6154_s11, %s4822_s27  ;;  %p4826_p3 = scmp.lt.u32.totalorder %s4822_s27, %s6154_s11 }
  0xb6   :  { %p4828_p4 = pnand %p4826_p3, %p4823_p2 }
  0xb8   :  { %4831 = shalt.err (!%p4828_p4)
}
  0xb9   :  { %s4832_s8 = scalar_lea.vmem %s130_s30, 16  ;;  %s4836_s18 = scalar_lea.vmem %s130_s30, 32 }
  0xba   :  { %p4833_p5 = scmp.ne.s32.totalorder %s130_s30, %s4832_s8  ;;  %p4837_p6 = scmp.lt.s32.totalorder %s130_s30, %s130_s30 }
  0xbb   :  { %p4838_p7 = scmp.lt.s32.totalorder %s4836_s18, %s4832_s8 }
  0xbd   :  { %p4839_p8 = por %p4838_p7, %p4837_p6 }
  0xbf   :  { %p4840_p9 = pnand %p4839_p8, %p4833_p5 }
  0xc1   :  { %4843 = shalt.err (!%p4840_p9)
}
  0xc2   :  { %132 = dma.hbm_to_vmem [thread:$0]  %s6154_s11, 16, %s130_s30, [#allocation23]  }
  0xc3   :  { %s4844_s12 = scalar_lea.hbm %s6156_s13, 16 }
  0xc4   :  { %p4845_p10 = scmp.ne.s32.totalorder %s6156_s13, %s4844_s12  ;;  %p4848_p11 = scmp.lt.u32.totalorder %s4844_s12, %s6156_s13 }
  0xc6   :  { %p4850_p12 = pnand %p4848_p11, %p4845_p10 }
  0xc8   :  { %4853 = shalt.err (!%p4850_p12)
}
  0xc9   :  { %s4854_s27 = scalar_lea.vmem %s152_s29, 16  ;;  %s4858_s0 = scalar_lea.vmem %s152_s29, 32 }
  0xca   :  { %p4855_p13 = scmp.ne.s32.totalorder %s152_s29, %s4854_s27  ;;  %p4859_p0 = scmp.lt.s32.totalorder %s152_s29, %s152_s29 }
  0xcb   :  { %p4860_p1 = scmp.lt.s32.totalorder %s4858_s0, %s4854_s27 }
  0xcd   :  { %p4861_p2 = por %p4860_p1, %p4859_p0 }
  0xcf   :  { %p4862_p3 = pnand %p4861_p2, %p4855_p13 }
  0xd1   :  { %4865 = shalt.err (!%p4862_p3)
}
  0xd2   :  { %154 = dma.hbm_to_vmem [thread:$0]  %s6156_s13, 16, %s152_s29, [#allocation26]  }
  0xd3   :  { %s4941_s3 = smov [#allocation28]   ;;  %s4866_s18 = scalar_lea.hbm %s6159_s16, 256 }
  0xd4   :  { %s164_s21 = sshll.u32 %s4941_s3, 4  ;;  %p4867_p4 = scmp.ne.s32.totalorder %s6159_s16, %s4866_s18  ;;  %s165_s21 = int_to_ptr.vmem [resolvable:$true] %s164_s21 }
  0xd5   :  { %p4870_p5 = scmp.lt.u32.totalorder %s4866_s18, %s6159_s16 }
  0xd7   :  { %p4872_p6 = pnand %p4870_p5, %p4867_p4 }
  0xd9   :  { %4875 = shalt.err (!%p4872_p6)
}
  0xda   :  { %s4876_s12 = scalar_lea.vmem %s165_s21, 256  ;;  %p4881_p8 = scmp.lt.s32.totalorder %s165_s21, %s165_s21 }
  0xdb   :  { %p4877_p7 = scmp.ne.s32.totalorder %s165_s21, %s4876_s12  ;;  %p4882_p9 = scmp.lt.s32.totalorder %s4876_s12, %s4876_s12 }
  0xdd   :  { %p4883_p10 = por %p4882_p9, %p4881_p8 }
  0xdf   :  { %p4884_p11 = pnand %p4883_p10, %p4877_p7 }
  0xe1   :  { %4887 = shalt.err (!%p4884_p11)
}
  0xe2   :  { %170 = dma.hbm_to_vmem [thread:$0]  %s6159_s16, 256, %s165_s21, [#allocation29], %s4928_s28, %s4928_s28, %s4929_s1  }
  0xe3   :  { %4910 = dma.done.wait [#allocation11], 128  }
  0xe4   :  { %4911 = vsyncadd [#allocation11], 4294967168 }
  0xe5   :  { %4912 = dma.done.wait [#allocation14], 1152  }
  0xe6   :  { %4913 = vsyncadd [#allocation14], 4294966144 }
  0xe7   :  { %4914 = dma.done.wait [#allocation17], 192  }
  0xe8   :  { %4915 = vsyncadd [#allocation17], 4294967104 }
  0xe9   :  { %4916 = dma.done.wait [#allocation20], 32  }
  0xea   :  { %4917 = vsyncadd [#allocation20], 4294967264 }
  0xeb   :  { %4918 = dma.done.wait [#allocation23], 208  }
  0xec   :  { %4919 = vsyncadd [#allocation23], 4294967088 }
  0xed   :  { %4920 = dma.done.wait [#allocation26], 272  }
  0xee   :  { %4921 = vsyncadd [#allocation26], 4294967024 }
  0xef   :  { %4922 = dma.done.wait [#allocation29], 256  }
  0xf0   :  { %4923 = vsyncadd [#allocation29], 4294967040  ;;  %v5220_v0 = vld [vmem:[#allocation15] sm:$0xff]  ;;  %v5222_v1 = vld [vmem:[#allocation15 + $0x8] sm:$0xff]  ;;  %vm240_vm0 = vcmask 64512   ;;  %vm253_vm1 = vcmask 1043456  }
  0xf1   :  { %v5224_v2 = vld [vmem:[#allocation15 + $0x10] sm:$0xff]  ;;  %v339_v3 = vpack.c.bf16 %v5222_v1, %v5220_v0  ;;  %v334_v4 = vld [vmem:[#allocation15 + $0x18] sm:$0xff]  ;;  %v335_v5 = vld [vmem:[#allocation15 + $0x20] sm:$0xff]  ;;  %s4942_s16 = smov 72   ;;  %vm218_vm2 = vcmask 130048   ;;  %v4943_v18 = vmov 0.0  }
  0xf2   :  { %v336_v6 = vld [vmem:[#allocation15 + $0x28] sm:$0xff]  ;;  %v337_v8 = vld [vmem:[#allocation15 + $0x30] sm:$0xff]  ;;  %v338_v9 = vld [vmem:[#allocation15 + $0x38] sm:$0xff]  ;;  %v340_v10 = vpack.c.bf16 %v334_v4, %v5224_v2  ;;  %vm215_vm3 = vcmask 261120   ;;  %s4944_s25 = smov 88   ;;  %vm4945_vm4 = vmmov 0  }
  0xf3   :  { %v341_v7 = vpack.c.bf16 %v336_v6, %v335_v5  ;;  %357 = vrot.lane.b32.xlu0 %v339_v3, %s4942_s16  ;;  %v4444_v11 = vld [vmem:[#allocation22] sm:$0xff]   ;;  %4124 = vmatprep.mubr.msk.bf16.mxu0 %vm240_vm0, %v339_v3  ;;  %v342_v12 = vpack.c.bf16 %v338_v9, %v337_v8  ;;  %v4445_v13 = vld [vmem:[#allocation22 + $0x8] ss:$0 sps:$4 sm:$0xff]   ;;  %v232_v14 = vld [vmem:[#allocation18] sm:$0xf]  ;;  %vm374_vm5 = vcmask 195584  }
  0xf4   :  { %4132 = vmatprep.subr.bf16.mxu1 %v4444_v11  ;;  %4416 = vmatprep.subr.msk.bf16.mxu0 %vm253_vm1, %v232_v14  ;;  %v255_v15 = vsel %vm253_vm1, %v232_v14, 0  ;;  %v217_v16 = vld [vmem:[#allocation13] sm:$0xff]  ;;  %v388_v17 = vsel %vm253_vm1, %v4445_v13, 0  ;;  %v4447_v19 = vld [vmem:[%s6152_s9] sm:$0xff]   ;;  %v4446_v25 = vld [vmem:[#allocation16] sm:$0xff]   ;;  %s4947_s10 = smov 96  }
  0xf5   :  { %361 = vrot.lane.b32.xlu1 %v341_v7, %s4942_s16  ;;  %4133 = vmatpush3.bf16.msra.mxu1 %v4444_v11  ;;  %219 = vst.msk [vmem:[#allocation3] sm:$0xff] %vm218_vm2, %v217_v16  ;;  %v4448_v20 = vld [vmem:[%s6152_s9 + $0x8] sm:$0xff]   ;;  %v214_v21 = vld [vmem:[#allocation10] sm:$0xff]  ;;  %v3893_v44 = vld [vmem:[#allocation21] ss:$0 sm:$0xff]  ;;  %s4948_s7 = smov 120  }
  0xf6   :  { %4123 = vmatpush3.bf16.msra.mxu0 %v255_v15  ;;  %4417 = vmatprep.subr.msk.bf16.mxu1 %vm253_vm1, %v4445_v13  ;;  %216 = vst.msk [vmem:[#allocation2] sm:$0xff] %vm215_vm3, %v214_v21  ;;  %v3880_v33 = vld [vmem:[%s6148_s5] ss:$0 sm:$0xff]  ;;  %v4450_v42 = vld [vmem:[%s6149_s6 + $0x8] sm:$0xff]   ;;  %s4946_s5 = smov 32   ;;  %s4949_s13 = smov 112  }
  0xf7   :  { %359 = vrot.lane.b32.xlu0 %v340_v10, %s4942_s16  ;;  %4144 = vmatprep.subr.bf16.mxu0 %v4943_v18  ;;  %v4449_v34 = vld [vmem:[%s6149_s6] sm:$0xff]   ;;  %v3885_v57 = vld [vmem:[#allocation24] ss:$0 sm:$0xff] }
  0xf9   :  { %363 = vrot.lane.b32.xlu1 %v342_v12, %s4942_s16  ;;  %4125 = vmatmul.mubr.msk.bf16.vlgmr.msra.gmra.mrb[0].mxu0 %vm240_vm0, %v340_v10 }
  0xfa   :  { %4135 = vmatpush3.bf16.msra.mxu1 %v388_v17  ;;  %4128 = vmatprep.mubr.msk.bf16.mxu0 %vm240_vm0, %v341_v7 }
  0xfb   :  { %547 = vrot.lane.b32.xlu0 %v5220_v0, %s4944_s25  ;;  %4152 = vmatprep.subr.bf16.mxu1 %v4943_v18 }
  0xfc   :  { %4145 = vmatpush3.bf16.msra.mxu0 %v4447_v19  ;;  %v484_v30 = vld [vmem:[#allocation3] sm:$0xff] }
  0xfd   :  { %4146 = vmatprep.subr.bf16.mxu0 %v4943_v18  ;;  %v5253_v22 = vld [vmem:[#allocation2] sm:$0xff]  ;;  %673 = vrot.lane.b32.xlu1 %v3893_v44, %s4928_s28 }
  0xfe   :  { %v485_v23 = vpack.c.bf16 %v5253_v22, %v5253_v22 }
 0x100   :  { %4147 = vmatpush3.bf16.msra.mxu0 %v4448_v20 }
 0x101   :  { %4129 = vmatmul.mubr.msk.bf16.gmra.mrb[4].mxu0 %vm240_vm0, %v342_v12  ;;  %4158 = vmatprep.subr.bf16.mxu0 %v4943_v18 }
 0x102   :  { %4148 = vmatprep.mubr.msk.bf16.mxu0 %vm4945_vm4, %v4943_v18 }
 0x109   :  { %4149 = vmatmul.mubr.msk.bf16.vlgmr.msra.gmra.mrb[8].mxu0 %vm215_vm3, %v485_v23 }
 0x10a   :  { %4162 = vmatprep.mubr.msk.bf16.mxu0 %vm4945_vm4, %v4943_v18  ;;  %4159 = vmatpush3.bf16.msra.mxu0 %v4449_v34 }
 0x10b   :  { %4160 = vmatprep.subr.bf16.mxu0 %v4943_v18 }
 0x10e   :  { %4161 = vmatpush3.bf16.msra.mxu0 %v4450_v42  ;;  %v4452_v42 = vld [vmem:[%s6152_s9 + $0x8] sm:$0xff]  }
 0x10f   :  { %4174 = vmatprep.subr.bf16.mxu0 %v4943_v18 }
 0x165   :  { %v358_v24 = vpop.permute.xlu0 %357 }
 0x166   :  { %4136 = vmatprep.mubr.msk.bf16.mxu1 %vm374_vm5, %v358_v24 }
 0x167   :  { %v362_v26 = vpop.permute.xlu1 %361 }
 0x169   :  { %v360_v27 = vpop.permute.xlu0 %359 }
 0x16a   :  { %4137 = vmatmul.mubr.msk.bf16.vlgmr.msra.gmra.mrb[0].mxu1 %vm374_vm5, %v360_v27 }
 0x16b   :  { %4153 = vmatpush3.bf16.msra.mxu1 %v4446_v25  ;;  %4140 = vmatprep.mubr.msk.bf16.mxu1 %vm374_vm5, %v362_v26  ;;  %v364_v28 = vpop.permute.xlu1 %363  ;;  %v5301_v25 = vld [vmem:[#allocation19] ss:$0 sm:$0xff] }
 0x16c   :  { %4166 = vmatprep.subr.bf16.mxu1 %v4943_v18 }
 0x16d   :  { %v548_v29 = vpop.permute.xlu0 %547 }
 0x16e   :  { %v550_v31 = vmul.f32 %v548_v29, %v484_v30 }
 0x16f   :  { %v5290_v10 = vpop.permute.xlu1 %673 }
 0x170   :  { %v551_v32 = vpack.c.bf16 %v550_v31, %v550_v31 }
 0x172   :  { %4141 = vmatmul.mubr.msk.bf16.gmra.mrb[4].mxu1 %vm374_vm5, %v364_v28 }
 0x173   :  { %4154 = vmatprep.mubr.msk.bf16.mxu1 %vm4945_vm4, %v4943_v18 }
 0x17a   :  { %4155 = vmatmul.mubr.msk.bf16.vlgmr.msra.gmra.mrb[8].mxu1 %vm218_vm2, %v551_v32 }
 0x17b   :  { %4170 = vmatprep.mubr.msk.bf16.mxu1 %vm4945_vm4, %v4943_v18 }
 0x1cc   :  { %v4126_v35 = vpop.f32.mrb[0].mxu0 }
 0x1cd   :  { %v300_v36 = vadd.f32 %v4126_v35, %v3880_v33  ;;  %v291_v37 = vpop.f32.mrb[1].mxu0 }
 0x1ce   :  { %v292_v38 = vadd.f32 %v3880_v33, %v291_v37  ;;  %v4127_v39 = vpop.f32.mrb[2].mxu0 }
 0x1cf   :  { %325 = vst.msk [vmem:[#allocation8 + $0x10] sm:$0xff] %vm215_vm3, %v300_v36  ;;  %v303_v40 = vadd.f32 %v4127_v39, %v3880_v33  ;;  %v294_v41 = vpop.f32.mrb[3].mxu0 }
 0x1d0   :  { %323 = vst.msk [vmem:[#allocation8] sm:$0xff] %vm215_vm3, %v292_v38  ;;  %v295_v43 = vadd.f32 %v3880_v33, %v294_v41  ;;  %v4451_v41 = vld [vmem:[%s6152_s9] sm:$0xff]  }
 0x1d1   :  { %326 = vst.msk [vmem:[#allocation8 + $0x18] sm:$0xff] %vm215_vm3, %v303_v40  ;;  %4167 = vmatpush3.bf16.msra.mxu1 %v4451_v41 }
 0x1d2   :  { %324 = vst.msk [vmem:[#allocation8 + $0x8] sm:$0xff] %vm215_vm3, %v295_v43  ;;  %4168 = vmatprep.subr.bf16.mxu1 %v4943_v18 }
 0x1d4   :  { %v4130_v45 = vpop.f32.mrb[4].mxu0 }
 0x1d5   :  { %v316_v46 = vadd.f32 %v4130_v45, %v3880_v33  ;;  %v307_v47 = vpop.f32.mrb[5].mxu0  ;;  %4169 = vmatpush3.bf16.msra.mxu1 %v4452_v42 }
 0x1d6   :  { %v308_v48 = vadd.f32 %v3880_v33, %v307_v47  ;;  %v4131_v49 = vpop.f32.mrb[6].mxu0  ;;  %4182 = vmatprep.subr.bf16.mxu1 %v4943_v18 }
 0x1d7   :  { %329 = vst.msk [vmem:[#allocation8 + $0x30] sm:$0xff] %vm215_vm3, %v316_v46  ;;  %v319_v50 = vadd.f32 %v4131_v49, %v3880_v33  ;;  %v310_v51 = vpop.f32.mrb[7].mxu0  ;;  %v554_v15 = vld [vmem:[#allocation8] sm:$0xff] }
 0x1d8   :  { %327 = vst.msk [vmem:[#allocation8 + $0x20] sm:$0xff] %vm215_vm3, %v308_v48  ;;  %v311_v52 = vadd.f32 %v3880_v33, %v310_v51  ;;  %v4453_v51 = vld [vmem:[#allocation25] sm:$0xff]  }
 0x1d9   :  { %330 = vst.msk [vmem:[#allocation8 + $0x38] sm:$0xff] %vm215_vm3, %v319_v50 }
 0x1da   :  { %328 = vst.msk [vmem:[#allocation8 + $0x28] sm:$0xff] %vm215_vm3, %v311_v52  ;;  %v4454_v52 = vld [vmem:[#allocation25 + $0x8] sm:$0xff]  }
 0x1dc   :  { %v539_v53 = vpop.f32.mrb[8].mxu0 }
 0x1dd   :  { %v4150_v54 = vpop.f32.mrb[9].mxu0  ;;  %v676_v13 = vadd.f32 %v5290_v10, %v539_v53 }
 0x1de   :  { %v542_v55 = vpop.f32.mrb[10].mxu0 }
 0x1df   :  { %v4151_v56 = vpop.f32.mrb[11].mxu0  ;;  %678 = vrot.lane.b32.xlu0 %v676_v13, %s4928_s28 }
 0x23d   :  { %v4138_v58 = vpop.f32.mrb[0].mxu1 }
 0x23e   :  { %v433_v59 = vadd.f32 %v4138_v58, %v3885_v57  ;;  %v424_v60 = vpop.f32.mrb[1].mxu1 }
 0x23f   :  { %v425_v61 = vadd.f32 %v3885_v57, %v424_v60  ;;  %v4139_v62 = vpop.f32.mrb[2].mxu1 }
 0x240   :  { %457 = vst.msk [vmem:[#allocation9 + $0x10] sm:$0xff] %vm215_vm3, %v433_v59  ;;  %v436_v63 = vadd.f32 %v4139_v62, %v3885_v57  ;;  %v427_v3 = vpop.f32.mrb[3].mxu1  ;;  %v5339_v62 = vld [vmem:[#allocation27] ss:$0 sm:$0xff] }
 0x241   :  { %455 = vst.msk [vmem:[#allocation9] sm:$0xff] %vm215_vm3, %v425_v61  ;;  %v428_v4 = vadd.f32 %v3885_v57, %v427_v3 }
 0x242   :  { %458 = vst.msk [vmem:[#allocation9 + $0x18] sm:$0xff] %vm215_vm3, %v436_v63 }
 0x243   :  { %456 = vst.msk [vmem:[#allocation9 + $0x8] sm:$0xff] %vm215_vm3, %v428_v4 }
 0x245   :  { %v4142_v5 = vpop.f32.mrb[4].mxu1 }
 0x246   :  { %v449_v6 = vadd.f32 %v4142_v5, %v3885_v57  ;;  %v440_v7 = vpop.f32.mrb[5].mxu1 }
 0x247   :  { %v441_v8 = vadd.f32 %v3885_v57, %v440_v7  ;;  %v4143_v9 = vpop.f32.mrb[6].mxu1 }
 0x248   :  { %461 = vst.msk [vmem:[#allocation9 + $0x30] sm:$0xff] %vm215_vm3, %v449_v6  ;;  %v452_v11 = vadd.f32 %v4143_v9, %v3885_v57  ;;  %v443_v12 = vpop.f32.mrb[7].mxu1  ;;  %v768_v38 = vld [vmem:[#allocation9] sm:$0xff] }
 0x249   :  { %459 = vst.msk [vmem:[#allocation9 + $0x20] sm:$0xff] %vm215_vm3, %v441_v8  ;;  %v444_v14 = vadd.f32 %v3885_v57, %v443_v12 }
 0x24a   :  { %462 = vst.msk [vmem:[#allocation9 + $0x38] sm:$0xff] %vm215_vm3, %v452_v11 }
 0x24b   :  { %460 = vst.msk [vmem:[#allocation9 + $0x28] sm:$0xff] %vm215_vm3, %v444_v14 }
 0x24d   :  { %v599_v16 = vpop.f32.mrb[8].mxu1 }
 0x24e   :  { %v600_v17 = vadd.f32 %v599_v16, %v554_v15  ;;  %v4156_v19 = vpop.f32.mrb[9].mxu1 }
 0x24f   :  { %v602_v20 = vpop.f32.mrb[10].mxu1 }
 0x250   :  { %v605_v21 = vmax.f32 %v600_v17, 0.0  ;;  %v4157_v23 = vpop.f32.mrb[11].mxu1 }
 0x251   :  { %v679_v35 = vpop.permute.xlu0 %678  ;;  %v4456_v23 = vld [vmem:[%s6149_s6] sm:$0xff]  }
 0x252   :  { %v606_v24 = vpack.c.bf16 %v605_v21, %v605_v21 }
 0x254   :  { %4163 = vmatmul.mubr.msk.bf16.vlgmr.msra.gmra.mrb[12].mxu0 %vm215_vm3, %v606_v24 }
 0x255   :  { %4178 = vmatprep.mubr.msk.bf16.mxu0 %vm4945_vm4, %v4943_v18  ;;  %4175 = vmatpush3.bf16.msra.mxu0 %v4453_v51 }
 0x256   :  { %4176 = vmatprep.subr.bf16.mxu0 %v4943_v18 }
 0x259   :  { %4177 = vmatpush3.bf16.msra.mxu0 %v4454_v52 }
 0x25a   :  { %4188 = vmatprep.subr.bf16.mxu0 %v4943_v18 }
 0x327   :  { %v660_v26 = vpop.f32.mrb[12].mxu0 }
 0x328   :  { %v661_v27 = vadd.f32 %v5301_v25, %v660_v26  ;;  %v4164_v28 = vpop.f32.mrb[13].mxu0 }
 0x329   :  { %v663_v29 = vpop.f32.mrb[14].mxu0 }
 0x32a   :  { %v666_v30 = vadd.f32 %v661_v27, %v539_v53  ;;  %v4165_v31 = vpop.f32.mrb[15].mxu0 }
 0x32c   :  { %v3903_v32 = vmul.f32 -1.442695, %v666_v30 }
 0x32e   :  { %4508 = vpow2.f32 %v3903_v32 }
 0x338   :  { %v4509_v33 = vpop.eup %4508 }
 0x339   :  { %v670_v34 = vadd.f32 1.0, %v4509_v33 }
 0x33b   :  { %4510 = vrcp.f32 %v670_v34 }
 0x345   :  { %v4511_v36 = vpop.eup %4510 }
 0x346   :  { %v681_v37 = vmul.f32 %v4511_v36, %v679_v35  ;;  %v688_v44 = vsub.f32 1.0, %v4511_v36  ;;  %v4457_v35 = vld [vmem:[%s6149_s6 + $0x8] sm:$0xff]  }
 0x348   :  { %683 = vrot.lane.b32.xlu1 %v681_v37, %s4928_s28 }
 0x34c   :  { %695 = vrot.lane.b32.xlu1 %v5253_v22, %s4946_s5 }
 0x350   :  { %770 = vrot.lane.b32.xlu1 %v768_v38, %s4947_s10 }
 0x354   :  { %854 = vrot.lane.b32.xlu1 %v5220_v0, %s4948_s7  ;;  %v4455_v0 = vld [vmem:[#allocation16] sm:$0xff]  }
 0x358   :  { %873 = vrot.lane.b32.xlu1 %v5222_v1, %s4944_s25 }
 0x3ba   :  { %v684_v39 = vpop.permute.xlu1 %683 }
 0x3bb   :  { %v686_v40 = vadd.f32 %v684_v39, %v661_v27 }
 0x3bd   :  { %4512 = vtanh.f32 %v686_v40 }
 0x3be   :  { %v696_v22 = vpop.permute.xlu1 %695 }
 0x3bf   :  { %v698_v46 = vmul.f32 %v4511_v36, %v696_v22  ;;  %v881_v36 = vld [vmem:[#allocation8 + $0x8] sm:$0xff] }
 0x3c2   :  { %v771_v53 = vpop.permute.xlu1 %770 }
 0x3c6   :  { %v855_v26 = vpop.permute.xlu1 %854 }
 0x3c7   :  { %v4513_v43 = vpop.eup %4512 }
 0x3c8   :  { %690 = vrot.lane.b32.xlu0 %v4513_v43, %s4947_s10 }
 0x3ca   :  { %v874_v31 = vpop.permute.xlu1 %873 }
 0x43a   :  { %v691_v45 = vpop.permute.xlu0 %690 }
 0x43b   :  { %v693_v47 = vmul.f32 %v691_v45, %v688_v44 }
 0x43d   :  { %v5317_v48 = vadd.f32 %v698_v46, %v693_v47 }
 0x43f   :  { %v705_v49 = vpack.c.bf16 %v5317_v48, %v5317_v48 }
 0x441   :  { %711 = vrot.lane.b32.xlu0 %v705_v49, %s4947_s10 }
 0x4b3   :  { %v712_v50 = vpop.permute.xlu0 %711 }
 0x4b4   :  { %4171 = vmatmul.mubr.msk.bf16.vlgmr.msra.gmra.mrb[12].mxu1 %vm215_vm3, %v712_v50 }
 0x4b5   :  { %4184 = vmatprep.mubr.msk.bf16.mxu1 %vm4945_vm4, %v4943_v18  ;;  %4183 = vmatpush3.bf16.msra.mxu1 %v4455_v0 }
 0x4b6   :  { %4196 = vmatprep.subr.bf16.mxu1 %v4943_v18 }
 0x587   :  { %v5331_v54 = vpop.f32.mrb[12].mxu1 }
 0x588   :  { %v773_v55 = vadd.f32 %v771_v53, %v5331_v54  ;;  %v4172_v56 = vpop.f32.mrb[13].mxu1  ;;  %v999_v29 = vadd.f32 %v5331_v54, %v5290_v10 }
 0x589   :  { %v765_v57 = vpop.f32.mrb[14].mxu1 }
 0x58a   :  { %v774_v58 = vmax.f32 %v773_v55, 0.0  ;;  %v4173_v59 = vpop.f32.mrb[15].mxu1 }
 0x58b   :  { %v4458_v59 = vld [vmem:[%s6152_s9] sm:$0xff]  }
 0x58c   :  { %v775_v60 = vpack.c.bf16 %v774_v58, %v774_v58 }
 0x58e   :  { %781 = vrot.lane.b32.xlu0 %v775_v60, %s4946_s5 }
 0x600   :  { %v782_v61 = vpop.permute.xlu0 %781 }
 0x601   :  { %4179 = vmatmul.mubr.msk.bf16.vlgmr.msra.gmra.mrb[16].mxu0 %vm215_vm3, %v782_v61  ;;  %v1089_v61 = vld [vmem:[#allocation9 + $0x8] sm:$0xff] }
 0x602   :  { %4192 = vmatprep.mubr.msk.bf16.mxu0 %vm4945_vm4, %v4943_v18  ;;  %4189 = vmatpush3.bf16.msra.mxu0 %v4456_v23 }
 0x603   :  { %4190 = vmatprep.subr.bf16.mxu0 %v4943_v18 }
 0x606   :  { %4191 = vmatpush3.bf16.msra.mxu0 %v4457_v35 }
 0x607   :  { %4204 = vmatprep.subr.bf16.mxu0 %v4943_v18 }
 0x6d4   :  { %v832_v63 = vpop.f32.mrb[16].mxu0 }
 0x6d5   :  { %v833_v3 = vadd.f32 %v5339_v62, %v832_v63  ;;  %v4180_v4 = vpop.f32.mrb[17].mxu0 }
 0x6d6   :  { %v835_v5 = vpop.f32.mrb[18].mxu0 }
 0x6d7   :  { %v838_v6 = vand.u32 2147483647, %v833_v3  ;;  %863 = vst.msk [vmem:[#allocation5] sm:$0xff] %vm218_vm2, %v833_v3  ;;  %v4181_v7 = vpop.f32.mrb[19].mxu0  ;;  %v851_v20 = vmax.f32 %v833_v3, 0.0 }
 0x6d9   :  { %v839_v8 = vsub.f32 0.0, %v838_v6 }
 0x6db   :  { %v840_v9 = vmul.f32 1.442695, %v839_v8 }
 0x6dd   :  { %4514 = vpow2.f32 %v840_v9 }
 0x6e7   :  { %v4515_v11 = vpop.eup %4514 }
 0x6e8   :  { %v842_v12 = vadd.f32 1.0, %v4515_v11  ;;  %v845_v13 = vmul.f32 -0.5, %v4515_v11  ;;  %v848_v15 = vand.u32 2147483647, %v4515_v11 }
 0x6ea   :  { %4516 = vlog2.f32 %v842_v12  ;;  %v846_v14 = vadd.f32 1.0, %v845_v13  ;;  %vm849_vm6 = vcmp.lt.f32.partialorder %v848_v15, 0.0004427343 }
 0x6ec   :  { %v847_v19 = vmul.f32 %v4515_v11, %v846_v14 }
 0x6f4   :  { %v4517_v16 = vpop.eup %4516 }
 0x6f5   :  { %v844_v17 = vmul.f32 0.6931472, %v4517_v16 }
 0x6f7   :  { %v850_v21 = vsel %vm849_vm6, %v847_v19, %v844_v17  ;;  %v4462_v19 = vld [vmem:[#allocation16] sm:$0xff]  }
 0x6f8   :  { %v852_v24 = vadd.f32 %v851_v20, %v850_v21 }
 0x6fa   :  { %v5346_v27 = vadd.f32 0.1, %v852_v24 }
 0x6fc   :  { %v857_v28 = vmul.f32 %v855_v26, %v5346_v27 }
 0x6fe   :  { %859 = vrot.lane.b32.xlu0 %v857_v28, %s4949_s13 }
 0x702   :  { %1001 = vrot.lane.b32.xlu0 %v999_v29, %s4928_s28 }
 0x770   :  { %v860_v30 = vpop.permute.xlu0 %859 }
 0x771   :  { %v862_v32 = vadd.f32 %v860_v30, %v833_v3 }
 0x773   :  { %869 = vst.msk [vmem:[#allocation7] sm:$0xff] %vm218_vm2, %v862_v32  ;;  %v876_v33 = vmul.f32 %v874_v31, %v862_v32 }
 0x774   :  { %v1002_v55 = vpop.permute.xlu0 %1001 }
 0x775   :  { %v877_v34 = vpack.c.bf16 %v876_v33, %v876_v33 }
 0x777   :  { %4185 = vmatmul.mubr.msk.bf16.vlgmr.msra.gmra.mrb[16].mxu1 %vm218_vm2, %v877_v34 }
 0x778   :  { %4200 = vmatprep.mubr.msk.bf16.mxu1 %vm4945_vm4, %v4943_v18  ;;  %4197 = vmatpush3.bf16.msra.mxu1 %v4458_v59 }
 0x779   :  { %4198 = vmatprep.subr.bf16.mxu1 %v4943_v18 }
 0x84a   :  { %v925_v37 = vpop.f32.mrb[16].mxu1 }
 0x84b   :  { %v926_v38 = vadd.f32 %v925_v37, %v881_v36  ;;  %v4186_v39 = vpop.f32.mrb[17].mxu1 }
 0x84c   :  { %v928_v40 = vpop.f32.mrb[18].mxu1 }
 0x84d   :  { %v931_v41 = vmax.f32 %v926_v38, 0.0  ;;  %v4187_v42 = vpop.f32.mrb[19].mxu1 }
 0x84f   :  { %v932_v43 = vpack.c.bf16 %v931_v41, %v931_v41  ;;  %v4463_v41 = vld [vmem:[%s6149_s6] sm:$0xff]  }
 0x851   :  { %4193 = vmatmul.mubr.msk.bf16.vlgmr.msra.gmra.mrb[20].mxu0 %vm215_vm3, %v932_v43 }
 0x852   :  { %4208 = vmatprep.mubr.msk.bf16.mxu0 %vm4945_vm4, %v4943_v18 }
 0x924   :  { %v986_v22 = vpop.f32.mrb[20].mxu0 }
 0x925   :  { %v987_v44 = vadd.f32 %v5301_v25, %v986_v22  ;;  %v4194_v45 = vpop.f32.mrb[21].mxu0 }
 0x926   :  { %v989_v46 = vpop.f32.mrb[22].mxu0 }
 0x927   :  { %v992_v47 = vadd.f32 %v987_v44, %v5331_v54  ;;  %v4195_v49 = vpop.f32.mrb[23].mxu0  ;;  %v4459_v54 = vld [vmem:[%s6152_s9 + $0x8] sm:$0xff]  }
 0x928   :  { %4199 = vmatpush3.bf16.msra.mxu1 %v4459_v54 }
 0x929   :  { %v3915_v50 = vmul.f32 -1.442695, %v992_v47  ;;  %4212 = vmatprep.subr.bf16.mxu1 %v4943_v18 }
 0x92b   :  { %4518 = vpow2.f32 %v3915_v50 }
 0x935   :  { %v4519_v51 = vpop.eup %4518 }
 0x936   :  { %v996_v52 = vadd.f32 1.0, %v4519_v51 }
 0x938   :  { %4520 = vrcp.f32 %v996_v52  ;;  %v4464_v52 = vld [vmem:[%s6149_s6 + $0x8] sm:$0xff]  }
 0x942   :  { %v4521_v53 = vpop.eup %4520 }
 0x943   :  { %v1004_v56 = vmul.f32 %v4521_v53, %v1002_v55  ;;  %v1011_v0 = vsub.f32 1.0, %v4521_v53  ;;  %v1017_v3 = vmul.f32 %v4521_v53, %v5317_v48  ;;  %v1205_v53 = vld [vmem:[#allocation8 + $0x10] sm:$0xff] }
 0x945   :  { %1006 = vrot.lane.b32.xlu1 %v1004_v56, %s4928_s28 }
 0x9b7   :  { %v1007_v57 = vpop.permute.xlu1 %1006 }
 0x9b8   :  { %v1009_v58 = vadd.f32 %v1007_v57, %v987_v44 }
 0x9ba   :  { %4522 = vtanh.f32 %v1009_v58 }
 0x9c4   :  { %v4523_v60 = vpop.eup %4522 }
 0x9c5   :  { %1013 = vrot.lane.b32.xlu0 %v4523_v60, %s4947_s10 }
 0x9c9   :  { %1091 = vrot.lane.b32.xlu0 %v1089_v61, %s4947_s10 }
 0x9cd   :  { %1175 = vrot.lane.b32.xlu0 %v5222_v1, %s4948_s7  ;;  %v4460_v1 = vld [vmem:[#allocation25] sm:$0xff]  }
 0x9ce   :  { %4205 = vmatpush3.bf16.msra.mxu0 %v4460_v1 }
 0x9cf   :  { %4206 = vmatprep.subr.bf16.mxu0 %v4943_v18 }
 0x9d1   :  { %1197 = vrot.lane.b32.xlu0 %v5224_v2, %s4944_s25  ;;  %v4461_v2 = vld [vmem:[#allocation25 + $0x8] sm:$0xff]  }
 0x9d2   :  { %4207 = vmatpush3.bf16.msra.mxu0 %v4461_v2 }
 0x9d3   :  { %4218 = vmatprep.subr.bf16.mxu0 %v4943_v18 }
 0xa37   :  { %v1014_v63 = vpop.permute.xlu0 %1013 }
 0xa38   :  { %v1016_v4 = vmul.f32 %v1014_v63, %v1011_v0 }
 0xa3a   :  { %v5383_v5 = vadd.f32 %v1017_v3, %v1016_v4 }
 0xa3b   :  { %v1092_v8 = vpop.permute.xlu0 %1091 }
 0xa3c   :  { %v1025_v6 = vpack.c.bf16 %v5383_v5, %v5383_v5 }
 0xa3e   :  { %1031 = vrot.lane.b32.xlu1 %v1025_v6, %s4947_s10 }
 0xa3f   :  { %v1176_v43 = vpop.permute.xlu0 %1175 }
 0xa43   :  { %v1198_v47 = vpop.permute.xlu0 %1197 }
 0xab0   :  { %v1032_v7 = vpop.permute.xlu1 %1031 }
 0xab1   :  { %4201 = vmatmul.mubr.msk.bf16.vlgmr.msra.gmra.mrb[20].mxu1 %vm215_vm3, %v1032_v7 }
 0xab2   :  { %4214 = vmatprep.mubr.msk.bf16.mxu1 %vm4945_vm4, %v4943_v18  ;;  %4213 = vmatpush3.bf16.msra.mxu1 %v4462_v19  ;;  %v4620_v19 = vld [vmem:[#allocation15 + $0x10] sm:$0xff] }
 0xab3   :  { %4226 = vmatprep.subr.bf16.mxu1 %v4943_v18 }
 0xb84   :  { %v5393_v9 = vpop.f32.mrb[20].mxu1 }
 0xb85   :  { %v1094_v11 = vadd.f32 %v1092_v8, %v5393_v9  ;;  %v4202_v12 = vpop.f32.mrb[21].mxu1  ;;  %v1323_v45 = vadd.f32 %v5393_v9, %v5290_v10 }
 0xb86   :  { %v1085_v13 = vpop.f32.mrb[22].mxu1 }
 0xb87   :  { %v1095_v14 = vmax.f32 %v1094_v11, 0.0  ;;  %v4203_v15 = vpop.f32.mrb[23].mxu1 }
 0xb88   :  { %v4465_v15 = vld [vmem:[%s6152_s9] sm:$0xff]  }
 0xb89   :  { %v1096_v16 = vpack.c.bf16 %v1095_v14, %v1095_v14 }
 0xb8b   :  { %1102 = vrot.lane.b32.xlu1 %v1096_v16, %s4946_s5 }
 0xbfd   :  { %v1103_v17 = vpop.permute.xlu1 %1102 }
 0xbfe   :  { %4209 = vmatmul.mubr.msk.bf16.vlgmr.msra.gmra.mrb[24].mxu0 %vm215_vm3, %v1103_v17  ;;  %v1413_v17 = vld [vmem:[#allocation9 + $0x10] sm:$0xff] }
 0xbff   :  { %4222 = vmatprep.mubr.msk.bf16.mxu0 %vm4945_vm4, %v4943_v18  ;;  %4219 = vmatpush3.bf16.msra.mxu0 %v4463_v41 }
 0xc00   :  { %4220 = vmatprep.subr.bf16.mxu0 %v4943_v18 }
 0xc03   :  { %4221 = vmatpush3.bf16.msra.mxu0 %v4464_v52 }
 0xc04   :  { %4234 = vmatprep.subr.bf16.mxu0 %v4943_v18 }
 0xcd1   :  { %v1153_v20 = vpop.f32.mrb[24].mxu0 }
 0xcd2   :  { %v1154_v21 = vadd.f32 %v5339_v62, %v1153_v20  ;;  %v4210_v23 = vpop.f32.mrb[25].mxu0  ;;  %v5439_v20 = vld [vmem:[#allocation15 + $0x18] sm:$0xff] }
 0xcd3   :  { %v1156_v24 = vpop.f32.mrb[26].mxu0 }
 0xcd4   :  { %v1159_v26 = vand.u32 2147483647, %v1154_v21  ;;  %1185 = vst.msk [vmem:[#allocation5 + $0x8] sm:$0xff] %vm218_vm2, %v1154_v21  ;;  %v4211_v28 = vpop.f32.mrb[27].mxu0  ;;  %v1172_v39 = vmax.f32 %v1154_v21, 0.0 }
 0xcd6   :  { %v1160_v29 = vsub.f32 0.0, %v1159_v26 }
 0xcd8   :  { %v1161_v30 = vmul.f32 1.442695, %v1160_v29 }
 0xcda   :  { %4524 = vpow2.f32 %v1161_v30 }
 0xce4   :  { %v4525_v31 = vpop.eup %4524 }
 0xce5   :  { %v1163_v32 = vadd.f32 1.0, %v4525_v31  ;;  %v1166_v33 = vmul.f32 -0.5, %v4525_v31  ;;  %v1169_v35 = vand.u32 2147483647, %v4525_v31 }
 0xce7   :  { %4526 = vlog2.f32 %v1163_v32  ;;  %v1167_v34 = vadd.f32 1.0, %v1166_v33  ;;  %vm1170_vm7 = vcmp.lt.f32.partialorder %v1169_v35, 0.0004427343  ;;  %v4468_v32 = vld [vmem:[#allocation25 + $0x8] sm:$0xff]  }
 0xce9   :  { %v1168_v38 = vmul.f32 %v4525_v31, %v1167_v34  ;;  %v4467_v31 = vld [vmem:[#allocation25] sm:$0xff]  }
 0xcf1   :  { %v4527_v36 = vpop.eup %4526 }
 0xcf2   :  { %v1165_v37 = vmul.f32 0.6931472, %v4527_v36 }
 0xcf4   :  { %v1171_v40 = vsel %vm1170_vm7, %v1168_v38, %v1165_v37 }
 0xcf5   :  { %v1173_v42 = vadd.f32 %v1172_v39, %v1171_v40 }
 0xcf7   :  { %v5406_v22 = vadd.f32 0.1, %v1173_v42  ;;  %v4469_v42 = vld [vmem:[#allocation16] sm:$0xff]  }
 0xcf9   :  { %v1178_v44 = vmul.f32 %v1176_v43, %v5406_v22 }
 0xcfb   :  { %1180 = vrot.lane.b32.xlu1 %v1178_v44, %s4949_s13 }
 0xcff   :  { %1325 = vrot.lane.b32.xlu1 %v1323_v45, %s4928_s28 }
 0xd6d   :  { %v1181_v46 = vpop.permute.xlu1 %1180 }
 0xd6e   :  { %v1183_v49 = vadd.f32 %v1181_v46, %v1154_v21 }
 0xd70   :  { %1193 = vst.msk [vmem:[#allocation7 + $0x8] sm:$0xff] %vm218_vm2, %v1183_v49  ;;  %v1200_v50 = vmul.f32 %v1198_v47, %v1183_v49 }
 0xd71   :  { %v1326_v11 = vpop.permute.xlu1 %1325 }
 0xd72   :  { %v1201_v51 = vpack.c.bf16 %v1200_v50, %v1200_v50 }
 0xd74   :  { %4215 = vmatmul.mubr.msk.bf16.vlgmr.msra.gmra.mrb[24].mxu1 %vm218_vm2, %v1201_v51 }
 0xd75   :  { %4230 = vmatprep.mubr.msk.bf16.mxu1 %vm4945_vm4, %v4943_v18  ;;  %4227 = vmatpush3.bf16.msra.mxu1 %v4465_v15 }
 0xd76   :  { %4228 = vmatprep.subr.bf16.mxu1 %v4943_v18 }
 0xe47   :  { %v1249_v55 = vpop.f32.mrb[24].mxu1 }
 0xe48   :  { %v1250_v56 = vadd.f32 %v1249_v55, %v1205_v53  ;;  %v4216_v57 = vpop.f32.mrb[25].mxu1 }
 0xe49   :  { %v1252_v58 = vpop.f32.mrb[26].mxu1 }
 0xe4a   :  { %v1255_v59 = vmax.f32 %v1250_v56, 0.0  ;;  %v4217_v54 = vpop.f32.mrb[27].mxu1 }
 0xe4c   :  { %v1256_v60 = vpack.c.bf16 %v1255_v59, %v1255_v59 }
 0xe4e   :  { %4223 = vmatmul.mubr.msk.bf16.vlgmr.msra.gmra.mrb[28].mxu0 %vm215_vm3, %v1256_v60 }
 0xe4f   :  { %4238 = vmatprep.mubr.msk.bf16.mxu0 %vm4945_vm4, %v4943_v18  ;;  %4235 = vmatpush3.bf16.msra.mxu0 %v4467_v31 }
 0xe50   :  { %4236 = vmatprep.subr.bf16.mxu0 %v4943_v18 }
 0xe53   :  { %4237 = vmatpush3.bf16.msra.mxu0 %v4468_v32 }
 0xe54   :  { %4248 = vmatprep.subr.bf16.mxu0 %v4943_v18 }
 0xf21   :  { %v1310_v61 = vpop.f32.mrb[28].mxu0 }
 0xf22   :  { %v1311_v0 = vadd.f32 %v5301_v25, %v1310_v61  ;;  %v4224_v63 = vpop.f32.mrb[29].mxu0 }
 0xf23   :  { %v1313_v3 = vpop.f32.mrb[30].mxu0 }
 0xf24   :  { %v1316_v4 = vadd.f32 %v1311_v0, %v5393_v9  ;;  %v4225_v6 = vpop.f32.mrb[31].mxu0  ;;  %v4466_v9 = vld [vmem:[%s6152_s9 + $0x8] sm:$0xff]  }
 0xf25   :  { %4229 = vmatpush3.bf16.msra.mxu1 %v4466_v9 }
 0xf26   :  { %v3927_v7 = vmul.f32 -1.442695, %v1316_v4  ;;  %4242 = vmatprep.subr.bf16.mxu1 %v4943_v18 }
 0xf28   :  { %4528 = vpow2.f32 %v3927_v7 }
 0xf32   :  { %v4529_v1 = vpop.eup %4528 }
 0xf33   :  { %v1320_v2 = vadd.f32 1.0, %v4529_v1 }
 0xf35   :  { %4530 = vrcp.f32 %v1320_v2 }
 0xf3f   :  { %v4531_v8 = vpop.eup %4530 }
 0xf40   :  { %v1328_v12 = vmul.f32 %v4531_v8, %v1326_v11  ;;  %v1335_v21 = vsub.f32 1.0, %v4531_v8  ;;  %v1341_v24 = vmul.f32 %v4531_v8, %v5383_v5 }
 0xf42   :  { %1330 = vrot.lane.b32.xlu0 %v1328_v12, %s4928_s28 }
 0xfb4   :  { %v1331_v13 = vpop.permute.xlu0 %1330 }
 0xfb5   :  { %v1333_v14 = vadd.f32 %v1331_v13, %v1311_v0  ;;  %v4470_v0 = vld [vmem:[%s6149_s6] sm:$0xff]   ;;  %v4471_v13 = vld [vmem:[%s6149_s6 + $0x8] sm:$0xff]  }
 0xfb7   :  { %4532 = vtanh.f32 %v1333_v14  ;;  %v1529_v14 = vld [vmem:[#allocation8 + $0x18] sm:$0xff] }
 0xfc1   :  { %v4533_v16 = vpop.eup %4532 }
 0xfc2   :  { %1337 = vrot.lane.b32.xlu1 %v4533_v16, %s4947_s10 }
 0xfc6   :  { %1415 = vrot.lane.b32.xlu1 %v1413_v17, %s4947_s10 }
 0xfca   :  { %1499 = vrot.lane.b32.xlu1 %v4620_v19, %s4948_s7 }
 0xfce   :  { %1521 = vrot.lane.b32.xlu1 %v5439_v20, %s4944_s25 }
0x1034   :  { %v1338_v23 = vpop.permute.xlu1 %1337 }
0x1035   :  { %v1340_v26 = vmul.f32 %v1338_v23, %v1335_v21 }
0x1037   :  { %v5444_v28 = vadd.f32 %v1341_v24, %v1340_v26 }
0x1038   :  { %v1416_v33 = vpop.permute.xlu1 %1415 }
0x1039   :  { %v1349_v29 = vpack.c.bf16 %v5444_v28, %v5444_v28 }
0x103b   :  { %1355 = vrot.lane.b32.xlu0 %v1349_v29, %s4947_s10 }
0x103c   :  { %v1500_v3 = vpop.permute.xlu1 %1499 }
0x1040   :  { %v1522_v2 = vpop.permute.xlu1 %1521 }
0x10ad   :  { %v1356_v30 = vpop.permute.xlu0 %1355 }
0x10ae   :  { %4231 = vmatmul.mubr.msk.bf16.vlgmr.msra.gmra.mrb[28].mxu1 %vm215_vm3, %v1356_v30 }
0x10af   :  { %4244 = vmatprep.mubr.msk.bf16.mxu1 %vm4945_vm4, %v4943_v18  ;;  %4243 = vmatpush3.bf16.msra.mxu1 %v4469_v42  ;;  %v4472_v42 = vld [vmem:[%s6152_s9] sm:$0xff]  }
0x10b0   :  { %4256 = vmatprep.subr.bf16.mxu1 %v4943_v18 }
0x1181   :  { %v5454_v34 = vpop.f32.mrb[28].mxu1 }
0x1182   :  { %v1418_v35 = vadd.f32 %v1416_v33, %v5454_v34  ;;  %v4232_v36 = vpop.f32.mrb[29].mxu1  ;;  %v1647_v7 = vadd.f32 %v5454_v34, %v5290_v10 }
0x1183   :  { %v1409_v37 = vpop.f32.mrb[30].mxu1 }
0x1184   :  { %v1419_v38 = vmax.f32 %v1418_v35, 0.0  ;;  %v4233_v39 = vpop.f32.mrb[31].mxu1 }
0x1186   :  { %v1420_v40 = vpack.c.bf16 %v1419_v38, %v1419_v38 }
0x1188   :  { %1426 = vrot.lane.b32.xlu0 %v1420_v40, %s4946_s5 }
0x11fa   :  { %v1427_v41 = vpop.permute.xlu0 %1426 }
0x11fb   :  { %4239 = vmatmul.mubr.msk.bf16.vlgmr.msra.gmra.mrb[32].mxu0 %vm215_vm3, %v1427_v41 }
0x11fc   :  { %4252 = vmatprep.mubr.msk.bf16.mxu0 %vm4945_vm4, %v4943_v18  ;;  %4249 = vmatpush3.bf16.msra.mxu0 %v4470_v0 }
0x11fd   :  { %4250 = vmatprep.subr.bf16.mxu0 %v4943_v18 }
0x1200   :  { %4251 = vmatpush3.bf16.msra.mxu0 %v4471_v13 }
0x1201   :  { %4264 = vmatprep.subr.bf16.mxu0 %v4943_v18 }
0x12ce   :  { %v1477_v43 = vpop.f32.mrb[32].mxu0 }
0x12cf   :  { %v1478_v44 = vadd.f32 %v5339_v62, %v1477_v43  ;;  %v4240_v45 = vpop.f32.mrb[33].mxu0 }
0x12d0   :  { %v1480_v46 = vpop.f32.mrb[34].mxu0 }
0x12d1   :  { %v1483_v47 = vand.u32 2147483647, %v1478_v44  ;;  %1509 = vst.msk [vmem:[#allocation5 + $0x10] sm:$0xff] %vm218_vm2, %v1478_v44  ;;  %v4241_v49 = vpop.f32.mrb[35].mxu0  ;;  %v1496_v60 = vmax.f32 %v1478_v44, 0.0 }
0x12d3   :  { %v1484_v50 = vsub.f32 0.0, %v1483_v47 }
0x12d5   :  { %v1485_v51 = vmul.f32 1.442695, %v1484_v50 }
0x12d7   :  { %4534 = vpow2.f32 %v1485_v51 }
0x12e1   :  { %v4535_v52 = vpop.eup %4534 }
0x12e2   :  { %v1487_v53 = vadd.f32 1.0, %v4535_v52  ;;  %v1490_v55 = vmul.f32 -0.5, %v4535_v52  ;;  %v1493_v57 = vand.u32 2147483647, %v4535_v52 }
0x12e4   :  { %4536 = vlog2.f32 %v1487_v53  ;;  %v1491_v56 = vadd.f32 1.0, %v1490_v55  ;;  %vm1494_vm8 = vcmp.lt.f32.partialorder %v1493_v57, 0.0004427343  ;;  %v4474_v53 = vld [vmem:[#allocation25] sm:$0xff]  }
0x12e6   :  { %v1492_v54 = vmul.f32 %v4535_v52, %v1491_v56 }
0x12ee   :  { %v4537_v58 = vpop.eup %4536 }
0x12ef   :  { %v1489_v59 = vmul.f32 0.6931472, %v4537_v58 }
0x12f1   :  { %v1495_v61 = vsel %vm1494_vm8, %v1492_v54, %v1489_v59  ;;  %vm3804_vm8 = vcmask 392192  }
0x12f2   :  { %v1497_v63 = vadd.f32 %v1496_v60, %v1495_v61 }
0x12f4   :  { %v5467_v4 = vadd.f32 0.1, %v1497_v63  ;;  %v5519_v63 = vld [vmem:[#allocation15 + $0x20] sm:$0xff] }
0x12f6   :  { %v1502_v6 = vmul.f32 %v1500_v3, %v5467_v4  ;;  %v4476_v3 = vld [vmem:[#allocation16] sm:$0xff]  }
0x12f8   :  { %1504 = vrot.lane.b32.xlu0 %v1502_v6, %s4949_s13 }
0x12fc   :  { %1649 = vrot.lane.b32.xlu0 %v1647_v7, %s4928_s28 }
0x136a   :  { %v1505_v1 = vpop.permute.xlu0 %1504 }
0x136b   :  { %v1507_v8 = vadd.f32 %v1505_v1, %v1478_v44  ;;  %v1737_v44 = vld [vmem:[#allocation9 + $0x18] sm:$0xff] }
0x136d   :  { %1517 = vst.msk [vmem:[#allocation7 + $0x10] sm:$0xff] %vm218_vm2, %v1507_v8  ;;  %v1524_v11 = vmul.f32 %v1522_v2, %v1507_v8 }
0x136e   :  { %v1650_v38 = vpop.permute.xlu0 %1649 }
0x136f   :  { %v1525_v12 = vpack.c.bf16 %v1524_v11, %v1524_v11 }
0x1371   :  { %4245 = vmatmul.mubr.msk.bf16.vlgmr.msra.gmra.mrb[32].mxu1 %vm218_vm2, %v1525_v12 }
0x1372   :  { %4260 = vmatprep.mubr.msk.bf16.mxu1 %vm4945_vm4, %v4943_v18  ;;  %4257 = vmatpush3.bf16.msra.mxu1 %v4472_v42  ;;  %v1853_v42 = vld [vmem:[#allocation8 + $0x20] sm:$0xff] }
0x1373   :  { %4258 = vmatprep.subr.bf16.mxu1 %v4943_v18 }
0x1444   :  { %v1573_v15 = vpop.f32.mrb[32].mxu1 }
0x1445   :  { %v1574_v9 = vadd.f32 %v1573_v15, %v1529_v14  ;;  %v4246_v16 = vpop.f32.mrb[33].mxu1 }
0x1446   :  { %v1576_v17 = vpop.f32.mrb[34].mxu1 }
0x1447   :  { %v1579_v19 = vmax.f32 %v1574_v9, 0.0  ;;  %v4247_v21 = vpop.f32.mrb[35].mxu1 }
0x1449   :  { %v1580_v23 = vpack.c.bf16 %v1579_v19, %v1579_v19 }
0x144b   :  { %4253 = vmatmul.mubr.msk.bf16.vlgmr.msra.gmra.mrb[36].mxu0 %vm215_vm3, %v1580_v23 }
0x144c   :  { %4268 = vmatprep.mubr.msk.bf16.mxu0 %vm4945_vm4, %v4943_v18  ;;  %4265 = vmatpush3.bf16.msra.mxu0 %v4474_v53 }
0x144d   :  { %4266 = vmatprep.subr.bf16.mxu0 %v4943_v18 }
0x151e   :  { %v1634_v24 = vpop.f32.mrb[36].mxu0 }
0x151f   :  { %v1635_v26 = vadd.f32 %v5301_v25, %v1634_v24  ;;  %v4254_v29 = vpop.f32.mrb[37].mxu0 }
0x1520   :  { %v1637_v30 = vpop.f32.mrb[38].mxu0  ;;  %v4477_v29 = vld [vmem:[%s6149_s6] sm:$0xff]  }
0x1521   :  { %v1640_v31 = vadd.f32 %v1635_v26, %v5454_v34  ;;  %v4255_v32 = vpop.f32.mrb[39].mxu0  ;;  %v4473_v34 = vld [vmem:[%s6152_s9 + $0x8] sm:$0xff]  }
0x1522   :  { %4259 = vmatpush3.bf16.msra.mxu1 %v4473_v34 }
0x1523   :  { %v3939_v33 = vmul.f32 -1.442695, %v1640_v31  ;;  %4272 = vmatprep.subr.bf16.mxu1 %v4943_v18 }
0x1525   :  { %4538 = vpow2.f32 %v3939_v33 }
0x152f   :  { %v4539_v35 = vpop.eup %4538 }
0x1530   :  { %v1644_v36 = vadd.f32 1.0, %v4539_v35 }
0x1532   :  { %4540 = vrcp.f32 %v1644_v36 }
0x153c   :  { %v4541_v37 = vpop.eup %4540 }
0x153d   :  { %v1652_v39 = vmul.f32 %v4541_v37, %v1650_v38  ;;  %v1659_v45 = vsub.f32 1.0, %v4541_v37  ;;  %v1665_v47 = vmul.f32 %v4541_v37, %v5444_v28 }
0x153f   :  { %1654 = vrot.lane.b32.xlu1 %v1652_v39, %s4928_s28 }
0x15b1   :  { %v1655_v40 = vpop.permute.xlu1 %1654 }
0x15b2   :  { %v1657_v41 = vadd.f32 %v1655_v40, %v1635_v26 }
0x15b4   :  { %4542 = vtanh.f32 %v1657_v41  ;;  %v4478_v41 = vld [vmem:[%s6149_s6 + $0x8] sm:$0xff]  }
0x15be   :  { %v4543_v43 = vpop.eup %4542 }
0x15bf   :  { %1661 = vrot.lane.b32.xlu0 %v4543_v43, %s4947_s10 }
0x15c3   :  { %1739 = vrot.lane.b32.xlu0 %v1737_v44, %s4947_s10 }
0x15c7   :  { %1823 = vrot.lane.b32.xlu0 %v5439_v20, %s4948_s7  ;;  %v4475_v20 = vld [vmem:[#allocation25 + $0x8] sm:$0xff]  }
0x15c8   :  { %4267 = vmatpush3.bf16.msra.mxu0 %v4475_v20 }
0x15c9   :  { %4278 = vmatprep.subr.bf16.mxu0 %v4943_v18 }
0x15cb   :  { %1845 = vrot.lane.b32.xlu0 %v5519_v63, %s4944_s25 }
0x1631   :  { %v1662_v46 = vpop.permute.xlu0 %1661 }
0x1632   :  { %v1664_v49 = vmul.f32 %v1662_v46, %v1659_v45 }
0x1634   :  { %v5502_v50 = vadd.f32 %v1665_v47, %v1664_v49 }
0x1635   :  { %v1740_v55 = vpop.permute.xlu0 %1739 }
0x1636   :  { %v1673_v51 = vpack.c.bf16 %v5502_v50, %v5502_v50 }
0x1638   :  { %1679 = vrot.lane.b32.xlu1 %v1673_v51, %s4947_s10 }
0x1639   :  { %v1824_v31 = vpop.permute.xlu0 %1823 }
0x163d   :  { %v1846_v37 = vpop.permute.xlu0 %1845 }
0x16aa   :  { %v1680_v52 = vpop.permute.xlu1 %1679 }
0x16ab   :  { %4261 = vmatmul.mubr.msk.bf16.vlgmr.msra.gmra.mrb[36].mxu1 %vm215_vm3, %v1680_v52 }
0x16ac   :  { %4274 = vmatprep.mubr.msk.bf16.mxu1 %vm4945_vm4, %v4943_v18  ;;  %4273 = vmatpush3.bf16.msra.mxu1 %v4476_v3 }
0x16ad   :  { %4286 = vmatprep.subr.bf16.mxu1 %v4943_v18 }
0x177e   :  { %v5512_v56 = vpop.f32.mrb[36].mxu1 }
0x177f   :  { %v1742_v57 = vadd.f32 %v1740_v55, %v5512_v56  ;;  %v4262_v58 = vpop.f32.mrb[37].mxu1  ;;  %v1971_v35 = vadd.f32 %v5512_v56, %v5290_v10 }
0x1780   :  { %v1733_v59 = vpop.f32.mrb[38].mxu1 }
0x1781   :  { %v1743_v54 = vmax.f32 %v1742_v57, 0.0  ;;  %v4263_v60 = vpop.f32.mrb[39].mxu1 }
0x1783   :  { %v1744_v61 = vpack.c.bf16 %v1743_v54, %v1743_v54 }
0x1785   :  { %1750 = vrot.lane.b32.xlu1 %v1744_v61, %s4946_s5 }
0x17f7   :  { %v1751_v0 = vpop.permute.xlu1 %1750 }
0x17f8   :  { %4269 = vmatmul.mubr.msk.bf16.vlgmr.msra.gmra.mrb[40].mxu0 %vm215_vm3, %v1751_v0 }
0x17f9   :  { %4282 = vmatprep.mubr.msk.bf16.mxu0 %vm4945_vm4, %v4943_v18  ;;  %4279 = vmatpush3.bf16.msra.mxu0 %v4477_v29 }
0x17fa   :  { %4280 = vmatprep.subr.bf16.mxu0 %v4943_v18 }
0x17fd   :  { %4281 = vmatpush3.bf16.msra.mxu0 %v4478_v41 }
0x17fe   :  { %4294 = vmatprep.subr.bf16.mxu0 %v4943_v18 }
0x18cb   :  { %v1801_v6 = vpop.f32.mrb[40].mxu0 }
0x18cc   :  { %v1802_v7 = vadd.f32 %v5339_v62, %v1801_v6  ;;  %v4270_v1 = vpop.f32.mrb[41].mxu0 }
0x18cd   :  { %v1804_v2 = vpop.f32.mrb[42].mxu0  ;;  %v2061_v1 = vld [vmem:[#allocation9 + $0x20] sm:$0xff] }
0x18ce   :  { %v1807_v8 = vand.u32 2147483647, %v1802_v7  ;;  %1833 = vst.msk [vmem:[#allocation5 + $0x18] sm:$0xff] %vm218_vm2, %v1802_v7  ;;  %v4271_v11 = vpop.f32.mrb[43].mxu0  ;;  %v1820_v24 = vmax.f32 %v1802_v7, 0.0 }
0x18d0   :  { %v1808_v12 = vsub.f32 0.0, %v1807_v8 }
0x18d2   :  { %v1809_v13 = vmul.f32 1.442695, %v1808_v12 }
0x18d4   :  { %4544 = vpow2.f32 %v1809_v13 }
0x18de   :  { %v4545_v14 = vpop.eup %4544 }
0x18df   :  { %v1811_v15 = vadd.f32 1.0, %v4545_v14  ;;  %v1814_v9 = vmul.f32 -0.5, %v4545_v14  ;;  %v1817_v17 = vand.u32 2147483647, %v4545_v14 }
0x18e1   :  { %4546 = vlog2.f32 %v1811_v15  ;;  %v1815_v16 = vadd.f32 1.0, %v1814_v9  ;;  %vm1818_vm9 = vcmp.lt.f32.partialorder %v1817_v17, 0.0004427343  ;;  %v4481_v9 = vld [vmem:[#allocation25] sm:$0xff]  }
0x18e3   :  { %v1816_v23 = vmul.f32 %v4545_v14, %v1815_v16 }
0x18eb   :  { %v4547_v19 = vpop.eup %4546 }
0x18ec   :  { %v1813_v21 = vmul.f32 0.6931472, %v4547_v19 }
0x18ee   :  { %v1819_v26 = vsel %vm1818_vm9, %v1816_v23, %v1813_v21  ;;  %vm3831_vm9 = vcmask 785408  }
0x18ef   :  { %v1821_v30 = vadd.f32 %v1820_v24, %v1819_v26 }
0x18f1   :  { %v5529_v32 = vadd.f32 0.1, %v1821_v30 }
0x18f3   :  { %v1826_v33 = vmul.f32 %v1824_v31, %v5529_v32  ;;  %v5581_v31 = vld [vmem:[#allocation15 + $0x28] sm:$0xff] }
0x18f5   :  { %1828 = vrot.lane.b32.xlu1 %v1826_v33, %s4949_s13  ;;  %v4483_v33 = vld [vmem:[#allocation16] sm:$0xff]  }
0x18f9   :  { %1973 = vrot.lane.b32.xlu1 %v1971_v35, %s4928_s28 }
0x1967   :  { %v1829_v36 = vpop.permute.xlu1 %1828 }
0x1968   :  { %v1831_v38 = vadd.f32 %v1829_v36, %v1802_v7 }
0x196a   :  { %1841 = vst.msk [vmem:[#allocation7 + $0x18] sm:$0xff] %vm218_vm2, %v1831_v38  ;;  %v1848_v39 = vmul.f32 %v1846_v37, %v1831_v38 }
0x196b   :  { %v1974_v61 = vpop.permute.xlu1 %1973 }
0x196c   :  { %v1849_v40 = vpack.c.bf16 %v1848_v39, %v1848_v39 }
0x196e   :  { %4275 = vmatmul.mubr.msk.bf16.vlgmr.msra.gmra.mrb[40].mxu1 %vm218_vm2, %v1849_v40 }
0x196f   :  { %4290 = vmatprep.mubr.msk.bf16.mxu1 %vm4945_vm4, %v4943_v18 }
0x1a41   :  { %v1897_v34 = vpop.f32.mrb[40].mxu1 }
0x1a42   :  { %v1898_v43 = vadd.f32 %v1897_v34, %v1853_v42  ;;  %v4276_v44 = vpop.f32.mrb[41].mxu1 }
0x1a43   :  { %v1900_v45 = vpop.f32.mrb[42].mxu1 }
0x1a44   :  { %v1903_v46 = vmax.f32 %v1898_v43, 0.0  ;;  %v4277_v47 = vpop.f32.mrb[43].mxu1 }
0x1a46   :  { %v1904_v49 = vpack.c.bf16 %v1903_v46, %v1903_v46 }
0x1a48   :  { %4283 = vmatmul.mubr.msk.bf16.vlgmr.msra.gmra.mrb[44].mxu0 %vm215_vm3, %v1904_v49 }
0x1a49   :  { %4298 = vmatprep.mubr.msk.bf16.mxu0 %vm4945_vm4, %v4943_v18  ;;  %4295 = vmatpush3.bf16.msra.mxu0 %v4481_v9 }
0x1a4a   :  { %4296 = vmatprep.subr.bf16.mxu0 %v4943_v18 }
0x1b1b   :  { %v1958_v51 = vpop.f32.mrb[44].mxu0 }
0x1b1c   :  { %v1959_v52 = vadd.f32 %v5301_v25, %v1958_v51  ;;  %v4284_v53 = vpop.f32.mrb[45].mxu0  ;;  %v4479_v25 = vld [vmem:[%s6152_s9] sm:$0xff]  }
0x1b1d   :  { %v1961_v20 = vpop.f32.mrb[46].mxu0  ;;  %4287 = vmatpush3.bf16.msra.mxu1 %v4479_v25  ;;  %v4484_v53 = vld [vmem:[%s6149_s6] sm:$0xff]   ;;  %v2177_v25 = vld [vmem:[#allocation8 + $0x28] sm:$0xff] }
0x1b1e   :  { %v1964_v55 = vadd.f32 %v1959_v52, %v5512_v56  ;;  %v4285_v57 = vpop.f32.mrb[47].mxu0  ;;  %v4480_v56 = vld [vmem:[%s6152_s9 + $0x8] sm:$0xff]   ;;  %4288 = vmatprep.subr.bf16.mxu1 %v4943_v18 }
0x1b20   :  { %v3951_v58 = vmul.f32 -1.442695, %v1964_v55 }
0x1b21   :  { %4289 = vmatpush3.bf16.msra.mxu1 %v4480_v56 }
0x1b22   :  { %4548 = vpow2.f32 %v3951_v58  ;;  %4302 = vmatprep.subr.bf16.mxu1 %v4943_v18 }
0x1b2c   :  { %v4549_v59 = vpop.eup %4548 }
0x1b2d   :  { %v1968_v54 = vadd.f32 1.0, %v4549_v59 }
0x1b2f   :  { %4550 = vrcp.f32 %v1968_v54 }
0x1b39   :  { %v4551_v60 = vpop.eup %4550 }
0x1b3a   :  { %v1976_v0 = vmul.f32 %v4551_v60, %v1974_v61  ;;  %v1983_v2 = vsub.f32 1.0, %v4551_v60  ;;  %v1989_v11 = vmul.f32 %v4551_v60, %v5502_v50 }
0x1b3c   :  { %1978 = vrot.lane.b32.xlu0 %v1976_v0, %s4928_s28 }
0x1bae   :  { %v1979_v3 = vpop.permute.xlu0 %1978 }
0x1baf   :  { %v1981_v6 = vadd.f32 %v1979_v3, %v1959_v52 }
0x1bb1   :  { %4552 = vtanh.f32 %v1981_v6  ;;  %v4485_v6 = vld [vmem:[%s6149_s6 + $0x8] sm:$0xff]  }
0x1bbb   :  { %v4553_v7 = vpop.eup %4552 }
0x1bbc   :  { %1985 = vrot.lane.b32.xlu1 %v4553_v7, %s4947_s10 }
0x1bc0   :  { %2063 = vrot.lane.b32.xlu1 %v2061_v1, %s4947_s10 }
0x1bc4   :  { %2147 = vrot.lane.b32.xlu1 %v5519_v63, %s4948_s7  ;;  %v4482_v63 = vld [vmem:[#allocation25 + $0x8] sm:$0xff]  }
0x1bc5   :  { %4297 = vmatpush3.bf16.msra.mxu0 %v4482_v63 }
0x1bc6   :  { %4308 = vmatprep.subr.bf16.mxu0 %v4943_v18 }
0x1bc8   :  { %2169 = vrot.lane.b32.xlu1 %v5581_v31, %s4944_s25 }
0x1c2e   :  { %v1986_v8 = vpop.permute.xlu1 %1985 }
0x1c2f   :  { %v1988_v12 = vmul.f32 %v1986_v8, %v1983_v2 }
0x1c31   :  { %v5564_v13 = vadd.f32 %v1989_v11, %v1988_v12 }
0x1c32   :  { %v2064_v16 = vpop.permute.xlu1 %2063 }
0x1c33   :  { %v1997_v14 = vpack.c.bf16 %v5564_v13, %v5564_v13 }
0x1c35   :  { %2003 = vrot.lane.b32.xlu0 %v1997_v14, %s4947_s10 }
0x1c36   :  { %v2148_v55 = vpop.permute.xlu1 %2147 }
0x1c3a   :  { %v2170_v60 = vpop.permute.xlu1 %2169 }
0x1ca7   :  { %v2004_v15 = vpop.permute.xlu0 %2003 }
0x1ca8   :  { %4291 = vmatmul.mubr.msk.bf16.vlgmr.msra.gmra.mrb[44].mxu1 %vm215_vm3, %v2004_v15  ;;  %v5610_v15 = vld [vmem:[#allocation19] ss:$0 sm:$0xff] }
0x1ca9   :  { %4304 = vmatprep.mubr.msk.bf16.mxu1 %vm4945_vm4, %v4943_v18  ;;  %4303 = vmatpush3.bf16.msra.mxu1 %v4483_v33 }
0x1caa   :  { %4316 = vmatprep.subr.bf16.mxu1 %v4943_v18 }
0x1d7b   :  { %v5574_v17 = vpop.f32.mrb[44].mxu1 }
0x1d7c   :  { %v2066_v19 = vadd.f32 %v2064_v16, %v5574_v17  ;;  %v4292_v21 = vpop.f32.mrb[45].mxu1  ;;  %v2295_v59 = vadd.f32 %v5574_v17, %v5290_v10 }
0x1d7d   :  { %v2057_v23 = vpop.f32.mrb[46].mxu1 }
0x1d7e   :  { %v2067_v24 = vmax.f32 %v2066_v19, 0.0  ;;  %v4293_v26 = vpop.f32.mrb[47].mxu1 }
0x1d80   :  { %v2068_v29 = vpack.c.bf16 %v2067_v24, %v2067_v24 }
0x1d82   :  { %2074 = vrot.lane.b32.xlu0 %v2068_v29, %s4946_s5 }
0x1df4   :  { %v2075_v30 = vpop.permute.xlu0 %2074 }
0x1df5   :  { %4299 = vmatmul.mubr.msk.bf16.vlgmr.msra.gmra.mrb[48].mxu0 %vm215_vm3, %v2075_v30 }
0x1df6   :  { %4312 = vmatprep.mubr.msk.bf16.mxu0 %vm4945_vm4, %v4943_v18  ;;  %4309 = vmatpush3.bf16.msra.mxu0 %v4484_v53 }
0x1df7   :  { %4310 = vmatprep.subr.bf16.mxu0 %v4943_v18 }
0x1dfa   :  { %4311 = vmatpush3.bf16.msra.mxu0 %v4485_v6 }
0x1dfb   :  { %4324 = vmatprep.subr.bf16.mxu0 %v4943_v18 }
0x1ec8   :  { %v2125_v35 = vpop.f32.mrb[48].mxu0 }
0x1ec9   :  { %v2126_v36 = vadd.f32 %v5339_v62, %v2125_v35  ;;  %v4300_v37 = vpop.f32.mrb[49].mxu0 }
0x1eca   :  { %v2128_v38 = vpop.f32.mrb[50].mxu0  ;;  %v4486_v37 = vld [vmem:[%s6152_s9] sm:$0xff]  }
0x1ecb   :  { %v2131_v39 = vand.u32 2147483647, %v2126_v36  ;;  %2157 = vst.msk [vmem:[#allocation5 + $0x20] sm:$0xff] %vm218_vm2, %v2126_v36  ;;  %v4301_v40 = vpop.f32.mrb[51].mxu0  ;;  %v2144_v62 = vmax.f32 %v2126_v36, 0.0 }
0x1ecd   :  { %v2132_v41 = vsub.f32 0.0, %v2131_v39  ;;  %v2385_v39 = vld [vmem:[#allocation9 + $0x28] sm:$0xff] }
0x1ecf   :  { %v2133_v42 = vmul.f32 1.442695, %v2132_v41 }
0x1ed1   :  { %4554 = vpow2.f32 %v2133_v42 }
0x1edb   :  { %v4555_v34 = vpop.eup %4554 }
0x1edc   :  { %v2135_v43 = vadd.f32 1.0, %v4555_v34  ;;  %v2138_v44 = vmul.f32 -0.5, %v4555_v34  ;;  %v2141_v46 = vand.u32 2147483647, %v4555_v34 }
0x1ede   :  { %4556 = vlog2.f32 %v2135_v43  ;;  %v2139_v45 = vadd.f32 1.0, %v2138_v44  ;;  %vm2142_vm10 = vcmp.lt.f32.partialorder %v2141_v46, 0.0004427343  ;;  %v4488_v46 = vld [vmem:[#allocation25] sm:$0xff]  }
0x1ee0   :  { %v2140_v51 = vmul.f32 %v4555_v34, %v2139_v45 }
0x1ee8   :  { %v4557_v47 = vpop.eup %4556 }
0x1ee9   :  { %v2137_v49 = vmul.f32 0.6931472, %v4557_v47  ;;  %v4489_v47 = vld [vmem:[#allocation25 + $0x8] sm:$0xff]  }
0x1eeb   :  { %v2143_v52 = vsel %vm2142_vm10, %v2140_v51, %v2137_v49  ;;  %vm3840_vm10 = vcmask 916480  }
0x1eec   :  { %v2145_v20 = vadd.f32 %v2144_v62, %v2143_v52 }
0x1eee   :  { %v5591_v57 = vadd.f32 0.1, %v2145_v20 }
0x1ef0   :  { %v2150_v58 = vmul.f32 %v2148_v55, %v5591_v57 }
0x1ef2   :  { %2152 = vrot.lane.b32.xlu0 %v2150_v58, %s4949_s13 }
0x1ef6   :  { %2297 = vrot.lane.b32.xlu0 %v2295_v59, %s4928_s28 }
0x1f64   :  { %v2153_v54 = vpop.permute.xlu0 %2152 }
0x1f65   :  { %v2155_v61 = vadd.f32 %v2153_v54, %v2126_v36  ;;  %v5645_v54 = vld [vmem:[#allocation15 + $0x30] sm:$0xff] }
0x1f67   :  { %2165 = vst.msk [vmem:[#allocation7 + $0x20] sm:$0xff] %vm218_vm2, %v2155_v61  ;;  %v2172_v0 = vmul.f32 %v2170_v60, %v2155_v61  ;;  %v4490_v60 = vld [vmem:[#allocation16] sm:$0xff]  }
0x1f68   :  { %v2298_v30 = vpop.permute.xlu0 %2297 }
0x1f69   :  { %v2173_v3 = vpack.c.bf16 %v2172_v0, %v2172_v0  ;;  %v5650_v0 = vld [vmem:[#allocation27] ss:$0 sm:$0xff] }
0x1f6b   :  { %4305 = vmatmul.mubr.msk.bf16.vlgmr.msra.gmra.mrb[48].mxu1 %vm218_vm2, %v2173_v3 }
0x1f6c   :  { %4320 = vmatprep.mubr.msk.bf16.mxu1 %vm4945_vm4, %v4943_v18  ;;  %4317 = vmatpush3.bf16.msra.mxu1 %v4486_v37 }
0x1f6d   :  { %4318 = vmatprep.subr.bf16.mxu1 %v4943_v18 }
0x203e   :  { %v2221_v56 = vpop.f32.mrb[48].mxu1 }
0x203f   :  { %v2222_v7 = vadd.f32 %v2221_v56, %v2177_v25  ;;  %v4306_v1 = vpop.f32.mrb[49].mxu1 }
0x2040   :  { %v2224_v2 = vpop.f32.mrb[50].mxu1 }
0x2041   :  { %v2227_v8 = vmax.f32 %v2222_v7, 0.0  ;;  %v4307_v11 = vpop.f32.mrb[51].mxu1 }
0x2043   :  { %v2228_v12 = vpack.c.bf16 %v2227_v8, %v2227_v8 }
0x2045   :  { %4313 = vmatmul.mubr.msk.bf16.vlgmr.msra.gmra.mrb[52].mxu0 %vm215_vm3, %v2228_v12 }
0x2046   :  { %4328 = vmatprep.mubr.msk.bf16.mxu0 %vm4945_vm4, %v4943_v18  ;;  %4325 = vmatpush3.bf16.msra.mxu0 %v4488_v46 }
0x2047   :  { %4326 = vmatprep.subr.bf16.mxu0 %v4943_v18 }
0x204a   :  { %4327 = vmatpush3.bf16.msra.mxu0 %v4489_v47 }
0x204b   :  { %4338 = vmatprep.subr.bf16.mxu0 %v4943_v18 }
0x2118   :  { %v2282_v14 = vpop.f32.mrb[52].mxu0 }
0x2119   :  { %v2283_v9 = vadd.f32 %v5610_v15, %v2282_v14  ;;  %v4314_v63 = vpop.f32.mrb[53].mxu0 }
0x211a   :  { %v2285_v16 = vpop.f32.mrb[54].mxu0 }
0x211b   :  { %v2288_v19 = vadd.f32 %v2283_v9, %v5574_v17  ;;  %v4315_v21 = vpop.f32.mrb[55].mxu0  ;;  %v4487_v17 = vld [vmem:[%s6152_s9 + $0x8] sm:$0xff]  }
0x211c   :  { %4319 = vmatpush3.bf16.msra.mxu1 %v4487_v17 }
0x211d   :  { %v3963_v23 = vmul.f32 -1.442695, %v2288_v19  ;;  %4332 = vmatprep.subr.bf16.mxu1 %v4943_v18 }
0x211f   :  { %4558 = vpow2.f32 %v3963_v23 }
0x2129   :  { %v4559_v24 = vpop.eup %4558 }
0x212a   :  { %v2292_v26 = vadd.f32 1.0, %v4559_v24  ;;  %v4491_v24 = vld [vmem:[%s6149_s6] sm:$0xff]  }
0x212c   :  { %4560 = vrcp.f32 %v2292_v26 }
0x2136   :  { %v4561_v29 = vpop.eup %4560 }
0x2137   :  { %v2300_v33 = vmul.f32 %v4561_v29, %v2298_v30  ;;  %v2307_v40 = vsub.f32 1.0, %v4561_v29  ;;  %v2313_v42 = vmul.f32 %v4561_v29, %v5564_v13 }
0x2139   :  { %2302 = vrot.lane.b32.xlu1 %v2300_v33, %s4928_s28 }
0x21ab   :  { %v2303_v35 = vpop.permute.xlu1 %2302 }
0x21ac   :  { %v2305_v36 = vadd.f32 %v2303_v35, %v2283_v9 }
0x21ae   :  { %4562 = vtanh.f32 %v2305_v36 }
0x21b8   :  { %v4563_v38 = vpop.eup %4562 }
0x21b9   :  { %2309 = vrot.lane.b32.xlu0 %v4563_v38, %s4947_s10 }
0x21bd   :  { %2387 = vrot.lane.b32.xlu0 %v2385_v39, %s4947_s10 }
0x21c1   :  { %2471 = vrot.lane.b32.xlu0 %v5581_v31, %s4948_s7 }
0x21c5   :  { %2493 = vrot.lane.b32.xlu0 %v5645_v54, %s4944_s25 }
0x222b   :  { %v2310_v41 = vpop.permute.xlu0 %2309 }
0x222c   :  { %v2312_v34 = vmul.f32 %v2310_v41, %v2307_v40  ;;  %v4492_v40 = vld [vmem:[%s6149_s6 + $0x8] sm:$0xff]   ;;  %v2501_v41 = vld [vmem:[#allocation8 + $0x30] sm:$0xff] }
0x222e   :  { %v5628_v43 = vadd.f32 %v2313_v42, %v2312_v34 }
0x222f   :  { %v2388_v49 = vpop.permute.xlu0 %2387 }
0x2230   :  { %v2321_v44 = vpack.c.bf16 %v5628_v43, %v5628_v43 }
0x2232   :  { %2327 = vrot.lane.b32.xlu1 %v2321_v44, %s4947_s10 }
0x2233   :  { %v2472_v29 = vpop.permute.xlu0 %2471 }
0x2237   :  { %v2494_v37 = vpop.permute.xlu0 %2493 }
0x22a4   :  { %v2328_v45 = vpop.permute.xlu1 %2327 }
0x22a5   :  { %4321 = vmatmul.mubr.msk.bf16.vlgmr.msra.gmra.mrb[52].mxu1 %vm215_vm3, %v2328_v45 }
0x22a6   :  { %4334 = vmatprep.mubr.msk.bf16.mxu1 %vm4945_vm4, %v4943_v18  ;;  %4333 = vmatpush3.bf16.msra.mxu1 %v4490_v60 }
0x22a7   :  { %4346 = vmatprep.subr.bf16.mxu1 %v4943_v18 }
0x2378   :  { %v5638_v51 = vpop.f32.mrb[52].mxu1 }
0x2379   :  { %v2390_v62 = vadd.f32 %v2388_v49, %v5638_v51  ;;  %v4322_v52 = vpop.f32.mrb[53].mxu1  ;;  %v2619_v35 = vadd.f32 %v5638_v51, %v5290_v10 }
0x237a   :  { %v2381_v53 = vpop.f32.mrb[54].mxu1 }
0x237b   :  { %v2391_v20 = vmax.f32 %v2390_v62, 0.0  ;;  %v4323_v55 = vpop.f32.mrb[55].mxu1 }
0x237d   :  { %v2392_v58 = vpack.c.bf16 %v2391_v20, %v2391_v20 }
0x237f   :  { %2398 = vrot.lane.b32.xlu1 %v2392_v58, %s4946_s5 }
0x23f1   :  { %v2399_v59 = vpop.permute.xlu1 %2398 }
0x23f2   :  { %4329 = vmatmul.mubr.msk.bf16.vlgmr.msra.gmra.mrb[56].mxu0 %vm215_vm3, %v2399_v59 }
0x23f3   :  { %4342 = vmatprep.mubr.msk.bf16.mxu0 %vm4945_vm4, %v4943_v18  ;;  %4339 = vmatpush3.bf16.msra.mxu0 %v4491_v24 }
0x23f4   :  { %4340 = vmatprep.subr.bf16.mxu0 %v4943_v18 }
0x23f7   :  { %4341 = vmatpush3.bf16.msra.mxu0 %v4492_v40  ;;  %v4497_v40 = vld [vmem:[#allocation16] sm:$0xff]  }
0x23f8   :  { %4354 = vmatprep.subr.bf16.mxu0 %v4943_v18 }
0x24c5   :  { %v2449_v61 = vpop.f32.mrb[56].mxu0 }
0x24c6   :  { %v2450_v3 = vadd.f32 %v5650_v0, %v2449_v61  ;;  %v4330_v6 = vpop.f32.mrb[57].mxu0 }
0x24c7   :  { %v2452_v25 = vpop.f32.mrb[58].mxu0 }
0x24c8   :  { %v2455_v56 = vand.u32 2147483647, %v2450_v3  ;;  %2481 = vst.msk [vmem:[#allocation5 + $0x28] sm:$0xff] %vm218_vm2, %v2450_v3  ;;  %v4331_v7 = vpop.f32.mrb[59].mxu0  ;;  %v2468_v21 = vmax.f32 %v2450_v3, 0.0 }
0x24ca   :  { %v2456_v1 = vsub.f32 0.0, %v2455_v56 }
0x24cc   :  { %v2457_v2 = vmul.f32 1.442695, %v2456_v1  ;;  %v4493_v1 = vld [vmem:[%s6152_s9] sm:$0xff]  }
0x24ce   :  { %4564 = vpow2.f32 %v2457_v2 }
0x24d8   :  { %v4565_v8 = vpop.eup %4564 }
0x24d9   :  { %v2459_v11 = vadd.f32 1.0, %v4565_v8  ;;  %v2462_v12 = vmul.f32 -0.5, %v4565_v8  ;;  %v2465_v9 = vand.u32 2147483647, %v4565_v8 }
0x24db   :  { %4566 = vlog2.f32 %v2459_v11  ;;  %v2463_v14 = vadd.f32 1.0, %v2462_v12  ;;  %vm2466_vm11 = vcmp.lt.f32.partialorder %v2465_v9, 0.0004427343 }
0x24dd   :  { %v2464_v19 = vmul.f32 %v4565_v8, %v2463_v14  ;;  %v2709_v8 = vld [vmem:[#allocation9 + $0x30] sm:$0xff] }
0x24e5   :  { %v4567_v63 = vpop.eup %4566 }
0x24e6   :  { %v2461_v16 = vmul.f32 0.6931472, %v4567_v63 }
0x24e8   :  { %v2467_v23 = vsel %vm2466_vm11, %v2464_v19, %v2461_v16 }
0x24e9   :  { %v2469_v26 = vadd.f32 %v2468_v21, %v2467_v23  ;;  %v4495_v21 = vld [vmem:[#allocation25] sm:$0xff]   ;;  %v4496_v23 = vld [vmem:[#allocation25 + $0x8] sm:$0xff]  }
0x24eb   :  { %v5657_v30 = vadd.f32 0.1, %v2469_v26 }
0x24ed   :  { %v2474_v33 = vmul.f32 %v2472_v29, %v5657_v30 }
0x24ef   :  { %2476 = vrot.lane.b32.xlu1 %v2474_v33, %s4949_s13 }
0x24f3   :  { %2621 = vrot.lane.b32.xlu1 %v2619_v35, %s4928_s28 }
0x2561   :  { %v2477_v36 = vpop.permute.xlu1 %2476 }
0x2562   :  { %v2479_v17 = vadd.f32 %v2477_v36, %v2450_v3 }
0x2564   :  { %2489 = vst.msk [vmem:[#allocation7 + $0x28] sm:$0xff] %vm218_vm2, %v2479_v17  ;;  %v2496_v38 = vmul.f32 %v2494_v37, %v2479_v17 }
0x2565   :  { %v2622_v6 = vpop.permute.xlu1 %2621 }
0x2566   :  { %v2497_v39 = vpack.c.bf16 %v2496_v38, %v2496_v38 }
0x2568   :  { %4335 = vmatmul.mubr.msk.bf16.vlgmr.msra.gmra.mrb[56].mxu1 %vm218_vm2, %v2497_v39  ;;  %v5709_v39 = vld [vmem:[#allocation15 + $0x38] sm:$0xff] }
0x2569   :  { %4350 = vmatprep.mubr.msk.bf16.mxu1 %vm4945_vm4, %v4943_v18  ;;  %4347 = vmatpush3.bf16.msra.mxu1 %v4493_v1 }
0x256a   :  { %4348 = vmatprep.subr.bf16.mxu1 %v4943_v18 }
0x263b   :  { %v2545_v42 = vpop.f32.mrb[56].mxu1 }
0x263c   :  { %v2546_v34 = vadd.f32 %v2545_v42, %v2501_v41  ;;  %v4336_v44 = vpop.f32.mrb[57].mxu1 }
0x263d   :  { %v2548_v45 = vpop.f32.mrb[58].mxu1 }
0x263e   :  { %v2551_v46 = vmax.f32 %v2546_v34, 0.0  ;;  %v4337_v47 = vpop.f32.mrb[59].mxu1 }
0x2640   :  { %v2552_v49 = vpack.c.bf16 %v2551_v46, %v2551_v46 }
0x2642   :  { %4343 = vmatmul.mubr.msk.bf16.vlgmr.msra.gmra.mrb[60].mxu0 %vm215_vm3, %v2552_v49 }
0x2643   :  { %4358 = vmatprep.mubr.msk.bf16.mxu0 %vm4945_vm4, %v4943_v18  ;;  %4355 = vmatpush3.bf16.msra.mxu0 %v4495_v21 }
0x2644   :  { %4356 = vmatprep.subr.bf16.mxu0 %v4943_v18 }
0x2647   :  { %4357 = vmatpush3.bf16.msra.mxu0 %v4496_v23 }
0x2648   :  { %4368 = vmatprep.subr.bf16.mxu0 %v4943_v18 }
0x2715   :  { %v2606_v62 = vpop.f32.mrb[60].mxu0 }
0x2716   :  { %v2607_v52 = vadd.f32 %v5610_v15, %v2606_v62  ;;  %v4344_v53 = vpop.f32.mrb[61].mxu0 }
0x2717   :  { %v2609_v20 = vpop.f32.mrb[62].mxu0 }
0x2718   :  { %v2612_v55 = vadd.f32 %v2607_v52, %v5638_v51  ;;  %v4345_v58 = vpop.f32.mrb[63].mxu0  ;;  %v4494_v51 = vld [vmem:[%s6152_s9 + $0x8] sm:$0xff]  }
0x2719   :  { %4349 = vmatpush3.bf16.msra.mxu1 %v4494_v51 }
0x271a   :  { %v3975_v59 = vmul.f32 -1.442695, %v2612_v55  ;;  %4362 = vmatprep.subr.bf16.mxu1 %v4943_v18 }
0x271c   :  { %4568 = vpow2.f32 %v3975_v59 }
0x2726   :  { %v4569_v60 = vpop.eup %4568 }
0x2727   :  { %v2616_v61 = vadd.f32 1.0, %v4569_v60 }
0x2729   :  { %4570 = vrcp.f32 %v2616_v61 }
0x2733   :  { %v4571_v3 = vpop.eup %4570 }
0x2734   :  { %v2624_v25 = vmul.f32 %v4571_v3, %v2622_v6  ;;  %v2631_v11 = vsub.f32 1.0, %v4571_v3  ;;  %v2637_v14 = vmul.f32 %v4571_v3, %v5628_v43  ;;  %v4498_v6 = vld [vmem:[%s6149_s6] sm:$0xff]  }
0x2736   :  { %2626 = vrot.lane.b32.xlu0 %v2624_v25, %s4928_s28 }
0x27a8   :  { %v2627_v56 = vpop.permute.xlu0 %2626 }
0x27a9   :  { %v2629_v7 = vadd.f32 %v2627_v56, %v2607_v52 }
0x27ab   :  { %4572 = vtanh.f32 %v2629_v7 }
0x27b5   :  { %v4573_v2 = vpop.eup %4572 }
0x27b6   :  { %2633 = vrot.lane.b32.xlu1 %v4573_v2, %s4947_s10 }
0x27ba   :  { %2711 = vrot.lane.b32.xlu1 %v2709_v8, %s4947_s10 }
0x27be   :  { %2795 = vrot.lane.b32.xlu1 %v5645_v54, %s4948_s7 }
0x27c2   :  { %2817 = vrot.lane.b32.xlu1 %v5709_v39, %s4944_s25 }
0x2828   :  { %v2634_v12 = vpop.permute.xlu1 %2633 }
0x2829   :  { %v2636_v9 = vmul.f32 %v2634_v12, %v2631_v11 }
0x282b   :  { %v5692_v63 = vadd.f32 %v2637_v14, %v2636_v9  ;;  %v4499_v9 = vld [vmem:[%s6149_s6 + $0x8] sm:$0xff]  }
0x282c   :  { %v2712_v24 = vpop.permute.xlu1 %2711 }
0x282d   :  { %v2645_v16 = vpack.c.bf16 %v5692_v63, %v5692_v63 }
0x282f   :  { %2651 = vrot.lane.b32.xlu0 %v2645_v16, %s4947_s10 }
0x2830   :  { %v2796_v56 = vpop.permute.xlu1 %2795 }
0x2834   :  { %v2818_v8 = vpop.permute.xlu1 %2817 }
0x28a1   :  { %v2652_v19 = vpop.permute.xlu0 %2651 }
0x28a2   :  { %4351 = vmatmul.mubr.msk.bf16.vlgmr.msra.gmra.mrb[60].mxu1 %vm215_vm3, %v2652_v19 }
0x28a3   :  { %4364 = vmatprep.mubr.msk.bf16.mxu1 %vm4945_vm4, %v4943_v18  ;;  %4363 = vmatpush3.bf16.msra.mxu1 %v4497_v40 }
0x28a4   :  { %4376 = vmatprep.subr.bf16.mxu1 %v4943_v18 }
0x2975   :  { %v5702_v26 = vpop.f32.mrb[60].mxu1 }
0x2976   :  { %v2714_v29 = vadd.f32 %v2712_v24, %v5702_v26  ;;  %v4352_v33 = vpop.f32.mrb[61].mxu1  ;;  %v2943_v51 = vadd.f32 %v5702_v26, %v5290_v10  ;;  %v2825_v10 = vld [vmem:[#allocation8 + $0x38] sm:$0xff] }
0x2977   :  { %v2705_v35 = vpop.f32.mrb[62].mxu1 }
0x2978   :  { %v2715_v36 = vmax.f32 %v2714_v29, 0.0  ;;  %v4353_v37 = vpop.f32.mrb[63].mxu1 }
0x297a   :  { %v2716_v17 = vpack.c.bf16 %v2715_v36, %v2715_v36 }
0x297c   :  { %2722 = vrot.lane.b32.xlu0 %v2716_v17, %s4946_s5 }
0x29ee   :  { %v2723_v38 = vpop.permute.xlu0 %2722 }
0x29ef   :  { %4359 = vmatmul.mubr.msk.bf16.vlgmr.msra.gmra.mrb[64].mxu0 %vm215_vm3, %v2723_v38 }
0x29f0   :  { %4372 = vmatprep.mubr.msk.bf16.mxu0 %vm4945_vm4, %v4943_v18  ;;  %4369 = vmatpush3.bf16.msra.mxu0 %v4498_v6 }
0x29f1   :  { %4370 = vmatprep.subr.bf16.mxu0 %v4943_v18 }
0x29f4   :  { %4371 = vmatpush3.bf16.msra.mxu0 %v4499_v9 }
0x29f5   :  { %4384 = vmatprep.subr.bf16.mxu0 %v4943_v18 }
0x2ac2   :  { %v2773_v41 = vpop.f32.mrb[64].mxu0 }
0x2ac3   :  { %v2774_v42 = vadd.f32 %v5650_v0, %v2773_v41  ;;  %v4360_v34 = vpop.f32.mrb[65].mxu0 }
0x2ac4   :  { %v2776_v44 = vpop.f32.mrb[66].mxu0 }
0x2ac5   :  { %v2779_v45 = vand.u32 2147483647, %v2774_v42  ;;  %2805 = vst.msk [vmem:[#allocation5 + $0x30] sm:$0xff] %vm218_vm2, %v2774_v42  ;;  %v4361_v46 = vpop.f32.mrb[67].mxu0  ;;  %v2792_v61 = vmax.f32 %v2774_v42, 0.0 }
0x2ac7   :  { %v2780_v47 = vsub.f32 0.0, %v2779_v45 }
0x2ac9   :  { %v2781_v49 = vmul.f32 1.442695, %v2780_v47 }
0x2acb   :  { %4574 = vpow2.f32 %v2781_v49 }
0x2ad5   :  { %v4575_v62 = vpop.eup %4574 }
0x2ad6   :  { %v2783_v52 = vadd.f32 1.0, %v4575_v62  ;;  %v2786_v53 = vmul.f32 -0.5, %v4575_v62  ;;  %v2789_v55 = vand.u32 2147483647, %v4575_v62 }
0x2ad8   :  { %4576 = vlog2.f32 %v2783_v52  ;;  %v2787_v20 = vadd.f32 1.0, %v2786_v53  ;;  %vm2790_vm12 = vcmp.lt.f32.partialorder %v2789_v55, 0.0004427343  ;;  %v3495_v52 = vld [vmem:[#allocation15 + $0x18] sm:$0xff] }
0x2ada   :  { %v2788_v60 = vmul.f32 %v4575_v62, %v2787_v20  ;;  %v4502_v20 = vld [vmem:[%s6157_s14] sm:$0xff]  }
0x2ae2   :  { %v4577_v58 = vpop.eup %4576 }
0x2ae3   :  { %v2785_v59 = vmul.f32 0.6931472, %v4577_v58 }
0x2ae5   :  { %v2791_v3 = vsel %vm2790_vm12, %v2788_v60, %v2785_v59 }
0x2ae6   :  { %v2793_v25 = vadd.f32 %v2792_v61, %v2791_v3 }
0x2ae8   :  { %v5719_v7 = vadd.f32 0.1, %v2793_v25 }
0x2aea   :  { %v2798_v1 = vmul.f32 %v2796_v56, %v5719_v7 }
0x2aec   :  { %2800 = vrot.lane.b32.xlu0 %v2798_v1, %s4949_s13 }
0x2af0   :  { %2945 = vrot.lane.b32.xlu0 %v2943_v51, %s4928_s28 }
0x2b5e   :  { %v2801_v2 = vpop.permute.xlu0 %2800 }
0x2b5f   :  { %v2803_v11 = vadd.f32 %v2801_v2, %v2774_v42 }
0x2b61   :  { %2813 = vst.msk [vmem:[#allocation7 + $0x30] sm:$0xff] %vm218_vm2, %v2803_v11  ;;  %v2820_v12 = vmul.f32 %v2818_v8, %v2803_v11 }
0x2b62   :  { %v2946_v45 = vpop.permute.xlu0 %2945 }
0x2b63   :  { %v2821_v14 = vpack.c.bf16 %v2820_v12, %v2820_v12 }
0x2b65   :  { %4365 = vmatmul.mubr.msk.bf16.vlgmr.msra.gmra.mrb[64].mxu1 %vm218_vm2, %v2821_v14 }
0x2b66   :  { %4380 = vmatprep.mubr.msk.bf16.mxu1 %vm4945_vm4, %v4943_v18 }
0x2c38   :  { %v2869_v16 = vpop.f32.mrb[64].mxu1 }
0x2c39   :  { %v2870_v19 = vadd.f32 %v2869_v16, %v2825_v10  ;;  %v4366_v21 = vpop.f32.mrb[65].mxu1 }
0x2c3a   :  { %v2872_v23 = vpop.f32.mrb[66].mxu1 }
0x2c3b   :  { %v2875_v24 = vmax.f32 %v2870_v19, 0.0  ;;  %v4367_v29 = vpop.f32.mrb[67].mxu1 }
0x2c3d   :  { %v2876_v33 = vpack.c.bf16 %v2875_v24, %v2875_v24 }
0x2c3f   :  { %4373 = vmatmul.mubr.msk.bf16.vlgmr.msra.gmra.mrb[68].mxu0 %vm215_vm3, %v2876_v33 }
0x2c40   :  { %4388 = vmatprep.mubr.msk.bf16.mxu0 %vm4945_vm4, %v4943_v18 }
0x2d12   :  { %v2930_v35 = vpop.f32.mrb[68].mxu0 }
0x2d13   :  { %v2931_v36 = vadd.f32 %v5610_v15, %v2930_v35  ;;  %v4374_v37 = vpop.f32.mrb[69].mxu0  ;;  %v3033_v15 = vld [vmem:[#allocation9 + $0x38] sm:$0xff] }
0x2d14   :  { %v2933_v17 = vpop.f32.mrb[70].mxu0  ;;  %v4505_v37 = vld [vmem:[#allocation25 + $0x8] sm:$0xff]  }
0x2d15   :  { %v2936_v38 = vadd.f32 %v2931_v36, %v5702_v26  ;;  %v4375_v40 = vpop.f32.mrb[71].mxu0  ;;  %v3493_v26 = vld [vmem:[#allocation15 + $0x8] sm:$0xff]  ;;  %v4506_v17 = vld [vmem:[#allocation28] sm:$0xff]  }
0x2d17   :  { %v3987_v41 = vmul.f32 -1.442695, %v2936_v38 }
0x2d19   :  { %4578 = vpow2.f32 %v3987_v41 }
0x2d23   :  { %v4579_v42 = vpop.eup %4578 }
0x2d24   :  { %v2940_v34 = vadd.f32 1.0, %v4579_v42 }
0x2d26   :  { %4580 = vrcp.f32 %v2940_v34 }
0x2d30   :  { %v4581_v44 = vpop.eup %4580 }
0x2d31   :  { %v2948_v46 = vmul.f32 %v4581_v44, %v2946_v45 }
0x2d33   :  { %2950 = vrot.lane.b32.xlu1 %v2948_v46, %s4928_s28  ;;  %v3492_v46 = vld [vmem:[#allocation15] sm:$0xff] }
0x2da5   :  { %v2951_v47 = vpop.permute.xlu1 %2950 }
0x2da6   :  { %v2953_v49 = vadd.f32 %v2951_v47, %v2931_v36  ;;  %v4504_v36 = vld [vmem:[#allocation25] sm:$0xff]   ;;  %v3494_v47 = vld [vmem:[#allocation15 + $0x10] sm:$0xff] }
0x2da7   :  { %4385 = vmatpush3.bf16.msra.mxu0 %v4504_v36 }
0x2da8   :  { %4582 = vtanh.f32 %v2953_v49  ;;  %4386 = vmatprep.subr.bf16.mxu0 %v4943_v18  ;;  %v3496_v49 = vld [vmem:[#allocation15 + $0x20] sm:$0xff] }
0x2dab   :  { %4387 = vmatpush3.bf16.msra.mxu0 %v4505_v37 }
0x2dac   :  { %4404 = vmatprep.subr.bf16.mxu0 %v4506_v17 }
0x2db2   :  { %v4583_v62 = vpop.eup %4582 }
0x2db3   :  { %2957 = vrot.lane.b32.xlu0 %v4583_v62, %s4947_s10 }
0x2db7   :  { %701 = vrot.lane.b32.xlu0 %v5317_v48, %s4947_s10  ;;  %v4500_v48 = vld [vmem:[%s6152_s9] sm:$0xff]  }
0x2db8   :  { %4377 = vmatpush3.bf16.msra.mxu1 %v4500_v48 }
0x2db9   :  { %4378 = vmatprep.subr.bf16.mxu1 %v4943_v18  ;;  %v3994_v18 = vld [vmem:[%s6158_s15] ss:$0 sm:$0xff] }
0x2dbb   :  { %1344 = vrot.lane.b32.xlu0 %v5444_v28, %s4947_s10  ;;  %v4501_v28 = vld [vmem:[%s6152_s9 + $0x8] sm:$0xff]  }
0x2dbc   :  { %4379 = vmatpush3.bf16.msra.mxu1 %v4501_v28 }
0x2dbd   :  { %4392 = vmatprep.subr.bf16.mxu1 %v4502_v20 }
0x2dbf   :  { %1992 = vrot.lane.b32.xlu0 %v5564_v13, %s4947_s10  ;;  %v2955_v13 = vsub.f32 1.0, %v4581_v44 }
0x2dc3   :  { %2640 = vrot.lane.b32.xlu0 %v5692_v63, %s4947_s10 }
0x2dc7   :  { %3035 = vrot.lane.b32.xlu0 %v3033_v15, %s4947_s10 }
0x2dcb   :  { %3119 = vrot.lane.b32.xlu0 %v5709_v39, %s4948_s7 }
0x2dcf   :  { %3510 = vrot.lane.b32.xlu0 %v3493_v26, %s4936_s26 }
0x2dd3   :  { %3514 = vrot.lane.b32.xlu0 %v3495_v52, %s4936_s26 }
0x2dd7   :  { %3518 = vrot.lane.b32.xlu0 %v5581_v31, %s4936_s26 }
0x2ddb   :  { %3522 = vrot.lane.b32.xlu0 %v5709_v39, %s4936_s26  ;;  %v2961_v39 = vmul.f32 %v4581_v44, %v5692_v63 }
0x2ddf   :  { %1511 = vrot.lane.b32.xlu0 %v5467_v4, %s4949_s13 }
0x2de3   :  { %2159 = vrot.lane.b32.xlu0 %v5591_v57, %s4949_s13 }
0x2de7   :  { %2807 = vrot.lane.b32.xlu0 %v5719_v7, %s4949_s13  ;;  %v4503_v7 = vld [vmem:[%s6157_s14 + $0x8] sm:$0xff]  }
0x2e25   :  { %v2958_v31 = vpop.permute.xlu0 %2957 }
0x2e26   :  { %v2960_v53 = vmul.f32 %v2958_v31, %v2955_v13 }
0x2e28   :  { %v2962_v55 = vadd.f32 %v2961_v39, %v2960_v53 }
0x2e29   :  { %v702_v58 = vpop.permute.xlu0 %701 }
0x2e2a   :  { %704 = vst.msk [vmem:[#allocation4] sm:$0xff] %vm215_vm3, %v702_v58  ;;  %v2969_v4 = vpack.c.bf16 %v2962_v55, %v2962_v55 }
0x2e2c   :  { %2975 = vrot.lane.b32.xlu1 %v2969_v4, %s4947_s10 }
0x2e2d   :  { %v1345_v57 = vpop.permute.xlu0 %1344 }
0x2e2e   :  { %1348 = vst.msk [vmem:[#allocation4 + $0x10] sm:$0xff] %vm215_vm3, %v1345_v57 }
0x2e30   :  { %1020 = vrot.lane.b32.xlu1 %v5383_v5, %s4947_s10 }
0x2e31   :  { %v1993_v63 = vpop.permute.xlu0 %1992  ;;  %v5807_v11 = vld [vmem:[#allocation4] sm:$0xff] }
0x2e32   :  { %1996 = vst.msk [vmem:[#allocation4 + $0x20] sm:$0xff] %vm215_vm3, %v1993_v63 }
0x2e34   :  { %1668 = vrot.lane.b32.xlu1 %v5502_v50, %s4947_s10 }
0x2e35   :  { %v2641_v59 = vpop.permute.xlu0 %2640  ;;  %v5815_v10 = vld [vmem:[#allocation4 + $0x10] sm:$0xff] }
0x2e36   :  { %2644 = vst.msk [vmem:[#allocation4 + $0x30] sm:$0xff] %vm215_vm3, %v2641_v59 }
0x2e38   :  { %2316 = vrot.lane.b32.xlu1 %v5628_v43, %s4947_s10 }
0x2e39   :  { %v3036_v60 = vpop.permute.xlu0 %3035  ;;  %v5824_v21 = vld [vmem:[#allocation4 + $0x20] sm:$0xff] }
0x2e3c   :  { %2964 = vrot.lane.b32.xlu1 %v2962_v55, %s4947_s10 }
0x2e3d   :  { %v5788_v61 = vpop.permute.xlu0 %3119  ;;  %v5831_v29 = vld [vmem:[#allocation4 + $0x30] sm:$0xff] }
0x2e41   :  { %v5790_v3 = vpop.permute.xlu0 %3510 }
0x2e45   :  { %v5792_v5 = vpop.permute.xlu0 %3514 }
0x2e49   :  { %v5794_v6 = vpop.permute.xlu0 %3518 }
0x2e4d   :  { %v5796_v25 = vpop.permute.xlu0 %3522 }
0x2e51   :  { %v1512_v50 = vpop.permute.xlu0 %1511 }
0x2e52   :  { %1515 = vst.msk [vmem:[#allocation6 + $0x10] sm:$0xff] %vm218_vm2, %v1512_v50 }
0x2e55   :  { %v2160_v56 = vpop.permute.xlu0 %2159 }
0x2e56   :  { %2163 = vst.msk [vmem:[#allocation6 + $0x20] sm:$0xff] %vm218_vm2, %v2160_v56 }
0x2e59   :  { %v2808_v43 = vpop.permute.xlu0 %2807 }
0x2e5a   :  { %2811 = vst.msk [vmem:[#allocation6 + $0x30] sm:$0xff] %vm218_vm2, %v2808_v43 }
0x2e9e   :  { %v2976_v1 = vpop.permute.xlu1 %2975 }
0x2e9f   :  { %4381 = vmatmul.mubr.msk.bf16.vlgmr.msra.gmra.mrb[68].mxu1 %vm215_vm3, %v2976_v1 }
0x2ea0   :  { %4393 = vmatpush3.bf16.msra.mxu1 %v4502_v20 }
0x2ea1   :  { %4394 = vmatprep.subr.bf16.mxu1 %v4503_v7 }
0x2ea2   :  { %v1021_v51 = vpop.permute.xlu1 %1020 }
0x2ea3   :  { %1024 = vst.msk [vmem:[#allocation4 + $0x8] sm:$0xff] %vm215_vm3, %v1021_v51 }
0x2ea4   :  { %4395 = vmatpush3.bf16.msra.mxu1 %v4503_v7 }
0x2ea6   :  { %v1669_v2 = vpop.permute.xlu1 %1668 }
0x2ea7   :  { %1672 = vst.msk [vmem:[#allocation4 + $0x18] sm:$0xff] %vm215_vm3, %v1669_v2 }
0x2eaa   :  { %v2317_v8 = vpop.permute.xlu1 %2316  ;;  %v5809_v12 = vld [vmem:[#allocation4 + $0x8] sm:$0xff] }
0x2eab   :  { %2320 = vst.msk [vmem:[#allocation4 + $0x28] sm:$0xff] %vm215_vm3, %v2317_v8  ;;  %v3148_v14 = vpack.c.bf16 %v5809_v12, %v5807_v11 }
0x2ead   :  { %4396 = vmatprep.mubr.msk.bf16.mxu1 %vm215_vm3, %v3148_v14 }
0x2eae   :  { %v2965_v9 = vpop.permute.xlu1 %2964  ;;  %v5817_v16 = vld [vmem:[#allocation4 + $0x18] sm:$0xff] }
0x2eaf   :  { %2968 = vst.msk [vmem:[#allocation4 + $0x38] sm:$0xff] %vm215_vm3, %v2965_v9  ;;  %3138 = vst.msk [vmem:[#allocation2] sm:$0xff] %vm215_vm3, %v2965_v9  ;;  %v3149_v19 = vpack.c.bf16 %v5817_v16, %v5815_v10 }
0x2eb1   :  { %4397 = vmatmul.mubr.msk.bf16.vlgmr.msra.gmra.mrb[72].mxu1 %vm215_vm3, %v3149_v19 }
0x2eb2   :  { %v5826_v23 = vld [vmem:[#allocation4 + $0x28] sm:$0xff] }
0x2eb3   :  { %v3150_v24 = vpack.c.bf16 %v5826_v23, %v5824_v21 }
0x2eb5   :  { %4400 = vmatprep.mubr.msk.bf16.mxu1 %vm215_vm3, %v3150_v24 }
0x2eb6   :  { %v5833_v33 = vld [vmem:[#allocation4 + $0x38] sm:$0xff] }
0x2eb7   :  { %v3151_v35 = vpack.c.bf16 %v5833_v33, %v5831_v29 }
0x2eb9   :  { %4401 = vmatmul.mubr.msk.bf16.gmra.mrb[76].mxu1 %vm215_vm3, %v3151_v35 }
0x2f72   :  { %v3026_v38 = vpop.f32.mrb[68].mxu1 }
0x2f73   :  { %v3038_v40 = vadd.f32 %v3036_v60, %v3026_v38  ;;  %v4382_v41 = vpop.f32.mrb[69].mxu1 }
0x2f74   :  { %v3029_v42 = vpop.f32.mrb[70].mxu1 }
0x2f75   :  { %v3039_v34 = vmax.f32 %v3038_v40, 0.0  ;;  %v4383_v44 = vpop.f32.mrb[71].mxu1 }
0x2f77   :  { %v3040_v45 = vpack.c.bf16 %v3039_v34, %v3039_v34 }
0x2f79   :  { %3046 = vrot.lane.b32.xlu1 %v3040_v45, %s4946_s5  ;;  %v4001_v45 = vld [vmem:[%s6160_s17] ss:$0 sm:$0xff]  ;;  %s4950_s17 = smov 80  }
0x2f7d   :  { %3508 = vrot.lane.b32.xlu1 %v3492_v46, %s4936_s26 }
0x2f81   :  { %3512 = vrot.lane.b32.xlu1 %v3494_v47, %s4936_s26 }
0x2f84   :  { %v4398_v62 = vpop.f32.mrb[72].mxu1 }
0x2f85   :  { %v3230_v15 = vadd.f32 %v4398_v62, %v3994_v18  ;;  %v3221_v26 = vpop.f32.mrb[73].mxu1  ;;  %3516 = vrot.lane.b32.xlu1 %v3496_v49, %s4936_s26 }
0x2f86   :  { %v3222_v52 = vadd.f32 %v3994_v18, %v3221_v26  ;;  %v4399_v48 = vpop.f32.mrb[74].mxu1 }
0x2f87   :  { %v3233_v28 = vadd.f32 %v4399_v48, %v3994_v18  ;;  %v3224_v13 = vpop.f32.mrb[75].mxu1  ;;  %v3254_v39 = vmax.f32 %v3230_v15, 0.0 }
0x2f88   :  { %v3225_v31 = vadd.f32 %v3994_v18, %v3224_v13  ;;  %v3252_v20 = vmax.f32 %v3222_v52, 0.0 }
0x2f89   :  { %v3255_v53 = vmax.f32 %v3233_v28, 0.0  ;;  %3520 = vrot.lane.b32.xlu1 %v5645_v54, %s4936_s26 }
0x2f8a   :  { %v3253_v55 = vmax.f32 %v3225_v31, 0.0 }
0x2f8b   :  { %v3261_v58 = vpack.c.bf16 %v3255_v53, %v3254_v39 }
0x2f8c   :  { %v3260_v4 = vpack.c.bf16 %v3253_v55, %v3252_v20  ;;  %v4402_v57 = vpop.f32.mrb[76].mxu1 }
0x2f8d   :  { %v3246_v63 = vadd.f32 %v4402_v57, %v3994_v18  ;;  %v3237_v59 = vpop.f32.mrb[77].mxu1  ;;  %865 = vrot.lane.b32.xlu1 %v5346_v27, %s4949_s13  ;;  %v4507_v27 = vld [vmem:[#allocation28 + $0x8] sm:$0xff]  }
0x2f8e   :  { %v3238_v60 = vadd.f32 %v3994_v18, %v3237_v59  ;;  %v4403_v50 = vpop.f32.mrb[78].mxu1 }
0x2f8f   :  { %v3249_v56 = vadd.f32 %v4403_v50, %v3994_v18  ;;  %v3240_v43 = vpop.f32.mrb[79].mxu1  ;;  %v3258_v1 = vmax.f32 %v3246_v63, 0.0 }
0x2f90   :  { %v3241_v7 = vadd.f32 %v3994_v18, %v3240_v43  ;;  %v3256_v54 = vmax.f32 %v3238_v60, 0.0 }
0x2f91   :  { %v3259_v51 = vmax.f32 %v3249_v56, 0.0  ;;  %1187 = vrot.lane.b32.xlu1 %v5406_v22, %s4949_s13 }
0x2f92   :  { %v3257_v2 = vmax.f32 %v3241_v7, 0.0 }
0x2f93   :  { %v3263_v8 = vpack.c.bf16 %v3259_v51, %v3258_v1 }
0x2f94   :  { %v3262_v14 = vpack.c.bf16 %v3257_v2, %v3256_v54 }
0x2f95   :  { %1835 = vrot.lane.b32.xlu1 %v5529_v32, %s4949_s13 }
0x2f99   :  { %2483 = vrot.lane.b32.xlu1 %v5657_v30, %s4949_s13 }
0x2feb   :  { %v3047_v9 = vpop.permute.xlu1 %3046 }
0x2fec   :  { %4389 = vmatmul.mubr.msk.bf16.vlgmr.msra.gmra.mrb[72].mxu0 %vm215_vm3, %v3047_v9 }
0x2fed   :  { %4405 = vmatpush3.bf16.msra.mxu0 %v4506_v17  ;;  %4408 = vmatprep.mubr.msk.bf16.mxu0 %vm215_vm3, %v3260_v4 }
0x2fee   :  { %4406 = vmatprep.subr.bf16.mxu0 %v4507_v27 }
0x2fef   :  { %v5858_v19 = vpop.permute.xlu1 %3508 }
0x2ff1   :  { %4407 = vmatpush3.bf16.msra.mxu0 %v4507_v27 }
0x2ff3   :  { %v5860_v22 = vpop.permute.xlu1 %3512 }
0x2ff4   :  { %4409 = vmatmul.mubr.msk.bf16.vlgmr.msra.gmra.mrb[76].mxu0 %vm215_vm3, %v3261_v58 }
0x2ff5   :  { %4412 = vmatprep.mubr.msk.bf16.mxu0 %vm215_vm3, %v3262_v14 }
0x2ff7   :  { %v5864_v32 = vpop.permute.xlu1 %3516 }
0x2ffb   :  { %v5866_v30 = vpop.permute.xlu1 %3520 }
0x2ffc   :  { %4413 = vmatmul.mubr.msk.bf16.gmra.mrb[80].mxu0 %vm215_vm3, %v3263_v8 }
0x2fff   :  { %v866_v24 = vpop.permute.xlu1 %865 }
0x3000   :  { %868 = vst.msk [vmem:[#allocation6] sm:$0xff] %vm218_vm2, %v866_v24 }
0x3003   :  { %v1188_v35 = vpop.permute.xlu1 %1187 }
0x3004   :  { %1191 = vst.msk [vmem:[#allocation6 + $0x8] sm:$0xff] %vm218_vm2, %v1188_v35 }
0x3007   :  { %v1836_v36 = vpop.permute.xlu1 %1835 }
0x3008   :  { %1839 = vst.msk [vmem:[#allocation6 + $0x18] sm:$0xff] %vm218_vm2, %v1836_v36 }
0x300b   :  { %v2484_v37 = vpop.permute.xlu1 %2483 }
0x300c   :  { %2487 = vst.msk [vmem:[#allocation6 + $0x28] sm:$0xff] %vm218_vm2, %v2484_v37 }
0x30bf   :  { %v3097_v17 = vpop.f32.mrb[72].mxu0 }
0x30c0   :  { %v5874_v38 = vadd.f32 %v5650_v0, %v3097_v17  ;;  %v4390_v40 = vpop.f32.mrb[73].mxu0 }
0x30c1   :  { %v3100_v41 = vpop.f32.mrb[74].mxu0 }
0x30c2   :  { %v3103_v42 = vand.u32 2147483647, %v5874_v38  ;;  %3129 = vst.msk [vmem:[#allocation5 + $0x38] sm:$0xff] %vm218_vm2, %v5874_v38  ;;  %v4391_v34 = vpop.f32.mrb[75].mxu0 }
0x30c4   :  { %v3104_v44 = vsub.f32 0.0, %v3103_v42 }
0x30c6   :  { %v3105_v46 = vmul.f32 1.442695, %v3104_v44 }
0x30c7   :  { %v4410_v47 = vpop.f32.mrb[76].mxu0 }
0x30c8   :  { %4584 = vpow2.f32 %v3105_v46  ;;  %v5882_v18 = vadd.f32 %v4410_v47, %v4001_v45  ;;  %v3333_v0 = vpop.f32.mrb[77].mxu0 }
0x30c9   :  { %v5884_v49 = vadd.f32 %v4001_v45, %v3333_v0  ;;  %v4411_v62 = vpop.f32.mrb[78].mxu0 }
0x30ca   :  { %v3366_v15 = vand.u32 2147483647, %v5882_v18  ;;  %v5887_v26 = vadd.f32 %v4411_v62, %v4001_v45  ;;  %3616 = vrot.lane.b32.xlu0 %v5882_v18, %s4946_s5  ;;  %v3336_v52 = vpop.f32.mrb[79].mxu0 }
0x30cb   :  { %v3364_v48 = vand.u32 2147483647, %v5884_v49  ;;  %v5892_v28 = vadd.f32 %v4001_v45, %v3336_v52 }
0x30cc   :  { %v3374_v13 = vsub.f32 0.0, %v3366_v15  ;;  %v3367_v31 = vand.u32 2147483647, %v5887_v26  ;;  %3618 = vrot.lane.b32.xlu1 %v5887_v26, %s4946_s5 }
0x30cd   :  { %v3372_v39 = vsub.f32 0.0, %v3364_v48  ;;  %v3365_v53 = vand.u32 2147483647, %v5892_v28 }
0x30ce   :  { %v3384_v20 = vmul.f32 1.442695, %v3374_v13  ;;  %v3375_v55 = vsub.f32 0.0, %v3367_v31  ;;  %3612 = vrot.lane.b32.xlu0 %v5884_v49, %s4946_s5 }
0x30cf   :  { %v3380_v58 = vmul.f32 1.442695, %v3372_v39  ;;  %v3373_v4 = vsub.f32 0.0, %v3365_v53  ;;  %v4414_v57 = vpop.f32.mrb[80].mxu0 }
0x30d0   :  { %4586 = vpow2.f32 %v3384_v20  ;;  %v3386_v63 = vmul.f32 1.442695, %v3375_v55  ;;  %v5900_v59 = vadd.f32 %v4414_v57, %v4001_v45  ;;  %v3349_v60 = vpop.f32.mrb[81].mxu0  ;;  %3614 = vrot.lane.b32.xlu1 %v5892_v28, %s4946_s5  ;;  %v3470_v57 = vmax.f32 %v5882_v18, 0.0 }
0x30d1   :  { %4588 = vpow2.f32 %v3380_v58  ;;  %v3382_v50 = vmul.f32 1.442695, %v3373_v4  ;;  %v5904_v56 = vadd.f32 %v4001_v45, %v3349_v60  ;;  %v4415_v43 = vpop.f32.mrb[82].mxu0  ;;  %v3116_v4 = vmax.f32 %v5874_v38, 0.0 }
0x30d2   :  { %v4585_v7 = vpop.eup %4584  ;;  %4590 = vpow2.f32 %v3386_v63  ;;  %v3370_v1 = vand.u32 2147483647, %v5900_v59  ;;  %v5907_v51 = vadd.f32 %v4415_v43, %v4001_v45  ;;  %v3352_v54 = vpop.f32.mrb[83].mxu0  ;;  %3624 = vrot.lane.b32.xlu0 %v5900_v59, %s4946_s5 }
0x30d3   :  { %4592 = vpow2.f32 %v3382_v50  ;;  %v3368_v2 = vand.u32 2147483647, %v5904_v56  ;;  %v5912_v8 = vadd.f32 %v4001_v45, %v3352_v54  ;;  %v3107_v9 = vadd.f32 1.0, %v4585_v7 }
0x30d4   :  { %v3378_v14 = vsub.f32 0.0, %v3370_v1  ;;  %v3371_v27 = vand.u32 2147483647, %v5907_v51  ;;  %3626 = vrot.lane.b32.xlu1 %v5907_v51, %s4946_s5  ;;  %v3110_v34 = vmul.f32 -0.5, %v4585_v7  ;;  %v3113_v48 = vand.u32 2147483647, %v4585_v7 }
0x30d5   :  { %v3376_v24 = vsub.f32 0.0, %v3368_v2  ;;  %v3369_v35 = vand.u32 2147483647, %v5912_v8  ;;  %4594 = vlog2.f32 %v3107_v9 }
0x30d6   :  { %v3392_v36 = vmul.f32 1.442695, %v3378_v14  ;;  %v3379_v37 = vsub.f32 0.0, %v3371_v27  ;;  %3620 = vrot.lane.b32.xlu0 %v5904_v56, %s4946_s5  ;;  %v3111_v15 = vadd.f32 1.0, %v3110_v34  ;;  %vm3114_vm13 = vcmp.lt.f32.partialorder %v3113_v48, 0.0004427343 }
0x30d7   :  { %v3388_v17 = vmul.f32 1.442695, %v3376_v24  ;;  %v3377_v40 = vsub.f32 0.0, %v3369_v35  ;;  %v3471_v24 = vmax.f32 %v5887_v26, 0.0 }
0x30d8   :  { %4596 = vpow2.f32 %v3392_v36  ;;  %v3394_v41 = vmul.f32 1.442695, %v3379_v37  ;;  %3622 = vrot.lane.b32.xlu1 %v5912_v8, %s4946_s5  ;;  %v3112_v55 = vmul.f32 %v4585_v7, %v3111_v15  ;;  %v3468_v7 = vmax.f32 %v5884_v49, 0.0 }
0x30d9   :  { %4598 = vpow2.f32 %v3388_v17  ;;  %v3390_v42 = vmul.f32 1.442695, %v3377_v40  ;;  %v3469_v17 = vmax.f32 %v5892_v28, 0.0 }
0x30da   :  { %v4587_v44 = vpop.eup %4586  ;;  %4600 = vpow2.f32 %v3394_v41 }
0x30db   :  { %v5922_v45 = vpop.eup %4588  ;;  %v3414_v46 = vadd.f32 1.0, %v4587_v44  ;;  %4602 = vpow2.f32 %v3390_v42  ;;  %v3417_v13 = vmul.f32 -0.5, %v4587_v44  ;;  %v3420_v1 = vand.u32 2147483647, %v4587_v44 }
0x30dc   :  { %v5924_v47 = vpop.eup %4590  ;;  %v3396_v0 = vadd.f32 1.0, %v5922_v45  ;;  %v3399_v53 = vmul.f32 -0.5, %v5922_v45  ;;  %v3402_v42 = vand.u32 2147483647, %v5922_v45 }
0x30dd   :  { %v5927_v62 = vpop.eup %4592  ;;  %4604 = vlog2.f32 %v3414_v46  ;;  %v3423_v52 = vadd.f32 1.0, %v5924_v47  ;;  %v3426_v63 = vmul.f32 -0.5, %v5924_v47  ;;  %v3418_v43 = vadd.f32 1.0, %v3417_v13 }
0x30de   :  { %4606 = vlog2.f32 %v3396_v0  ;;  %v3405_v31 = vadd.f32 1.0, %v5927_v62  ;;  %v3400_v27 = vadd.f32 1.0, %v3399_v53  ;;  %v3408_v9 = vmul.f32 -0.5, %v5927_v62 }
0x30df   :  { %4608 = vlog2.f32 %v3423_v52  ;;  %v4595_v39 = vpop.eup %4594  ;;  %v3427_v41 = vadd.f32 1.0, %v3426_v63  ;;  %v3419_v46 = vmul.f32 %v4587_v44, %v3418_v43  ;;  %vm5951_vm14 = vcmp.lt.f32.partialorder %v3420_v1, 0.0004427343 }
0x30e0   :  { %v3109_v20 = vmul.f32 0.6931472, %v4595_v39  ;;  %4610 = vlog2.f32 %v3405_v31  ;;  %v3429_v15 = vand.u32 2147483647, %v5924_v47  ;;  %v3401_v31 = vmul.f32 %v5922_v45, %v3400_v27 }
0x30e1   :  { %v3409_v39 = vadd.f32 1.0, %v3408_v9  ;;  %v3411_v44 = vand.u32 2147483647, %v5927_v62  ;;  %vm3403_vm15 = vcmp.lt.f32.partialorder %v3402_v42, 0.0004427343 }
0x30e2   :  { %v5932_v58 = vpop.eup %4596  ;;  %v3115_v50 = vsel %vm3114_vm13, %v3112_v55, %v3109_v20  ;;  %vm3430_vm0 = vcmp.lt.f32.partialorder %v3429_v15, 0.0004427343 }
0x30e3   :  { %v5937_v60 = vpop.eup %4598  ;;  %v3450_v54 = vadd.f32 1.0, %v5932_v58  ;;  %v3117_v14 = vadd.f32 %v3116_v4, %v3115_v50  ;;  %v3428_v50 = vmul.f32 %v5924_v47, %v3427_v41  ;;  %v3453_v27 = vmul.f32 -0.5, %v5932_v58 }
0x30e4   :  { %v5940_v2 = vpop.eup %4600  ;;  %v3432_v36 = vadd.f32 1.0, %v5937_v60  ;;  %vm3412_vm1 = vcmp.lt.f32.partialorder %v3411_v44, 0.0004427343  ;;  %v3456_v15 = vand.u32 2147483647, %v5932_v58 }
0x30e5   :  { %4612 = vlog2.f32 %v3450_v54  ;;  %v3459_v35 = vadd.f32 1.0, %v5940_v2  ;;  %v5947_v37 = vpop.eup %4602  ;;  %v3118_v40 = vadd.f32 0.1, %v3117_v14  ;;  %v3410_v14 = vmul.f32 %v5927_v62, %v3409_v39 }
0x30e6   :  { %v3441_v55 = vadd.f32 1.0, %v5947_v37  ;;  %v3454_v42 = vadd.f32 1.0, %v3453_v27  ;;  %vm5978_vm4 = vcmp.lt.f32.partialorder %v3456_v15, 0.0004427343  ;;  %v3475_v27 = vmax.f32 %v5907_v51, 0.0 }
0x30e7   :  { %v4605_v34 = vpop.eup %4604  ;;  %4614 = vlog2.f32 %v3459_v35  ;;  %3131 = vrot.lane.b32.xlu1 %v3118_v40, %s4949_s13  ;;  %v3122_v48 = vmul.f32 %v5788_v61, %v3118_v40 }
0x30e8   :  { %v4607_v52 = vpop.eup %4606  ;;  %v3416_v13 = vmul.f32 0.6931472, %v4605_v34  ;;  %4616 = vlog2.f32 %v3432_v36  ;;  %v3462_v34 = vmul.f32 -0.5, %v5940_v2 }
0x30e9   :  { %v4609_v53 = vpop.eup %4608  ;;  %v3398_v20 = vmul.f32 0.6931472, %v4607_v52  ;;  %3124 = vrot.lane.b32.xlu0 %v3122_v48, %s4949_s13  ;;  %4618 = vlog2.f32 %v3441_v55  ;;  %v3444_v52 = vmul.f32 -0.5, %v5947_v37  ;;  %v3597_v55 = vld [vmem:[#allocation7 + $0x8] sm:$0xff] }
0x30ea   :  { %v3422_v4 = vsel %vm5951_vm14, %v3419_v46, %v3416_v13  ;;  %v3425_v63 = vmul.f32 0.6931472, %v4609_v53  ;;  %v4611_v61 = vpop.eup %4610  ;;  %v3435_v46 = vmul.f32 -0.5, %v5937_v60 }
0x30eb   :  { %v3478_v43 = vadd.f32 %v3470_v57, %v3422_v4  ;;  %v3404_v45 = vsel %vm3403_vm15, %v3401_v31, %v3398_v20  ;;  %v3407_v54 = vmul.f32 0.6931472, %v4611_v61  ;;  %v3465_v31 = vand.u32 2147483647, %v5940_v2 }
0x30ec   :  { %v3431_v1 = vsel %vm3430_vm0, %v3428_v50, %v3425_v63  ;;  %v3476_v36 = vadd.f32 %v3468_v7, %v3404_v45  ;;  %v3463_v7 = vadd.f32 1.0, %v3462_v34  ;;  %v3436_v53 = vadd.f32 1.0, %v3435_v46 }
0x30ed   :  { %v3486_v9 = vadd.f32 0.1, %v3478_v43  ;;  %v3479_v35 = vadd.f32 %v3471_v24, %v3431_v1  ;;  %v3413_v40 = vsel %vm3412_vm1, %v3410_v14, %v3407_v54  ;;  %v3438_v4 = vand.u32 2147483647, %v5937_v60 }
0x30ee   :  { %v3477_v41 = vadd.f32 %v3469_v17, %v3413_v40  ;;  %v3484_v62 = vadd.f32 0.1, %v3476_v36  ;;  %v3455_v17 = vmul.f32 %v5932_v58, %v3454_v42  ;;  %v3464_v50 = vmul.f32 %v5940_v2, %v3463_v7  ;;  %v3581_v7 = vld [vmem:[#allocation5 + $0x8] sm:$0xff] }
0x30ef   :  { %v4613_v47 = vpop.eup %4612  ;;  %3648 = vrot.lane.b32.xlu0 %v3486_v9, %s4946_s5  ;;  %v3487_v57 = vadd.f32 0.1, %v3479_v35  ;;  %v3534_v44 = vmul.f32 %v5860_v22, %v3486_v9  ;;  %v3445_v58 = vadd.f32 1.0, %v3444_v52  ;;  %v3474_v43 = vmax.f32 %v5900_v59, 0.0  ;;  %v3583_v52 = vld [vmem:[#allocation5 + $0x18] sm:$0xff] }
0x30f0   :  { %v3452_v24 = vmul.f32 0.6931472, %v4613_v47  ;;  %v3485_v13 = vadd.f32 0.1, %v3477_v41  ;;  %vm3466_vm5 = vcmp.lt.f32.partialorder %v3465_v31, 0.0004427343  ;;  %v3437_v54 = vmul.f32 %v5937_v60, %v3436_v53 }
0x30f1   :  { %v4615_v0 = vpop.eup %4614  ;;  %3650 = vrot.lane.b32.xlu1 %v3487_v57, %s4946_s5  ;;  %v3535_v45 = vmul.f32 %v5792_v5, %v3487_v57  ;;  %v3447_v22 = vand.u32 2147483647, %v5947_v37  ;;  %v3532_v2 = vmul.f32 %v5858_v19, %v3484_v62  ;;  %vm3439_vm6 = vcmp.lt.f32.partialorder %v3438_v4, 0.0004427343  ;;  %v3589_v31 = vld [vmem:[#allocation6 + $0x8] sm:$0xff]  ;;  %v3592_v53 = vld [vmem:[#allocation6 + $0x20] sm:$0xff] }
0x30f2   :  { %v4617_v48 = vpop.eup %4616  ;;  %v3461_v39 = vmul.f32 0.6931472, %v4615_v0  ;;  %v3458_v63 = vsel %vm5978_vm4, %v3455_v17, %v3452_v24  ;;  %v3446_v36 = vmul.f32 %v5947_v37, %v3445_v58  ;;  %v3472_v5 = vmax.f32 %v5904_v56, 0.0  ;;  %v3580_v24 = vld [vmem:[#allocation5] sm:$0xff]  ;;  %v3590_v17 = vld [vmem:[#allocation6 + $0x10] sm:$0xff] }
0x30f3   :  { %3644 = vrot.lane.b32.xlu0 %v3484_v62, %s4946_s5  ;;  %v4619_v20 = vpop.eup %4618  ;;  %v3434_v61 = vmul.f32 0.6931472, %v4617_v48  ;;  %v3482_v9 = vadd.f32 %v3474_v43, %v3458_v63  ;;  %v3533_v40 = vmul.f32 %v5790_v3, %v3485_v13  ;;  %vm3448_vm7 = vcmp.lt.f32.partialorder %v3447_v22, 0.0004427343  ;;  %v3585_v48 = vld [vmem:[#allocation5 + $0x28] sm:$0xff]  ;;  %v3596_v4 = vld [vmem:[#allocation7] sm:$0xff] }
0x30f4   :  { %v3467_v1 = vsel %vm3466_vm5, %v3464_v50, %v3461_v39  ;;  %v3443_v14 = vmul.f32 0.6931472, %v4619_v20  ;;  %v3473_v47 = vmax.f32 %v5912_v8, 0.0  ;;  %v3591_v39 = vld [vmem:[#allocation6 + $0x18] sm:$0xff]  ;;  %v3593_v20 = vld [vmem:[#allocation6 + $0x28] sm:$0xff]  ;;  %v3598_v50 = vld [vmem:[#allocation7 + $0x10] sm:$0xff] }
0x30f5   :  { %3646 = vrot.lane.b32.xlu1 %v3485_v13, %s4946_s5  ;;  %v3440_v35 = vsel %vm3439_vm6, %v3437_v54, %v3434_v61  ;;  %v3483_v34 = vadd.f32 %v3475_v27, %v3467_v1  ;;  %v3490_v57 = vadd.f32 0.1, %v3482_v9  ;;  %v3587_v13 = vld [vmem:[#allocation5 + $0x38] sm:$0xff]  ;;  %v3601_v61 = vld [vmem:[#allocation7 + $0x28] sm:$0xff]  ;;  %v3600_v58 = vld [vmem:[#allocation7 + $0x20] sm:$0xff] }
0x30f6   :  { %v3449_v60 = vsel %vm3448_vm7, %v3446_v36, %v3443_v14  ;;  %v3480_v19 = vadd.f32 %v3472_v5, %v3440_v35  ;;  %v3599_v63 = vld [vmem:[#allocation7 + $0x18] sm:$0xff] }
0x30f7   :  { %3552 = vrot.lane.b32.xlu0 %v3534_v44, %s4949_s13  ;;  %v3491_v41 = vadd.f32 0.1, %v3483_v34  ;;  %v3481_v42 = vadd.f32 %v3473_v47, %v3449_v60  ;;  %v3538_v3 = vmul.f32 %v5866_v30, %v3490_v57  ;;  %v3582_v30 = vld [vmem:[#allocation5 + $0x10] sm:$0xff] }
0x30f8   :  { %v3488_v37 = vadd.f32 0.1, %v3480_v19  ;;  %v3594_v44 = vld [vmem:[#allocation6 + $0x30] sm:$0xff] }
0x30f9   :  { %3554 = vrot.lane.b32.xlu1 %v3535_v45, %s4949_s13  ;;  %v3489_v46 = vadd.f32 0.1, %v3481_v42  ;;  %v3539_v0 = vmul.f32 %v5796_v25, %v3491_v41  ;;  %v3584_v25 = vld [vmem:[#allocation5 + $0x20] sm:$0xff] }
0x30fa   :  { %v3536_v62 = vmul.f32 %v5864_v32, %v3488_v37  ;;  %v3586_v32 = vld [vmem:[#allocation5 + $0x30] sm:$0xff] }
0x30fb   :  { %3548 = vrot.lane.b32.xlu0 %v3532_v2, %s4949_s13  ;;  %v3537_v15 = vmul.f32 %v5794_v6, %v3489_v46  ;;  %v3588_v6 = vld [vmem:[#allocation6] sm:$0xff] }
0x30fd   :  { %3550 = vrot.lane.b32.xlu1 %v3533_v40, %s4949_s13 }
0x30ff   :  { %3656 = vrot.lane.b32.xlu0 %v3490_v57, %s4946_s5 }
0x3101   :  { %3658 = vrot.lane.b32.xlu1 %v3491_v41, %s4946_s5 }
0x3103   :  { %3652 = vrot.lane.b32.xlu0 %v3488_v37, %s4946_s5 }
0x3105   :  { %3654 = vrot.lane.b32.xlu1 %v3489_v46, %s4946_s5 }
0x3107   :  { %3560 = vrot.lane.b32.xlu0 %v3538_v3, %s4949_s13 }
0x3109   :  { %3562 = vrot.lane.b32.xlu1 %v3539_v0, %s4949_s13 }
0x310b   :  { %3556 = vrot.lane.b32.xlu0 %v3536_v62, %s4949_s13 }
0x310d   :  { %3558 = vrot.lane.b32.xlu1 %v3537_v15, %s4949_s13 }
0x310f   :  { %3708 = vrot.lane.b32.xlu0 %v3580_v24, %s4950_s17 }
0x3111   :  { %3710 = vrot.lane.b32.xlu1 %v3581_v7, %s4950_s17 }
0x3113   :  { %3712 = vrot.lane.b32.xlu0 %v3582_v30, %s4950_s17 }
0x3115   :  { %3714 = vrot.lane.b32.xlu1 %v3583_v52, %s4950_s17 }
0x3117   :  { %3716 = vrot.lane.b32.xlu0 %v3584_v25, %s4950_s17 }
0x3119   :  { %3718 = vrot.lane.b32.xlu1 %v3585_v48, %s4950_s17 }
0x311b   :  { %3720 = vrot.lane.b32.xlu0 %v3586_v32, %s4950_s17 }
0x311d   :  { %3722 = vrot.lane.b32.xlu1 %v3587_v13, %s4950_s17 }
0x311f   :  { %3740 = vrot.lane.b32.xlu0 %v3588_v6, %s4947_s10 }
0x3121   :  { %3742 = vrot.lane.b32.xlu1 %v3589_v31, %s4947_s10 }
0x3123   :  { %3744 = vrot.lane.b32.xlu0 %v3590_v17, %s4947_s10 }
0x3125   :  { %3746 = vrot.lane.b32.xlu1 %v3591_v39, %s4947_s10 }
0x3127   :  { %3748 = vrot.lane.b32.xlu0 %v3592_v53, %s4947_s10 }
0x3129   :  { %3750 = vrot.lane.b32.xlu1 %v3593_v20, %s4947_s10  ;;  %v3602_v20 = vld [vmem:[#allocation7 + $0x30] sm:$0xff] }
0x312b   :  { %3752 = vrot.lane.b32.xlu0 %v3594_v44, %s4947_s10 }
0x312d   :  { %3774 = vrot.lane.b32.xlu1 %v3597_v55, %s4949_s13 }
0x312f   :  { %3772 = vrot.lane.b32.xlu0 %v3596_v4, %s4949_s13 }
0x3131   :  { %3778 = vrot.lane.b32.xlu1 %v3599_v63, %s4949_s13 }
0x3133   :  { %3776 = vrot.lane.b32.xlu0 %v3598_v50, %s4949_s13 }
0x3135   :  { %3782 = vrot.lane.b32.xlu1 %v3601_v61, %s4949_s13 }
0x3137   :  { %3780 = vrot.lane.b32.xlu0 %v3600_v58, %s4949_s13 }
0x313c   :  { %v3617_v45 = vpop.permute.xlu0 %3616 }
0x313d   :  { %v3798_v5 = vsel %vm215_vm3, %v5815_v10, %v3617_v45 }
0x313e   :  { %v3619_v43 = vpop.permute.xlu1 %3618 }
0x313f   :  { %v3799_v47 = vsel %vm215_vm3, %v5817_v16, %v3619_v43 }
0x3140   :  { %v3613_v1 = vpop.permute.xlu0 %3612 }
0x3141   :  { %v3796_v19 = vsel %vm215_vm3, %v5807_v11, %v3613_v1 }
0x3142   :  { %v3615_v22 = vpop.permute.xlu1 %3614 }
0x3143   :  { %v3797_v42 = vsel %vm215_vm3, %v5809_v12, %v3615_v22 }
0x3144   :  { %v3625_v14 = vpop.permute.xlu0 %3624 }
0x3145   :  { %v3802_v7 = vsel %vm215_vm3, %v5831_v29, %v3625_v14 }
0x3146   :  { %v3627_v54 = vpop.permute.xlu1 %3626 }
0x3148   :  { %v3621_v2 = vpop.permute.xlu0 %3620 }
0x314a   :  { %v3623_v27 = vpop.permute.xlu1 %3622 }
0x314b   :  { %v3801_v29 = vsel %vm215_vm3, %v5826_v23, %v3623_v27 }
0x3159   :  { %v3132_v9 = vpop.permute.xlu1 %3131 }
0x315a   :  { %3135 = vst.msk [vmem:[#allocation6 + $0x38] sm:$0xff] %vm218_vm2, %v3132_v9 }
0x315b   :  { %v3125_v35 = vpop.permute.xlu0 %3124 }
0x315c   :  { %v3127_v36 = vadd.f32 %v3125_v35, %v5874_v38 }
0x315e   :  { %3137 = vst.msk [vmem:[#allocation7 + $0x38] sm:$0xff] %vm218_vm2, %v3127_v36  ;;  %3139 = vst.msk [vmem:[#allocation3] sm:$0xff] %vm218_vm2, %v3127_v36  ;;  %vm3813_vm2 = vcmask 523264  }
0x3161   :  { %v3649_v40 = vpop.permute.xlu0 %3648  ;;  %v3595_v60 = vld [vmem:[#allocation6 + $0x38] sm:$0xff] }
0x3162   :  { %v6032_v34 = vsel %vm3804_vm8, %v3798_v5, %v3649_v40  ;;  %3754 = vrot.lane.b32.xlu1 %v3595_v60, %s4947_s10 }
0x3163   :  { %v3651_v57 = vpop.permute.xlu1 %3650 }
0x3164   :  { %v6038_v38 = vsel %vm3804_vm8, %v3799_v47, %v3651_v57 }
0x3165   :  { %v3645_v41 = vpop.permute.xlu0 %3644 }
0x3166   :  { %v6043_v10 = vsel %vm3804_vm8, %v3796_v19, %v3645_v41 }
0x3167   :  { %v3647_v37 = vpop.permute.xlu1 %3646 }
0x3168   :  { %v6048_v46 = vsel %vm3804_vm8, %v3797_v42, %v3647_v37 }
0x3169   :  { %v3553_v16 = vpop.permute.xlu0 %3552 }
0x316a   :  { %v3574_v3 = vadd.f32 %v3553_v16, %v5882_v18 }
0x316b   :  { %v3555_v0 = vpop.permute.xlu1 %3554 }
0x316c   :  { %v3575_v62 = vadd.f32 %v3555_v0, %v5887_v26  ;;  %3680 = vrot.lane.b32.xlu0 %v3574_v3, %s4928_s28  ;;  %v3803_v26 = vsel %vm215_vm3, %v5833_v33, %v3627_v54 }
0x316d   :  { %v3549_v11 = vpop.permute.xlu0 %3548 }
0x316e   :  { %v3572_v15 = vadd.f32 %v3549_v11, %v5884_v49  ;;  %3682 = vrot.lane.b32.xlu1 %v3575_v62, %s4928_s28 }
0x316f   :  { %v3551_v24 = vpop.permute.xlu1 %3550 }
0x3170   :  { %v3573_v12 = vadd.f32 %v3551_v24, %v5892_v28  ;;  %3676 = vrot.lane.b32.xlu0 %v3572_v15, %s4928_s28  ;;  %v3800_v28 = vsel %vm215_vm3, %v5824_v21, %v3621_v2  ;;  %vm3822_vm3 = vcmask 654336  }
0x3171   :  { %v3657_v30 = vpop.permute.xlu0 %3656 }
0x3172   :  { %v6060_v18 = vsel %vm3804_vm8, %v3802_v7, %v3657_v30  ;;  %3678 = vrot.lane.b32.xlu1 %v3573_v12, %s4928_s28 }
0x3173   :  { %v3659_v49 = vpop.permute.xlu1 %3658 }
0x3174   :  { %v6066_v52 = vsel %vm3804_vm8, %v3803_v26, %v3659_v49 }
0x3175   :  { %v3653_v25 = vpop.permute.xlu0 %3652 }
0x3176   :  { %v6071_v48 = vsel %vm3804_vm8, %v3800_v28, %v3653_v25 }
0x3177   :  { %v3655_v32 = vpop.permute.xlu1 %3654 }
0x3178   :  { %v6076_v13 = vsel %vm3804_vm8, %v3801_v29, %v3655_v32 }
0x3179   :  { %v3561_v6 = vpop.permute.xlu0 %3560 }
0x317a   :  { %v3578_v33 = vadd.f32 %v3561_v6, %v5900_v59  ;;  %v3603_v59 = vld [vmem:[#allocation7 + $0x38] sm:$0xff] }
0x317b   :  { %v3563_v31 = vpop.permute.xlu1 %3562 }
0x317c   :  { %v3579_v17 = vadd.f32 %v3563_v31, %v5907_v51  ;;  %3688 = vrot.lane.b32.xlu0 %v3578_v33, %s4928_s28 }
0x317d   :  { %v3557_v21 = vpop.permute.xlu0 %3556 }
0x317e   :  { %v3576_v39 = vadd.f32 %v3557_v21, %v5904_v56  ;;  %3690 = vrot.lane.b32.xlu1 %v3579_v17, %s4928_s28 }
0x317f   :  { %v3559_v53 = vpop.permute.xlu1 %3558 }
0x3180   :  { %v3577_v23 = vadd.f32 %v3559_v53, %v5912_v8  ;;  %3684 = vrot.lane.b32.xlu0 %v3576_v39, %s4928_s28 }
0x3181   :  { %v3709_v51 = vpop.permute.xlu0 %3708 }
0x3182   :  { %3686 = vrot.lane.b32.xlu1 %v3577_v23, %s4928_s28  ;;  %s4951_s28 = smov [#allocation30]  }
0x3183   :  { %v3711_v44 = vpop.permute.xlu1 %3710  ;;  %s3862_s5 = sshll.u32 %s4951_s28, 4  ;;  %s3863_s5 = int_to_ptr.vmem [resolvable:$true] %s3862_s5 }
0x3184   :  { %3784 = vrot.lane.b32.xlu0 %v3602_v20, %s4949_s13  ;;  %s4888_s10 = scalar_lea.vmem %s3863_s5, 1024  ;;  %p4893_p13 = scmp.lt.s32.totalorder %s3863_s5, %s3863_s5 }
0x3185   :  { %v3713_v55 = vpop.permute.xlu0 %3712  ;;  %p4889_p12 = scmp.ne.s32.totalorder %s3863_s5, %s4888_s10  ;;  %p4894_p0 = scmp.lt.s32.totalorder %s4888_s10, %s4888_s10 }
0x3186   :  { %3786 = vrot.lane.b32.xlu1 %v3603_v59, %s4949_s13 }
0x3187   :  { %v3715_v4 = vpop.permute.xlu1 %3714  ;;  %p4895_p1 = por %p4894_p0, %p4893_p13 }
0x3189   :  { %v3717_v56 = vpop.permute.xlu0 %3716  ;;  %p4896_p2 = pnand %p4895_p1, %p4889_p12 }
0x318b   :  { %v3719_v63 = vpop.permute.xlu1 %3718 }
0x318d   :  { %v3721_v50 = vpop.permute.xlu0 %3720 }
0x318f   :  { %v3723_v61 = vpop.permute.xlu1 %3722 }
0x3191   :  { %v3741_v58 = vpop.permute.xlu0 %3740 }
0x3193   :  { %v3743_v8 = vpop.permute.xlu1 %3742 }
0x3195   :  { %v3745_v43 = vpop.permute.xlu0 %3744 }
0x3197   :  { %v3747_v45 = vpop.permute.xlu1 %3746 }
0x3199   :  { %v3749_v22 = vpop.permute.xlu0 %3748 }
0x319b   :  { %v3751_v1 = vpop.permute.xlu1 %3750 }
0x319d   :  { %v3753_v54 = vpop.permute.xlu0 %3752 }
0x319f   :  { %v3775_v14 = vpop.permute.xlu1 %3774 }
0x31a1   :  { %v3773_v27 = vpop.permute.xlu0 %3772 }
0x31a3   :  { %v3779_v2 = vpop.permute.xlu1 %3778 }
0x31a5   :  { %v3777_v9 = vpop.permute.xlu0 %3776 }
0x31a7   :  { %v3783_v35 = vpop.permute.xlu1 %3782 }
0x31a9   :  { %v3781_v36 = vpop.permute.xlu0 %3780 }
0x31d4   :  { %v3755_v5 = vpop.permute.xlu1 %3754 }
0x31de   :  { %v3681_v40 = vpop.permute.xlu0 %3680 }
0x31df   :  { %v3816_v60 = vsel %vm3813_vm2, %v6032_v34, %v3681_v40 }
0x31e0   :  { %v3825_v47 = vsel %vm3822_vm3, %v3816_v60, %v3713_v55  ;;  %v3683_v57 = vpop.permute.xlu1 %3682 }
0x31e1   :  { %v3834_v19 = vsel %vm3831_vm9, %v3825_v47, %v3745_v43  ;;  %v3817_v41 = vsel %vm3813_vm2, %v6038_v38, %v3683_v57 }
0x31e2   :  { %v3843_v42 = vsel %vm3840_vm10, %v3834_v19, %v3777_v9  ;;  %v3826_v37 = vsel %vm3822_vm3, %v3817_v41, %v3715_v4  ;;  %v3677_v16 = vpop.permute.xlu0 %3676 }
0x31e3   :  { %3851 = vst [vmem:[#allocation30 + $0x10] sm:$0xff] %v3843_v42  ;;  %v3835_v3 = vsel %vm3831_vm9, %v3826_v37, %v3747_v45  ;;  %v3814_v0 = vsel %vm3813_vm2, %v6043_v10, %v3677_v16 }
0x31e4   :  { %v3844_v34 = vsel %vm3840_vm10, %v3835_v3, %v3779_v2  ;;  %v3823_v62 = vsel %vm3822_vm3, %v3814_v0, %v3709_v51  ;;  %v3679_v11 = vpop.permute.xlu1 %3678 }
0x31e5   :  { %3852 = vst [vmem:[#allocation30 + $0x18] sm:$0xff] %v3844_v34  ;;  %v3832_v15 = vsel %vm3831_vm9, %v3823_v62, %v3741_v58  ;;  %v3815_v38 = vsel %vm3813_vm2, %v6048_v46, %v3679_v11 }
0x31e6   :  { %v3841_v24 = vsel %vm3840_vm10, %v3832_v15, %v3773_v27  ;;  %v3824_v12 = vsel %vm3822_vm3, %v3815_v38, %v3711_v44 }
0x31e7   :  { %3849 = vst [vmem:[#allocation30] sm:$0xff] %v3841_v24  ;;  %v3833_v7 = vsel %vm3831_vm9, %v3824_v12, %v3743_v8 }
0x31e8   :  { %v3842_v10 = vsel %vm3840_vm10, %v3833_v7, %v3775_v14 }
0x31e9   :  { %3850 = vst [vmem:[#allocation30 + $0x8] sm:$0xff] %v3842_v10 }
0x31ee   :  { %v3689_v30 = vpop.permute.xlu0 %3688 }
0x31ef   :  { %v3820_v26 = vsel %vm3813_vm2, %v6060_v18, %v3689_v30 }
0x31f0   :  { %v3691_v49 = vpop.permute.xlu1 %3690  ;;  %v3829_v46 = vsel %vm3822_vm3, %v3820_v26, %v3721_v50 }
0x31f1   :  { %v3821_v28 = vsel %vm3813_vm2, %v6066_v52, %v3691_v49  ;;  %v3838_v21 = vsel %vm3831_vm9, %v3829_v46, %v3753_v54 }
0x31f2   :  { %v3685_v25 = vpop.permute.xlu0 %3684  ;;  %v3830_v33 = vsel %vm3822_vm3, %v3821_v28, %v3723_v61 }
0x31f3   :  { %v3818_v29 = vsel %vm3813_vm2, %v6071_v48, %v3685_v25  ;;  %v3839_v20 = vsel %vm3831_vm9, %v3830_v33, %v3755_v5 }
0x31f4   :  { %v3827_v32 = vsel %vm3822_vm3, %v3818_v29, %v3717_v56  ;;  %v3687_v6 = vpop.permute.xlu1 %3686 }
0x31f5   :  { %v3836_v31 = vsel %vm3831_vm9, %v3827_v32, %v3749_v22  ;;  %v3819_v18 = vsel %vm3813_vm2, %v6076_v13, %v3687_v6 }
0x31f6   :  { %v3845_v52 = vsel %vm3840_vm10, %v3836_v31, %v3781_v36  ;;  %v3828_v17 = vsel %vm3822_vm3, %v3819_v18, %v3719_v63  ;;  %v3785_v39 = vpop.permute.xlu0 %3784 }
0x31f7   :  { %3853 = vst [vmem:[#allocation30 + $0x20] sm:$0xff] %v3845_v52  ;;  %v3837_v48 = vsel %vm3831_vm9, %v3828_v17, %v3751_v1  ;;  %v3847_v53 = vsel %vm3840_vm10, %v3838_v21, %v3785_v39 }
0x31f8   :  { %v3846_v23 = vsel %vm3840_vm10, %v3837_v48, %v3783_v35  ;;  %3855 = vst [vmem:[#allocation30 + $0x30] sm:$0xff] %v3847_v53  ;;  %v3787_v13 = vpop.permute.xlu1 %3786 }
0x31f9   :  { %3854 = vst [vmem:[#allocation30 + $0x28] sm:$0xff] %v3846_v23  ;;  %v3848_v59 = vsel %vm3840_vm10, %v3839_v20, %v3787_v13 }
0x31fa   :  { %3856 = vst [vmem:[#allocation30 + $0x38] sm:$0xff] %v3848_v59 }
0x31fb   :  { %4899 = shalt.err (!%p4896_p2)
}
0x31fc   :  { %s6177_s2 = sld [smem:[#allocation42_spill]] }
0x3202   :  { %s4900_s19 = scalar_lea.hbm %s6177_s2, 1024 }
0x3203   :  { %p4901_p3 = scmp.ne.s32.totalorder %s6177_s2, %s4900_s19  ;;  %p4904_p4 = scmp.lt.u32.totalorder %s4900_s19, %s6177_s2 }
0x3205   :  { %p4906_p5 = pnand %p4904_p4, %p4901_p3 }
0x3207   :  { %4909 = shalt.err (!%p4906_p5)
}
0x3208   :  { %3868 = dma.vmem_to_hbm [thread:$0]  %s3863_s5, 1024, %s6177_s2, [#allocation12], %s4935_s23, %s4935_s23, %s4936_s26  }
0x3209   :  { %4924 = dma.done.wait [#allocation12], 1024  }
0x320a   :  { %4925 = vsyncadd [#allocation12], 4294966272 }
0x320b   :  { %3872 = vsyncpa [#allocation11], 1 }
0x320c   :  { %3873 = vsyncpa [#allocation14], 1 }
0x320d   :  { %3874 = vsyncpa [#allocation17], 1 }
0x320e   :  { %3875 = vsyncpa [#allocation20], 1 }
0x320f   :  { %3876 = vsyncpa [#allocation23], 1 }
0x3210   :  { %3877 = vsyncpa [#allocation26], 1 }
0x3211   :  { %3878 = vsyncpa [#allocation29], 1 }
0x3212   :  { %3879 = vsyncpa [#allocation12], 1 }

</bundles_post_ra>
